<compile_context>
chip_gen: v7x
topology: tpu7x:2x2x1
jax: 0.10.0
libtpu: 0.0.40
codegen_flags: <defaults>
</compile_context>

<pallas_src>
import functools

import jax
import jax.numpy as jnp
from jax.experimental import pallas as pl
from jax.experimental.pallas import tpu as pltpu

LN_EPS = 1e-5

PARAM_ORDER = (
    "ln1_g", "ln1_b",                      # norm1
    "w_qkv",                               # self_attn.qkv (no bias)
    "w_sproj", "b_sproj",                  # self_attn.proj
    "lnq_g", "lnq_b",                      # norm_q
    "lnv_g", "lnv_b",                      # norm_v
    "w_cq", "w_ck", "w_cv",                # cross attn q/k/v maps (no bias)
    "w_cproj", "b_cproj",                  # cross attn proj
    "ln2_g", "ln2_b",                      # norm2
    "w_fc1", "b_fc1", "w_fc2", "b_fc2",    # mlp
)

# Matrix weights become bf16 MXU operands; LN params / biases stay f32.
BF16_PARAMS = frozenset(
    {"w_qkv", "w_sproj", "w_cq", "w_ck", "w_cv", "w_cproj", "w_fc1", "w_fc2"})


# ---------------------------------------------------------------------------
# In-kernel math helpers (pure jnp, lower to VPU/EUP/XLU/MXU ops)
# ---------------------------------------------------------------------------
def _erf(x):
    # Abramowitz & Stegun 7.1.26 rational approximation, |err| < 1.5e-7.
    sgn = jnp.where(x >= 0.0, 1.0, -1.0)
    ax = jnp.abs(x)
    t = 1.0 / (1.0 + 0.3275911 * ax)
    poly = t * (0.254829592 + t * (-0.284496736 + t * (1.421413741
           + t * (-1.453152027 + t * 1.061405429))))
    return sgn * (1.0 - poly * jnp.exp(-ax * ax))


def _gelu_exact(x):
    # Matches torch.nn.GELU() (erf-based "exact" GELU); kept in f32.
    return 0.5 * x * (1.0 + _erf(x * 0.7071067811865476))


def _layernorm(x, g, b):
    mu = jnp.mean(x, axis=-1, keepdims=True)
    xc = x - mu
    var = jnp.mean(xc * xc, axis=-1, keepdims=True)
    return xc * jax.lax.rsqrt(var + LN_EPS) * g + b


def _softmax(s):
    m = jnp.max(s, axis=-1, keepdims=True)
    e = jnp.exp(s - m)
    return e * pl.reciprocal(jnp.sum(e, axis=-1, keepdims=True), approx=True)


def _mha(q_all, k_all, v_all, num_heads, head_dim, scale):
    """Per-head attention over 2-D (N, C) operands. Head outputs are built as
    register values and concatenated once along channels (lane-dense), with
    bf16 MXU operands and f32 accumulation."""
    outs = []
    for h in range(num_heads):
        lo = h * head_dim
        qh = q_all[:, lo:lo + head_dim].astype(jnp.bfloat16)   # (Nq, hd)
        kh = k_all[:, lo:lo + head_dim].astype(jnp.bfloat16)   # (Nk, hd)
        vh = v_all[:, lo:lo + head_dim].astype(jnp.bfloat16)   # (Nk, hd)
        s = jax.lax.dot_general(qh, kh, (((1,), (1,)), ((), ())),
                                preferred_element_type=jnp.float32) * scale
        p = _softmax(s)                                        # (Nq, Nk) f32
        outs.append(jnp.dot(p.astype(jnp.bfloat16), vh,
                            preferred_element_type=jnp.float32))
    return jnp.concatenate(outs, axis=-1)                      # (Nq, C) f32


# ---------------------------------------------------------------------------
# Fused DecoderBlock kernel. Grid = (batch, mlp_hidden_tiles).
# Attention + residuals run once per batch row (h_tile == 0); the MLP is
# accumulated into the resident output block one hidden slab at a time.
# ---------------------------------------------------------------------------
def decoder_block_kernel(
    q_ref, v_ref,
    ln1_g, ln1_b, w_qkv, w_sproj, b_sproj,
    lnq_g, lnq_b, lnv_g, lnv_b,
    w_cq, w_ck, w_cv, w_cproj, b_cproj,
    ln2_g, ln2_b, w_fc1, b_fc1, w_fc2, b_fc2,
    out_ref,
    n2_scr,                 # VMEM (Nq, C) bf16: norm2(x) reused by every MLP tile
    *, num_heads,
):
    C = q_ref.shape[-1]
    head_dim = C // num_heads
    scale = head_dim ** (-0.5)
    h_tile = pl.program_id(1)

    @pl.when(h_tile == 0)
    def _attention_and_init():
        x = q_ref[0]            # (Nq, C) f32
        vv = v_ref[0]           # (Nv, C) f32

        # ---------------- self attention: x = q + self_attn(norm1(q)) ------
        nx = _layernorm(x, ln1_g[...], ln1_b[...]).astype(jnp.bfloat16)
        qkv = jnp.dot(nx, w_qkv[...],
                      preferred_element_type=jnp.float32)       # (Nq, 3C)
        sa = _mha(qkv[:, 0:C], qkv[:, C:2 * C], qkv[:, 2 * C:3 * C],
                  num_heads, head_dim, scale)
        x = x + jnp.dot(sa.astype(jnp.bfloat16), w_sproj[...],
                        preferred_element_type=jnp.float32) + b_sproj[...]

        # ---------------- cross attention: x = x + attn(norm_q(x), norm_v(v))
        nq = _layernorm(x, lnq_g[...], lnq_b[...]).astype(jnp.bfloat16)
        nv = _layernorm(vv, lnv_g[...], lnv_b[...]).astype(jnp.bfloat16)
        qp = jnp.dot(nq, w_cq[...], preferred_element_type=jnp.float32)
        kp = jnp.dot(nv, w_ck[...], preferred_element_type=jnp.float32)
        vp = jnp.dot(nv, w_cv[...], preferred_element_type=jnp.float32)
        ca = _mha(qp, kp, vp, num_heads, head_dim, scale)
        x = x + jnp.dot(ca.astype(jnp.bfloat16), w_cproj[...],
                        preferred_element_type=jnp.float32) + b_cproj[...]

        # Stash norm2(x) for the MLP tiles; init output = residual + fc2 bias.
        n2_scr[...] = _layernorm(x, ln2_g[...], ln2_b[...]).astype(jnp.bfloat16)
        out_ref[0] = (x + b_fc2[...]).astype(out_ref.dtype)

    # ---------------- MLP hidden-dim slab (runs every h_tile) --------------
    h1 = _gelu_exact(
        jnp.dot(n2_scr[...], w_fc1[...], preferred_element_type=jnp.float32)
        + b_fc1[...])                                           # (Nq, tile_h) f32
    out_ref[0] = out_ref[0] + jnp.dot(
        h1.astype(jnp.bfloat16), w_fc2[...],
        preferred_element_type=jnp.float32).astype(out_ref.dtype)


def decoder_block_pallas(q, v, params, num_heads, *, mlp_tile=None):
    B, Nq, C = q.shape
    Nv = v.shape[1]
    hidden = params["w_fc1"].shape[1]

    if mlp_tile is None:
        mlp_tile = hidden
        for cand in (512, 384, 256, 128):
            if hidden % cand == 0:
                mlp_tile = cand
                break
    assert hidden % mlp_tile == 0, "mlp_tile must divide hidden"
    n_h = hidden // mlp_tile

    cast = {k: (p.astype(jnp.bfloat16) if k in BF16_PARAMS
                else p.astype(jnp.float32)) for k, p in params.items()}
    p_list = [cast[name] for name in PARAM_ORDER]

    def const_spec(p):
        nd = p.ndim
        return pl.BlockSpec(p.shape, lambda b, h, nd=nd: (0,) * nd)

    param_specs = []
    for name, p in zip(PARAM_ORDER, p_list):
        if name == "w_fc1":
            param_specs.append(pl.BlockSpec((C, mlp_tile), lambda b, h: (0, h)))
        elif name == "b_fc1":
            param_specs.append(pl.BlockSpec((1, mlp_tile), lambda b, h: (0, h)))
        elif name == "w_fc2":
            param_specs.append(pl.BlockSpec((mlp_tile, C), lambda b, h: (h, 0)))
        else:
            param_specs.append(const_spec(p))

    in_specs = [
        pl.BlockSpec((1, Nq, C), lambda b, h: (b, 0, 0)),   # q: one batch row
        pl.BlockSpec((1, Nv, C), lambda b, h: (b, 0, 0)),   # v: one batch row
    ] + param_specs

    # Explicit VMEM budget: every block is (up to) double-buffered by default.
    def nbytes(shape, dt):
        n = 1
        for s in shape:
            n *= s
        return n * jnp.dtype(dt).itemsize

    est = 2 * (nbytes((1, Nq, C), q.dtype) + nbytes((1, Nv, C), v.dtype)
               + nbytes((1, Nq, C), q.dtype))
    for name, p in zip(PARAM_ORDER, p_list):
        if name == "w_fc1":
            est += 2 * nbytes((C, mlp_tile), p.dtype)
        elif name == "b_fc1":
            est += 2 * nbytes((1, mlp_tile), p.dtype)
        elif name == "w_fc2":
            est += 2 * nbytes((mlp_tile, C), p.dtype)
        else:
            est += 2 * nbytes(p.shape, p.dtype)
    est += nbytes((Nq, C), jnp.bfloat16)                    # n2 scratch
    vmem_limit = int(min(max(3 * est, 32 * 1024 * 1024), 100 * 1024 * 1024))

    kernel = functools.partial(decoder_block_kernel, num_heads=num_heads)

    return pl.pallas_call(
        kernel,
        out_shape=jax.ShapeDtypeStruct((B, Nq, C), q.dtype),
        grid=(B, n_h),
        in_specs=in_specs,
        out_specs=pl.BlockSpec((1, Nq, C), lambda b, h: (b, 0, 0)),
        scratch_shapes=[pltpu.VMEM((Nq, C), jnp.bfloat16)],
        compiler_params=pltpu.CompilerParams(
            dimension_semantics=("parallel", "arbitrary"),
            vmem_limit_bytes=vmem_limit),
    )(q, v, *p_list)


# ---------------------------------------------------------------------------
# Pure-JAX f32 reference (mirrors the PyTorch forward) for validation
# ---------------------------------------------------------------------------
def _ref_mha(Q, K, V, num_heads, scale):
    B, N, C = Q.shape
    NK = K.shape[1]
    hd = C // num_heads
    Qh = Q.reshape(B, N, num_heads, hd).transpose(0, 2, 1, 3)
    Kh = K.reshape(B, NK, num_heads, hd).transpose(0, 2, 1, 3)
    Vh = V.reshape(B, NK, num_heads, hd).transpose(0, 2, 1, 3)
    s = jnp.einsum("bhnd,bhmd->bhnm", Qh, Kh) * scale
    p = jax.nn.softmax(s, axis=-1)
    o = jnp.einsum("bhnm,bhmd->bhnd", p, Vh)
    return o.transpose(0, 2, 1, 3).reshape(B, N, C)


def decoder_block_ref(q, v, p, num_heads):
    C = q.shape[-1]
    scale = (C // num_heads) ** (-0.5)
    ln = _layernorm

    nx = ln(q, p["ln1_g"], p["ln1_b"])
    qkv = nx @ p["w_qkv"]
    sa = _ref_mha(qkv[..., :C], qkv[..., C:2 * C], qkv[..., 2 * C:],
                  num_heads, scale)
    x = q + sa @ p["w_sproj"] + p["b_sproj"]

    nq = ln(x, p["lnq_g"], p["lnq_b"])
    nv = ln(v, p["lnv_g"], p["lnv_b"])
    ca = _ref_mha(nq @ p["w_cq"], nv @ p["w_ck"], nv @ p["w_cv"],
                  num_heads, scale)
    x = x + ca @ p["w_cproj"] + p["b_cproj"]

    n2 = ln(x, p["ln2_g"], p["ln2_b"])
    h1 = jax.nn.gelu(n2 @ p["w_fc1"] + p["b_fc1"], approximate=False)
    return x + h1 @ p["w_fc2"] + p["b_fc2"]


def make_params(key, C, hidden):
    ks = iter(jax.random.split(key, 24))

    def rnd(shape, s=0.05):
        return (s * jax.random.normal(next(ks), shape)).astype(jnp.float32)

    return dict(
        ln1_g=1.0 + rnd((1, C)), ln1_b=rnd((1, C)),
        w_qkv=rnd((C, 3 * C)),
        w_sproj=rnd((C, C)), b_sproj=rnd((1, C)),
        lnq_g=1.0 + rnd((1, C)), lnq_b=rnd((1, C)),
        lnv_g=1.0 + rnd((1, C)), lnv_b=rnd((1, C)),
        w_cq=rnd((C, C)), w_ck=rnd((C, C)), w_cv=rnd((C, C)),
        w_cproj=rnd((C, C)), b_cproj=rnd((1, C)),
        ln2_g=1.0 + rnd((1, C)), ln2_b=rnd((1, C)),
        w_fc1=rnd((C, hidden)), b_fc1=rnd((1, hidden)),
        w_fc2=rnd((hidden, C)), b_fc2=rnd((1, C)),
    )


if __name__ == "__main__":
    # Small but lane-aligned shapes: C is a multiple of 128 so every
    # load/store/matmul is lane-dense; hidden=512 tiled as 2 x 256 exercises
    # the MLP accumulation path.
    B, Nq, Nv, C, H = 2, 8, 16, 128, 4
    mlp_ratio = 4.0
    hidden = int(C * mlp_ratio)

    root = jax.random.PRNGKey(0)
    kp, kq, kv = jax.random.split(root, 3)
    params = make_params(kp, C, hidden)
    q = jax.random.normal(kq, (B, Nq, C), jnp.float32)
    v = jax.random.normal(kv, (B, Nv, C), jnp.float32)

    out = decoder_block_pallas(q, v, params, H, mlp_tile=256)
    out = jax.block_until_ready(out)
    assert out.shape == (B, Nq, C)

    with jax.default_matmul_precision("float32"):
        ref = decoder_block_ref(q, v, params, H)
    max_diff = float(jnp.max(jnp.abs(out - ref)))
    # bf16 MXU operands vs f32 reference: allow a few 1e-2 of drift.
    if max_diff > 5e-2:
        raise AssertionError(f"mismatch vs reference: max|diff|={max_diff}")

    print("KERNEL_OK")
</pallas_src>

<mosaic_0001>
module attributes {stable_mosaic.version = 11 : i64} {
  func.func @decoder_block_kernel(%arg0: i32, %arg1: i32, %arg2: memref<1x8x128xf32, #tpu.memory_space<vmem>>, %arg3: memref<1x16x128xf32, #tpu.memory_space<vmem>>, %arg4: memref<1x128xf32, #tpu.memory_space<vmem>>, %arg5: memref<1x128xf32, #tpu.memory_space<vmem>>, %arg6: memref<128x384xbf16, #tpu.memory_space<vmem>>, %arg7: memref<128x128xbf16, #tpu.memory_space<vmem>>, %arg8: memref<1x128xf32, #tpu.memory_space<vmem>>, %arg9: memref<1x128xf32, #tpu.memory_space<vmem>>, %arg10: memref<1x128xf32, #tpu.memory_space<vmem>>, %arg11: memref<1x128xf32, #tpu.memory_space<vmem>>, %arg12: memref<1x128xf32, #tpu.memory_space<vmem>>, %arg13: memref<128x128xbf16, #tpu.memory_space<vmem>>, %arg14: memref<128x128xbf16, #tpu.memory_space<vmem>>, %arg15: memref<128x128xbf16, #tpu.memory_space<vmem>>, %arg16: memref<128x128xbf16, #tpu.memory_space<vmem>>, %arg17: memref<1x128xf32, #tpu.memory_space<vmem>>, %arg18: memref<1x128xf32, #tpu.memory_space<vmem>>, %arg19: memref<1x128xf32, #tpu.memory_space<vmem>>, %arg20: memref<128x256xbf16, #tpu.memory_space<vmem>>, %arg21: memref<1x256xf32, #tpu.memory_space<vmem>>, %arg22: memref<256x128xbf16, #tpu.memory_space<vmem>>, %arg23: memref<1x128xf32, #tpu.memory_space<vmem>>, %arg24: memref<1x8x128xf32, #tpu.memory_space<vmem>>, %arg25: memref<8x128xbf16, #tpu.memory_space<vmem>>) attributes {dimension_semantics = [#tpu.dimension_semantics<parallel>, #tpu.dimension_semantics<arbitrary>], iteration_bounds = array<i64: 2, 2>, scalar_prefetch = 0 : i64, scratch_operands = 1 : i64, tpu.core_type = #tpu.core_type<tc>, window_params = [{transform_indices = @transform_0, window_bounds = array<i64: 1, 8, 128>}, {transform_indices = @transform_1, window_bounds = array<i64: 1, 16, 128>}, {pipeline_mode = #tpu.pipeline_mode<synchronous>, transform_indices = @transform_2, window_bounds = array<i64: 1, 128>}, {pipeline_mode = #tpu.pipeline_mode<synchronous>, transform_indices = @transform_3, window_bounds = array<i64: 1, 128>}, {pipeline_mode = #tpu.pipeline_mode<synchronous>, transform_indices = @transform_4, window_bounds = array<i64: 128, 384>}, {pipeline_mode = #tpu.pipeline_mode<synchronous>, transform_indices = @transform_5, window_bounds = array<i64: 128, 128>}, {pipeline_mode = #tpu.pipeline_mode<synchronous>, transform_indices = @transform_6, window_bounds = array<i64: 1, 128>}, {pipeline_mode = #tpu.pipeline_mode<synchronous>, transform_indices = @transform_7, window_bounds = array<i64: 1, 128>}, {pipeline_mode = #tpu.pipeline_mode<synchronous>, transform_indices = @transform_8, window_bounds = array<i64: 1, 128>}, {pipeline_mode = #tpu.pipeline_mode<synchronous>, transform_indices = @transform_9, window_bounds = array<i64: 1, 128>}, {pipeline_mode = #tpu.pipeline_mode<synchronous>, transform_indices = @transform_10, window_bounds = array<i64: 1, 128>}, {pipeline_mode = #tpu.pipeline_mode<synchronous>, transform_indices = @transform_11, window_bounds = array<i64: 128, 128>}, {pipeline_mode = #tpu.pipeline_mode<synchronous>, transform_indices = @transform_12, window_bounds = array<i64: 128, 128>}, {pipeline_mode = #tpu.pipeline_mode<synchronous>, transform_indices = @transform_13, window_bounds = array<i64: 128, 128>}, {pipeline_mode = #tpu.pipeline_mode<synchronous>, transform_indices = @transform_14, window_bounds = array<i64: 128, 128>}, {pipeline_mode = #tpu.pipeline_mode<synchronous>, transform_indices = @transform_15, window_bounds = array<i64: 1, 128>}, {pipeline_mode = #tpu.pipeline_mode<synchronous>, transform_indices = @transform_16, window_bounds = array<i64: 1, 128>}, {pipeline_mode = #tpu.pipeline_mode<synchronous>, transform_indices = @transform_17, window_bounds = array<i64: 1, 128>}, {transform_indices = @transform_18, window_bounds = array<i64: 128, 256>}, {transform_indices = @transform_19, window_bounds = array<i64: 1, 256>}, {transform_indices = @transform_20, window_bounds = array<i64: 256, 128>}, {pipeline_mode = #tpu.pipeline_mode<synchronous>, transform_indices = @transform_21, window_bounds = array<i64: 1, 128>}, {transform_indices = @transform_22, window_bounds = array<i64: 1, 8, 128>}]} {
    %c0_i32 = arith.constant 0 : i32
    %0 = arith.cmpi eq, %arg1, %c0_i32 : i32
    %1 = arith.extui %0 : i1 to i32
    %c0_i32_0 = arith.constant 0 : i32
    %2 = arith.cmpi ne, %1, %c0_i32_0 : i32
    scf.if %2 {
      %c0_31 = arith.constant 0 : index
      %c0_32 = arith.constant 0 : index
      %c0_33 = arith.constant 0 : index
      %59 = vector.load %arg2[%c0_31, %c0_32, %c0_33] : memref<1x8x128xf32, #tpu.memory_space<vmem>>, vector<1x8x128xf32>
      %60 = vector.shape_cast %59 : vector<1x8x128xf32> to vector<8x128xf32>
      %c0_34 = arith.constant 0 : index
      %c0_35 = arith.constant 0 : index
      %c0_36 = arith.constant 0 : index
      %61 = vector.load %arg3[%c0_34, %c0_35, %c0_36] : memref<1x16x128xf32, #tpu.memory_space<vmem>>, vector<1x16x128xf32>
      %62 = vector.shape_cast %61 : vector<1x16x128xf32> to vector<16x128xf32>
      %c0_37 = arith.constant 0 : index
      %c0_38 = arith.constant 0 : index
      %63 = vector.load %arg4[%c0_37, %c0_38] : memref<1x128xf32, #tpu.memory_space<vmem>>, vector<1x128xf32>
      %c0_39 = arith.constant 0 : index
      %c0_40 = arith.constant 0 : index
      %64 = vector.load %arg5[%c0_39, %c0_40] : memref<1x128xf32, #tpu.memory_space<vmem>>, vector<1x128xf32>
      %cst_41 = arith.constant dense<0.000000e+00> : vector<8xf32>
      %65 = vector.multi_reduction <add>, %60, %cst_41 [1] : vector<8x128xf32> to vector<8xf32>
      %66 = vector.shape_cast %65 : vector<8xf32> to vector<8x1xf32>
      %cst_42 = arith.constant 1.280000e+02 : f32
      %67 = vector.broadcast %cst_42 : f32 to vector<8x1xf32>
      %68 = arith.divf %66, %67 : vector<8x1xf32>
      %69 = vector.broadcast %68 : vector<8x1xf32> to vector<8x128xf32>
      %70 = arith.subf %60, %69 : vector<8x128xf32>
      %71 = arith.mulf %70, %70 : vector<8x128xf32>
      %cst_43 = arith.constant dense<0.000000e+00> : vector<8xf32>
      %72 = vector.multi_reduction <add>, %71, %cst_43 [1] : vector<8x128xf32> to vector<8xf32>
      %73 = vector.shape_cast %72 : vector<8xf32> to vector<8x1xf32>
      %cst_44 = arith.constant 1.280000e+02 : f32
      %74 = vector.broadcast %cst_44 : f32 to vector<8x1xf32>
      %75 = arith.divf %73, %74 : vector<8x1xf32>
      %cst_45 = arith.constant 9.99999974E-6 : f32
      %76 = vector.broadcast %cst_45 : f32 to vector<8x1xf32>
      %77 = arith.addf %75, %76 : vector<8x1xf32>
      %78 = math.rsqrt %77 : vector<8x1xf32>
      %79 = vector.broadcast %78 : vector<8x1xf32> to vector<8x128xf32>
      %80 = arith.mulf %70, %79 : vector<8x128xf32>
      %81 = vector.broadcast %63 : vector<1x128xf32> to vector<8x128xf32>
      %82 = arith.mulf %80, %81 : vector<8x128xf32>
      %83 = vector.broadcast %64 : vector<1x128xf32> to vector<8x128xf32>
      %84 = arith.addf %82, %83 : vector<8x128xf32>
      %85 = arith.truncf %84 : vector<8x128xf32> to vector<8x128xbf16>
      %c0_46 = arith.constant 0 : index
      %c0_47 = arith.constant 0 : index
      %86 = vector.load %arg6[%c0_46, %c0_47] : memref<128x384xbf16, #tpu.memory_space<vmem>>, vector<128x384xbf16>
      %cst_48 = arith.constant dense<0.000000e+00> : vector<8x384xf32>
      %87 = tpu.matmul %85, %86, %cst_48 {dimension_numbers = #tpu.dot_dimension_numbers<[1], [0], [0], [1], [0, 0, 1, 1], [], []>} : vector<8x128xbf16>, vector<128x384xbf16>, vector<8x384xf32> -> vector<8x384xf32>
      %88 = vector.extract_strided_slice %87 {offsets = [0, 0], sizes = [8, 128], strides = [1, 1]} : vector<8x384xf32> to vector<8x128xf32>
      %89 = vector.extract_strided_slice %87 {offsets = [0, 128], sizes = [8, 128], strides = [1, 1]} : vector<8x384xf32> to vector<8x128xf32>
      %90 = vector.extract_strided_slice %87 {offsets = [0, 256], sizes = [8, 128], strides = [1, 1]} : vector<8x384xf32> to vector<8x128xf32>
      %91 = vector.extract_strided_slice %88 {offsets = [0, 0], sizes = [8, 32], strides = [1, 1]} : vector<8x128xf32> to vector<8x32xf32>
      %92 = arith.truncf %91 : vector<8x32xf32> to vector<8x32xbf16>
      %93 = vector.extract_strided_slice %89 {offsets = [0, 0], sizes = [8, 32], strides = [1, 1]} : vector<8x128xf32> to vector<8x32xf32>
      %94 = arith.truncf %93 : vector<8x32xf32> to vector<8x32xbf16>
      %95 = vector.extract_strided_slice %90 {offsets = [0, 0], sizes = [8, 32], strides = [1, 1]} : vector<8x128xf32> to vector<8x32xf32>
      %96 = arith.truncf %95 : vector<8x32xf32> to vector<8x32xbf16>
      %cst_49 = arith.constant dense<0.000000e+00> : vector<8x8xf32>
      %97 = tpu.matmul %92, %94, %cst_49 {dimension_numbers = #tpu.dot_dimension_numbers<[1], [1], [0], [0], [0, 0, 1, 0], [], []>} : vector<8x32xbf16>, vector<8x32xbf16>, vector<8x8xf32> -> vector<8x8xf32>
      %cst_50 = arith.constant 0.176776692 : f32
      %98 = vector.broadcast %cst_50 : f32 to vector<8x8xf32>
      %99 = arith.mulf %97, %98 : vector<8x8xf32>
      %cst_51 = arith.constant dense<0xFF800000> : vector<8xf32>
      %100 = vector.multi_reduction <maximumf>, %99, %cst_51 [1] : vector<8x8xf32> to vector<8xf32>
      %101 = vector.shape_cast %100 : vector<8xf32> to vector<8x1xf32>
      %102 = vector.broadcast %101 : vector<8x1xf32> to vector<8x8xf32>
      %103 = arith.subf %99, %102 : vector<8x8xf32>
      %104 = math.exp %103 : vector<8x8xf32>
      %cst_52 = arith.constant dense<0.000000e+00> : vector<8xf32>
      %105 = vector.multi_reduction <add>, %104, %cst_52 [1] : vector<8x8xf32> to vector<8xf32>
      %106 = vector.shape_cast %105 : vector<8xf32> to vector<8x1xf32>
      %107 = tpu.reciprocal %106 {approx = true} : vector<8x1xf32> -> vector<8x1xf32>
      %108 = vector.broadcast %107 : vector<8x1xf32> to vector<8x8xf32>
      %109 = arith.mulf %104, %108 : vector<8x8xf32>
      %110 = arith.truncf %109 : vector<8x8xf32> to vector<8x8xbf16>
      %cst_53 = arith.constant dense<0.000000e+00> : vector<8x32xf32>
      %111 = tpu.matmul %110, %96, %cst_53 {dimension_numbers = #tpu.dot_dimension_numbers<[1], [0], [0], [1], [0, 0, 1, 1], [], []>} : vector<8x8xbf16>, vector<8x32xbf16>, vector<8x32xf32> -> vector<8x32xf32>
      %112 = vector.extract_strided_slice %88 {offsets = [0, 32], sizes = [8, 32], strides = [1, 1]} : vector<8x128xf32> to vector<8x32xf32>
      %113 = arith.truncf %112 : vector<8x32xf32> to vector<8x32xbf16>
      %114 = vector.extract_strided_slice %89 {offsets = [0, 32], sizes = [8, 32], strides = [1, 1]} : vector<8x128xf32> to vector<8x32xf32>
      %115 = arith.truncf %114 : vector<8x32xf32> to vector<8x32xbf16>
      %116 = vector.extract_strided_slice %90 {offsets = [0, 32], sizes = [8, 32], strides = [1, 1]} : vector<8x128xf32> to vector<8x32xf32>
      %117 = arith.truncf %116 : vector<8x32xf32> to vector<8x32xbf16>
      %cst_54 = arith.constant dense<0.000000e+00> : vector<8x8xf32>
      %118 = tpu.matmul %113, %115, %cst_54 {dimension_numbers = #tpu.dot_dimension_numbers<[1], [1], [0], [0], [0, 0, 1, 0], [], []>} : vector<8x32xbf16>, vector<8x32xbf16>, vector<8x8xf32> -> vector<8x8xf32>
      %cst_55 = arith.constant 0.176776692 : f32
      %119 = vector.broadcast %cst_55 : f32 to vector<8x8xf32>
      %120 = arith.mulf %118, %119 : vector<8x8xf32>
      %cst_56 = arith.constant dense<0xFF800000> : vector<8xf32>
      %121 = vector.multi_reduction <maximumf>, %120, %cst_56 [1] : vector<8x8xf32> to vector<8xf32>
      %122 = vector.shape_cast %121 : vector<8xf32> to vector<8x1xf32>
      %123 = vector.broadcast %122 : vector<8x1xf32> to vector<8x8xf32>
      %124 = arith.subf %120, %123 : vector<8x8xf32>
      %125 = math.exp %124 : vector<8x8xf32>
      %cst_57 = arith.constant dense<0.000000e+00> : vector<8xf32>
      %126 = vector.multi_reduction <add>, %125, %cst_57 [1] : vector<8x8xf32> to vector<8xf32>
      %127 = vector.shape_cast %126 : vector<8xf32> to vector<8x1xf32>
      %128 = tpu.reciprocal %127 {approx = true} : vector<8x1xf32> -> vector<8x1xf32>
      %129 = vector.broadcast %128 : vector<8x1xf32> to vector<8x8xf32>
      %130 = arith.mulf %125, %129 : vector<8x8xf32>
      %131 = arith.truncf %130 : vector<8x8xf32> to vector<8x8xbf16>
      %cst_58 = arith.constant dense<0.000000e+00> : vector<8x32xf32>
      %132 = tpu.matmul %131, %117, %cst_58 {dimension_numbers = #tpu.dot_dimension_numbers<[1], [0], [0], [1], [0, 0, 1, 1], [], []>} : vector<8x8xbf16>, vector<8x32xbf16>, vector<8x32xf32> -> vector<8x32xf32>
      %133 = vector.extract_strided_slice %88 {offsets = [0, 64], sizes = [8, 32], strides = [1, 1]} : vector<8x128xf32> to vector<8x32xf32>
      %134 = arith.truncf %133 : vector<8x32xf32> to vector<8x32xbf16>
      %135 = vector.extract_strided_slice %89 {offsets = [0, 64], sizes = [8, 32], strides = [1, 1]} : vector<8x128xf32> to vector<8x32xf32>
      %136 = arith.truncf %135 : vector<8x32xf32> to vector<8x32xbf16>
      %137 = vector.extract_strided_slice %90 {offsets = [0, 64], sizes = [8, 32], strides = [1, 1]} : vector<8x128xf32> to vector<8x32xf32>
      %138 = arith.truncf %137 : vector<8x32xf32> to vector<8x32xbf16>
      %cst_59 = arith.constant dense<0.000000e+00> : vector<8x8xf32>
      %139 = tpu.matmul %134, %136, %cst_59 {dimension_numbers = #tpu.dot_dimension_numbers<[1], [1], [0], [0], [0, 0, 1, 0], [], []>} : vector<8x32xbf16>, vector<8x32xbf16>, vector<8x8xf32> -> vector<8x8xf32>
      %cst_60 = arith.constant 0.176776692 : f32
      %140 = vector.broadcast %cst_60 : f32 to vector<8x8xf32>
      %141 = arith.mulf %139, %140 : vector<8x8xf32>
      %cst_61 = arith.constant dense<0xFF800000> : vector<8xf32>
      %142 = vector.multi_reduction <maximumf>, %141, %cst_61 [1] : vector<8x8xf32> to vector<8xf32>
      %143 = vector.shape_cast %142 : vector<8xf32> to vector<8x1xf32>
      %144 = vector.broadcast %143 : vector<8x1xf32> to vector<8x8xf32>
      %145 = arith.subf %141, %144 : vector<8x8xf32>
      %146 = math.exp %145 : vector<8x8xf32>
      %cst_62 = arith.constant dense<0.000000e+00> : vector<8xf32>
      %147 = vector.multi_reduction <add>, %146, %cst_62 [1] : vector<8x8xf32> to vector<8xf32>
      %148 = vector.shape_cast %147 : vector<8xf32> to vector<8x1xf32>
      %149 = tpu.reciprocal %148 {approx = true} : vector<8x1xf32> -> vector<8x1xf32>
      %150 = vector.broadcast %149 : vector<8x1xf32> to vector<8x8xf32>
      %151 = arith.mulf %146, %150 : vector<8x8xf32>
      %152 = arith.truncf %151 : vector<8x8xf32> to vector<8x8xbf16>
      %cst_63 = arith.constant dense<0.000000e+00> : vector<8x32xf32>
      %153 = tpu.matmul %152, %138, %cst_63 {dimension_numbers = #tpu.dot_dimension_numbers<[1], [0], [0], [1], [0, 0, 1, 1], [], []>} : vector<8x8xbf16>, vector<8x32xbf16>, vector<8x32xf32> -> vector<8x32xf32>
      %154 = vector.extract_strided_slice %88 {offsets = [0, 96], sizes = [8, 32], strides = [1, 1]} : vector<8x128xf32> to vector<8x32xf32>
      %155 = arith.truncf %154 : vector<8x32xf32> to vector<8x32xbf16>
      %156 = vector.extract_strided_slice %89 {offsets = [0, 96], sizes = [8, 32], strides = [1, 1]} : vector<8x128xf32> to vector<8x32xf32>
      %157 = arith.truncf %156 : vector<8x32xf32> to vector<8x32xbf16>
      %158 = vector.extract_strided_slice %90 {offsets = [0, 96], sizes = [8, 32], strides = [1, 1]} : vector<8x128xf32> to vector<8x32xf32>
      %159 = arith.truncf %158 : vector<8x32xf32> to vector<8x32xbf16>
      %cst_64 = arith.constant dense<0.000000e+00> : vector<8x8xf32>
      %160 = tpu.matmul %155, %157, %cst_64 {dimension_numbers = #tpu.dot_dimension_numbers<[1], [1], [0], [0], [0, 0, 1, 0], [], []>} : vector<8x32xbf16>, vector<8x32xbf16>, vector<8x8xf32> -> vector<8x8xf32>
      %cst_65 = arith.constant 0.176776692 : f32
      %161 = vector.broadcast %cst_65 : f32 to vector<8x8xf32>
      %162 = arith.mulf %160, %161 : vector<8x8xf32>
      %cst_66 = arith.constant dense<0xFF800000> : vector<8xf32>
      %163 = vector.multi_reduction <maximumf>, %162, %cst_66 [1] : vector<8x8xf32> to vector<8xf32>
      %164 = vector.shape_cast %163 : vector<8xf32> to vector<8x1xf32>
      %165 = vector.broadcast %164 : vector<8x1xf32> to vector<8x8xf32>
      %166 = arith.subf %162, %165 : vector<8x8xf32>
      %167 = math.exp %166 : vector<8x8xf32>
      %cst_67 = arith.constant dense<0.000000e+00> : vector<8xf32>
      %168 = vector.multi_reduction <add>, %167, %cst_67 [1] : vector<8x8xf32> to vector<8xf32>
      %169 = vector.shape_cast %168 : vector<8xf32> to vector<8x1xf32>
      %170 = tpu.reciprocal %169 {approx = true} : vector<8x1xf32> -> vector<8x1xf32>
      %171 = vector.broadcast %170 : vector<8x1xf32> to vector<8x8xf32>
      %172 = arith.mulf %167, %171 : vector<8x8xf32>
      %173 = arith.truncf %172 : vector<8x8xf32> to vector<8x8xbf16>
      %cst_68 = arith.constant dense<0.000000e+00> : vector<8x32xf32>
      %174 = tpu.matmul %173, %159, %cst_68 {dimension_numbers = #tpu.dot_dimension_numbers<[1], [0], [0], [1], [0, 0, 1, 1], [], []>} : vector<8x8xbf16>, vector<8x32xbf16>, vector<8x32xf32> -> vector<8x32xf32>
      %175 = tpu.concatenate %111, %132, %153, %174 in 1 : vector<8x32xf32>, vector<8x32xf32>, vector<8x32xf32>, vector<8x32xf32> -> vector<8x128xf32>
      %176 = arith.truncf %175 : vector<8x128xf32> to vector<8x128xbf16>
      %c0_69 = arith.constant 0 : index
      %c0_70 = arith.constant 0 : index
      %177 = vector.load %arg7[%c0_69, %c0_70] : memref<128x128xbf16, #tpu.memory_space<vmem>>, vector<128x128xbf16>
      %cst_71 = arith.constant dense<0.000000e+00> : vector<8x128xf32>
      %178 = tpu.matmul %176, %177, %cst_71 {dimension_numbers = #tpu.dot_dimension_numbers<[1], [0], [0], [1], [0, 0, 1, 1], [], []>} : vector<8x128xbf16>, vector<128x128xbf16>, vector<8x128xf32> -> vector<8x128xf32>
      %179 = arith.addf %60, %178 : vector<8x128xf32>
      %c0_72 = arith.constant 0 : index
      %c0_73 = arith.constant 0 : index
      %180 = vector.load %arg8[%c0_72, %c0_73] : memref<1x128xf32, #tpu.memory_space<vmem>>, vector<1x128xf32>
      %181 = vector.broadcast %180 : vector<1x128xf32> to vector<8x128xf32>
      %182 = arith.addf %179, %181 : vector<8x128xf32>
      %c0_74 = arith.constant 0 : index
      %c0_75 = arith.constant 0 : index
      %183 = vector.load %arg9[%c0_74, %c0_75] : memref<1x128xf32, #tpu.memory_space<vmem>>, vector<1x128xf32>
      %c0_76 = arith.constant 0 : index
      %c0_77 = arith.constant 0 : index
      %184 = vector.load %arg10[%c0_76, %c0_77] : memref<1x128xf32, #tpu.memory_space<vmem>>, vector<1x128xf32>
      %cst_78 = arith.constant dense<0.000000e+00> : vector<8xf32>
      %185 = vector.multi_reduction <add>, %182, %cst_78 [1] : vector<8x128xf32> to vector<8xf32>
      %186 = vector.shape_cast %185 : vector<8xf32> to vector<8x1xf32>
      %cst_79 = arith.constant 1.280000e+02 : f32
      %187 = vector.broadcast %cst_79 : f32 to vector<8x1xf32>
      %188 = arith.divf %186, %187 : vector<8x1xf32>
      %189 = vector.broadcast %188 : vector<8x1xf32> to vector<8x128xf32>
      %190 = arith.subf %182, %189 : vector<8x128xf32>
      %191 = arith.mulf %190, %190 : vector<8x128xf32>
      %cst_80 = arith.constant dense<0.000000e+00> : vector<8xf32>
      %192 = vector.multi_reduction <add>, %191, %cst_80 [1] : vector<8x128xf32> to vector<8xf32>
      %193 = vector.shape_cast %192 : vector<8xf32> to vector<8x1xf32>
      %cst_81 = arith.constant 1.280000e+02 : f32
      %194 = vector.broadcast %cst_81 : f32 to vector<8x1xf32>
      %195 = arith.divf %193, %194 : vector<8x1xf32>
      %cst_82 = arith.constant 9.99999974E-6 : f32
      %196 = vector.broadcast %cst_82 : f32 to vector<8x1xf32>
      %197 = arith.addf %195, %196 : vector<8x1xf32>
      %198 = math.rsqrt %197 : vector<8x1xf32>
      %199 = vector.broadcast %198 : vector<8x1xf32> to vector<8x128xf32>
      %200 = arith.mulf %190, %199 : vector<8x128xf32>
      %201 = vector.broadcast %183 : vector<1x128xf32> to vector<8x128xf32>
      %202 = arith.mulf %200, %201 : vector<8x128xf32>
      %203 = vector.broadcast %184 : vector<1x128xf32> to vector<8x128xf32>
      %204 = arith.addf %202, %203 : vector<8x128xf32>
      %205 = arith.truncf %204 : vector<8x128xf32> to vector<8x128xbf16>
      %c0_83 = arith.constant 0 : index
      %c0_84 = arith.constant 0 : index
      %206 = vector.load %arg11[%c0_83, %c0_84] : memref<1x128xf32, #tpu.memory_space<vmem>>, vector<1x128xf32>
      %c0_85 = arith.constant 0 : index
      %c0_86 = arith.constant 0 : index
      %207 = vector.load %arg12[%c0_85, %c0_86] : memref<1x128xf32, #tpu.memory_space<vmem>>, vector<1x128xf32>
      %cst_87 = arith.constant dense<0.000000e+00> : vector<16xf32>
      %208 = vector.multi_reduction <add>, %62, %cst_87 [1] : vector<16x128xf32> to vector<16xf32>
      %209 = vector.shape_cast %208 : vector<16xf32> to vector<16x1xf32>
      %cst_88 = arith.constant 1.280000e+02 : f32
      %210 = vector.broadcast %cst_88 : f32 to vector<16x1xf32>
      %211 = arith.divf %209, %210 : vector<16x1xf32>
      %212 = vector.broadcast %211 : vector<16x1xf32> to vector<16x128xf32>
      %213 = arith.subf %62, %212 : vector<16x128xf32>
      %214 = arith.mulf %213, %213 : vector<16x128xf32>
      %cst_89 = arith.constant dense<0.000000e+00> : vector<16xf32>
      %215 = vector.multi_reduction <add>, %214, %cst_89 [1] : vector<16x128xf32> to vector<16xf32>
      %216 = vector.shape_cast %215 : vector<16xf32> to vector<16x1xf32>
      %cst_90 = arith.constant 1.280000e+02 : f32
      %217 = vector.broadcast %cst_90 : f32 to vector<16x1xf32>
      %218 = arith.divf %216, %217 : vector<16x1xf32>
      %cst_91 = arith.constant 9.99999974E-6 : f32
      %219 = vector.broadcast %cst_91 : f32 to vector<16x1xf32>
      %220 = arith.addf %218, %219 : vector<16x1xf32>
      %221 = math.rsqrt %220 : vector<16x1xf32>
      %222 = vector.broadcast %221 : vector<16x1xf32> to vector<16x128xf32>
      %223 = arith.mulf %213, %222 : vector<16x128xf32>
      %224 = vector.broadcast %206 : vector<1x128xf32> to vector<16x128xf32>
      %225 = arith.mulf %223, %224 : vector<16x128xf32>
      %226 = vector.broadcast %207 : vector<1x128xf32> to vector<16x128xf32>
      %227 = arith.addf %225, %226 : vector<16x128xf32>
      %228 = arith.truncf %227 : vector<16x128xf32> to vector<16x128xbf16>
      %c0_92 = arith.constant 0 : index
      %c0_93 = arith.constant 0 : index
      %229 = vector.load %arg13[%c0_92, %c0_93] : memref<128x128xbf16, #tpu.memory_space<vmem>>, vector<128x128xbf16>
      %cst_94 = arith.constant dense<0.000000e+00> : vector<8x128xf32>
      %230 = tpu.matmul %205, %229, %cst_94 {dimension_numbers = #tpu.dot_dimension_numbers<[1], [0], [0], [1], [0, 0, 1, 1], [], []>} : vector<8x128xbf16>, vector<128x128xbf16>, vector<8x128xf32> -> vector<8x128xf32>
      %c0_95 = arith.constant 0 : index
      %c0_96 = arith.constant 0 : index
      %231 = vector.load %arg14[%c0_95, %c0_96] : memref<128x128xbf16, #tpu.memory_space<vmem>>, vector<128x128xbf16>
      %cst_97 = arith.constant dense<0.000000e+00> : vector<16x128xf32>
      %232 = tpu.matmul %228, %231, %cst_97 {dimension_numbers = #tpu.dot_dimension_numbers<[1], [0], [0], [1], [0, 0, 1, 1], [], []>} : vector<16x128xbf16>, vector<128x128xbf16>, vector<16x128xf32> -> vector<16x128xf32>
      %c0_98 = arith.constant 0 : index
      %c0_99 = arith.constant 0 : index
      %233 = vector.load %arg15[%c0_98, %c0_99] : memref<128x128xbf16, #tpu.memory_space<vmem>>, vector<128x128xbf16>
      %cst_100 = arith.constant dense<0.000000e+00> : vector<16x128xf32>
      %234 = tpu.matmul %228, %233, %cst_100 {dimension_numbers = #tpu.dot_dimension_numbers<[1], [0], [0], [1], [0, 0, 1, 1], [], []>} : vector<16x128xbf16>, vector<128x128xbf16>, vector<16x128xf32> -> vector<16x128xf32>
      %235 = vector.extract_strided_slice %230 {offsets = [0, 0], sizes = [8, 32], strides = [1, 1]} : vector<8x128xf32> to vector<8x32xf32>
      %236 = arith.truncf %235 : vector<8x32xf32> to vector<8x32xbf16>
      %237 = vector.extract_strided_slice %232 {offsets = [0, 0], sizes = [16, 32], strides = [1, 1]} : vector<16x128xf32> to vector<16x32xf32>
      %238 = arith.truncf %237 : vector<16x32xf32> to vector<16x32xbf16>
      %239 = vector.extract_strided_slice %234 {offsets = [0, 0], sizes = [16, 32], strides = [1, 1]} : vector<16x128xf32> to vector<16x32xf32>
      %240 = arith.truncf %239 : vector<16x32xf32> to vector<16x32xbf16>
      %cst_101 = arith.constant dense<0.000000e+00> : vector<8x16xf32>
      %241 = tpu.matmul %236, %238, %cst_101 {dimension_numbers = #tpu.dot_dimension_numbers<[1], [1], [0], [0], [0, 0, 1, 0], [], []>} : vector<8x32xbf16>, vector<16x32xbf16>, vector<8x16xf32> -> vector<8x16xf32>
      %cst_102 = arith.constant 0.176776692 : f32
      %242 = vector.broadcast %cst_102 : f32 to vector<8x16xf32>
      %243 = arith.mulf %241, %242 : vector<8x16xf32>
      %cst_103 = arith.constant dense<0xFF800000> : vector<8xf32>
      %244 = vector.multi_reduction <maximumf>, %243, %cst_103 [1] : vector<8x16xf32> to vector<8xf32>
      %245 = vector.shape_cast %244 : vector<8xf32> to vector<8x1xf32>
      %246 = vector.broadcast %245 : vector<8x1xf32> to vector<8x16xf32>
      %247 = arith.subf %243, %246 : vector<8x16xf32>
      %248 = math.exp %247 : vector<8x16xf32>
      %cst_104 = arith.constant dense<0.000000e+00> : vector<8xf32>
      %249 = vector.multi_reduction <add>, %248, %cst_104 [1] : vector<8x16xf32> to vector<8xf32>
      %250 = vector.shape_cast %249 : vector<8xf32> to vector<8x1xf32>
      %251 = tpu.reciprocal %250 {approx = true} : vector<8x1xf32> -> vector<8x1xf32>
      %252 = vector.broadcast %251 : vector<8x1xf32> to vector<8x16xf32>
      %253 = arith.mulf %248, %252 : vector<8x16xf32>
      %254 = arith.truncf %253 : vector<8x16xf32> to vector<8x16xbf16>
      %cst_105 = arith.constant dense<0.000000e+00> : vector<8x32xf32>
      %255 = tpu.matmul %254, %240, %cst_105 {dimension_numbers = #tpu.dot_dimension_numbers<[1], [0], [0], [1], [0, 0, 1, 1], [], []>} : vector<8x16xbf16>, vector<16x32xbf16>, vector<8x32xf32> -> vector<8x32xf32>
      %256 = vector.extract_strided_slice %230 {offsets = [0, 32], sizes = [8, 32], strides = [1, 1]} : vector<8x128xf32> to vector<8x32xf32>
      %257 = arith.truncf %256 : vector<8x32xf32> to vector<8x32xbf16>
      %258 = vector.extract_strided_slice %232 {offsets = [0, 32], sizes = [16, 32], strides = [1, 1]} : vector<16x128xf32> to vector<16x32xf32>
      %259 = arith.truncf %258 : vector<16x32xf32> to vector<16x32xbf16>
      %260 = vector.extract_strided_slice %234 {offsets = [0, 32], sizes = [16, 32], strides = [1, 1]} : vector<16x128xf32> to vector<16x32xf32>
      %261 = arith.truncf %260 : vector<16x32xf32> to vector<16x32xbf16>
      %cst_106 = arith.constant dense<0.000000e+00> : vector<8x16xf32>
      %262 = tpu.matmul %257, %259, %cst_106 {dimension_numbers = #tpu.dot_dimension_numbers<[1], [1], [0], [0], [0, 0, 1, 0], [], []>} : vector<8x32xbf16>, vector<16x32xbf16>, vector<8x16xf32> -> vector<8x16xf32>
      %cst_107 = arith.constant 0.176776692 : f32
      %263 = vector.broadcast %cst_107 : f32 to vector<8x16xf32>
      %264 = arith.mulf %262, %263 : vector<8x16xf32>
      %cst_108 = arith.constant dense<0xFF800000> : vector<8xf32>
      %265 = vector.multi_reduction <maximumf>, %264, %cst_108 [1] : vector<8x16xf32> to vector<8xf32>
      %266 = vector.shape_cast %265 : vector<8xf32> to vector<8x1xf32>
      %267 = vector.broadcast %266 : vector<8x1xf32> to vector<8x16xf32>
      %268 = arith.subf %264, %267 : vector<8x16xf32>
      %269 = math.exp %268 : vector<8x16xf32>
      %cst_109 = arith.constant dense<0.000000e+00> : vector<8xf32>
      %270 = vector.multi_reduction <add>, %269, %cst_109 [1] : vector<8x16xf32> to vector<8xf32>
      %271 = vector.shape_cast %270 : vector<8xf32> to vector<8x1xf32>
      %272 = tpu.reciprocal %271 {approx = true} : vector<8x1xf32> -> vector<8x1xf32>
      %273 = vector.broadcast %272 : vector<8x1xf32> to vector<8x16xf32>
      %274 = arith.mulf %269, %273 : vector<8x16xf32>
      %275 = arith.truncf %274 : vector<8x16xf32> to vector<8x16xbf16>
      %cst_110 = arith.constant dense<0.000000e+00> : vector<8x32xf32>
      %276 = tpu.matmul %275, %261, %cst_110 {dimension_numbers = #tpu.dot_dimension_numbers<[1], [0], [0], [1], [0, 0, 1, 1], [], []>} : vector<8x16xbf16>, vector<16x32xbf16>, vector<8x32xf32> -> vector<8x32xf32>
      %277 = vector.extract_strided_slice %230 {offsets = [0, 64], sizes = [8, 32], strides = [1, 1]} : vector<8x128xf32> to vector<8x32xf32>
      %278 = arith.truncf %277 : vector<8x32xf32> to vector<8x32xbf16>
      %279 = vector.extract_strided_slice %232 {offsets = [0, 64], sizes = [16, 32], strides = [1, 1]} : vector<16x128xf32> to vector<16x32xf32>
      %280 = arith.truncf %279 : vector<16x32xf32> to vector<16x32xbf16>
      %281 = vector.extract_strided_slice %234 {offsets = [0, 64], sizes = [16, 32], strides = [1, 1]} : vector<16x128xf32> to vector<16x32xf32>
      %282 = arith.truncf %281 : vector<16x32xf32> to vector<16x32xbf16>
      %cst_111 = arith.constant dense<0.000000e+00> : vector<8x16xf32>
      %283 = tpu.matmul %278, %280, %cst_111 {dimension_numbers = #tpu.dot_dimension_numbers<[1], [1], [0], [0], [0, 0, 1, 0], [], []>} : vector<8x32xbf16>, vector<16x32xbf16>, vector<8x16xf32> -> vector<8x16xf32>
      %cst_112 = arith.constant 0.176776692 : f32
      %284 = vector.broadcast %cst_112 : f32 to vector<8x16xf32>
      %285 = arith.mulf %283, %284 : vector<8x16xf32>
      %cst_113 = arith.constant dense<0xFF800000> : vector<8xf32>
      %286 = vector.multi_reduction <maximumf>, %285, %cst_113 [1] : vector<8x16xf32> to vector<8xf32>
      %287 = vector.shape_cast %286 : vector<8xf32> to vector<8x1xf32>
      %288 = vector.broadcast %287 : vector<8x1xf32> to vector<8x16xf32>
      %289 = arith.subf %285, %288 : vector<8x16xf32>
      %290 = math.exp %289 : vector<8x16xf32>
      %cst_114 = arith.constant dense<0.000000e+00> : vector<8xf32>
      %291 = vector.multi_reduction <add>, %290, %cst_114 [1] : vector<8x16xf32> to vector<8xf32>
      %292 = vector.shape_cast %291 : vector<8xf32> to vector<8x1xf32>
      %293 = tpu.reciprocal %292 {approx = true} : vector<8x1xf32> -> vector<8x1xf32>
      %294 = vector.broadcast %293 : vector<8x1xf32> to vector<8x16xf32>
      %295 = arith.mulf %290, %294 : vector<8x16xf32>
      %296 = arith.truncf %295 : vector<8x16xf32> to vector<8x16xbf16>
      %cst_115 = arith.constant dense<0.000000e+00> : vector<8x32xf32>
      %297 = tpu.matmul %296, %282, %cst_115 {dimension_numbers = #tpu.dot_dimension_numbers<[1], [0], [0], [1], [0, 0, 1, 1], [], []>} : vector<8x16xbf16>, vector<16x32xbf16>, vector<8x32xf32> -> vector<8x32xf32>
      %298 = vector.extract_strided_slice %230 {offsets = [0, 96], sizes = [8, 32], strides = [1, 1]} : vector<8x128xf32> to vector<8x32xf32>
      %299 = arith.truncf %298 : vector<8x32xf32> to vector<8x32xbf16>
      %300 = vector.extract_strided_slice %232 {offsets = [0, 96], sizes = [16, 32], strides = [1, 1]} : vector<16x128xf32> to vector<16x32xf32>
      %301 = arith.truncf %300 : vector<16x32xf32> to vector<16x32xbf16>
      %302 = vector.extract_strided_slice %234 {offsets = [0, 96], sizes = [16, 32], strides = [1, 1]} : vector<16x128xf32> to vector<16x32xf32>
      %303 = arith.truncf %302 : vector<16x32xf32> to vector<16x32xbf16>
      %cst_116 = arith.constant dense<0.000000e+00> : vector<8x16xf32>
      %304 = tpu.matmul %299, %301, %cst_116 {dimension_numbers = #tpu.dot_dimension_numbers<[1], [1], [0], [0], [0, 0, 1, 0], [], []>} : vector<8x32xbf16>, vector<16x32xbf16>, vector<8x16xf32> -> vector<8x16xf32>
      %cst_117 = arith.constant 0.176776692 : f32
      %305 = vector.broadcast %cst_117 : f32 to vector<8x16xf32>
      %306 = arith.mulf %304, %305 : vector<8x16xf32>
      %cst_118 = arith.constant dense<0xFF800000> : vector<8xf32>
      %307 = vector.multi_reduction <maximumf>, %306, %cst_118 [1] : vector<8x16xf32> to vector<8xf32>
      %308 = vector.shape_cast %307 : vector<8xf32> to vector<8x1xf32>
      %309 = vector.broadcast %308 : vector<8x1xf32> to vector<8x16xf32>
      %310 = arith.subf %306, %309 : vector<8x16xf32>
      %311 = math.exp %310 : vector<8x16xf32>
      %cst_119 = arith.constant dense<0.000000e+00> : vector<8xf32>
      %312 = vector.multi_reduction <add>, %311, %cst_119 [1] : vector<8x16xf32> to vector<8xf32>
      %313 = vector.shape_cast %312 : vector<8xf32> to vector<8x1xf32>
      %314 = tpu.reciprocal %313 {approx = true} : vector<8x1xf32> -> vector<8x1xf32>
      %315 = vector.broadcast %314 : vector<8x1xf32> to vector<8x16xf32>
      %316 = arith.mulf %311, %315 : vector<8x16xf32>
      %317 = arith.truncf %316 : vector<8x16xf32> to vector<8x16xbf16>
      %cst_120 = arith.constant dense<0.000000e+00> : vector<8x32xf32>
      %318 = tpu.matmul %317, %303, %cst_120 {dimension_numbers = #tpu.dot_dimension_numbers<[1], [0], [0], [1], [0, 0, 1, 1], [], []>} : vector<8x16xbf16>, vector<16x32xbf16>, vector<8x32xf32> -> vector<8x32xf32>
      %319 = tpu.concatenate %255, %276, %297, %318 in 1 : vector<8x32xf32>, vector<8x32xf32>, vector<8x32xf32>, vector<8x32xf32> -> vector<8x128xf32>
      %320 = arith.truncf %319 : vector<8x128xf32> to vector<8x128xbf16>
      %c0_121 = arith.constant 0 : index
      %c0_122 = arith.constant 0 : index
      %321 = vector.load %arg16[%c0_121, %c0_122] : memref<128x128xbf16, #tpu.memory_space<vmem>>, vector<128x128xbf16>
      %cst_123 = arith.constant dense<0.000000e+00> : vector<8x128xf32>
      %322 = tpu.matmul %320, %321, %cst_123 {dimension_numbers = #tpu.dot_dimension_numbers<[1], [0], [0], [1], [0, 0, 1, 1], [], []>} : vector<8x128xbf16>, vector<128x128xbf16>, vector<8x128xf32> -> vector<8x128xf32>
      %323 = arith.addf %182, %322 : vector<8x128xf32>
      %c0_124 = arith.constant 0 : index
      %c0_125 = arith.constant 0 : index
      %324 = vector.load %arg17[%c0_124, %c0_125] : memref<1x128xf32, #tpu.memory_space<vmem>>, vector<1x128xf32>
      %325 = vector.broadcast %324 : vector<1x128xf32> to vector<8x128xf32>
      %326 = arith.addf %323, %325 : vector<8x128xf32>
      %c0_126 = arith.constant 0 : index
      %c0_127 = arith.constant 0 : index
      %327 = vector.load %arg18[%c0_126, %c0_127] : memref<1x128xf32, #tpu.memory_space<vmem>>, vector<1x128xf32>
      %c0_128 = arith.constant 0 : index
      %c0_129 = arith.constant 0 : index
      %328 = vector.load %arg19[%c0_128, %c0_129] : memref<1x128xf32, #tpu.memory_space<vmem>>, vector<1x128xf32>
      %cst_130 = arith.constant dense<0.000000e+00> : vector<8xf32>
      %329 = vector.multi_reduction <add>, %326, %cst_130 [1] : vector<8x128xf32> to vector<8xf32>
      %330 = vector.shape_cast %329 : vector<8xf32> to vector<8x1xf32>
      %cst_131 = arith.constant 1.280000e+02 : f32
      %331 = vector.broadcast %cst_131 : f32 to vector<8x1xf32>
      %332 = arith.divf %330, %331 : vector<8x1xf32>
      %333 = vector.broadcast %332 : vector<8x1xf32> to vector<8x128xf32>
      %334 = arith.subf %326, %333 : vector<8x128xf32>
      %335 = arith.mulf %334, %334 : vector<8x128xf32>
      %cst_132 = arith.constant dense<0.000000e+00> : vector<8xf32>
      %336 = vector.multi_reduction <add>, %335, %cst_132 [1] : vector<8x128xf32> to vector<8xf32>
      %337 = vector.shape_cast %336 : vector<8xf32> to vector<8x1xf32>
      %cst_133 = arith.constant 1.280000e+02 : f32
      %338 = vector.broadcast %cst_133 : f32 to vector<8x1xf32>
      %339 = arith.divf %337, %338 : vector<8x1xf32>
      %cst_134 = arith.constant 9.99999974E-6 : f32
      %340 = vector.broadcast %cst_134 : f32 to vector<8x1xf32>
      %341 = arith.addf %339, %340 : vector<8x1xf32>
      %342 = math.rsqrt %341 : vector<8x1xf32>
      %343 = vector.broadcast %342 : vector<8x1xf32> to vector<8x128xf32>
      %344 = arith.mulf %334, %343 : vector<8x128xf32>
      %345 = vector.broadcast %327 : vector<1x128xf32> to vector<8x128xf32>
      %346 = arith.mulf %344, %345 : vector<8x128xf32>
      %347 = vector.broadcast %328 : vector<1x128xf32> to vector<8x128xf32>
      %348 = arith.addf %346, %347 : vector<8x128xf32>
      %349 = arith.truncf %348 : vector<8x128xf32> to vector<8x128xbf16>
      %c0_135 = arith.constant 0 : index
      %c0_136 = arith.constant 0 : index
      %350 = vector.load %arg25[%c0_135, %c0_136] : memref<8x128xbf16, #tpu.memory_space<vmem>>, vector<8x128xbf16>
      tpu.vector_store %arg25[%c0_135, %c0_136], %349 {strides = array<i32>} : memref<8x128xbf16, #tpu.memory_space<vmem>>, vector<8x128xbf16>,
      %c0_137 = arith.constant 0 : index
      %c0_138 = arith.constant 0 : index
      %351 = vector.load %arg23[%c0_137, %c0_138] : memref<1x128xf32, #tpu.memory_space<vmem>>, vector<1x128xf32>
      %352 = vector.broadcast %351 : vector<1x128xf32> to vector<8x128xf32>
      %353 = arith.addf %326, %352 : vector<8x128xf32>
      %c0_139 = arith.constant 0 : index
      %c0_140 = arith.constant 0 : index
      %c0_141 = arith.constant 0 : index
      %354 = vector.load %arg24[%c0_139, %c0_140, %c0_141] : memref<1x8x128xf32, #tpu.memory_space<vmem>>, vector<1x8x128xf32>
      %355 = vector.shape_cast %354 : vector<1x8x128xf32> to vector<8x128xf32>
      %356 = vector.shape_cast %353 : vector<8x128xf32> to vector<1x8x128xf32>
      tpu.vector_store %arg24[%c0_139, %c0_140, %c0_141], %356 {strides = array<i32>} : memref<1x8x128xf32, #tpu.memory_space<vmem>>, vector<1x8x128xf32>,
    } else {
    }
    %c0 = arith.constant 0 : index
    %c0_1 = arith.constant 0 : index
    %3 = vector.load %arg25[%c0, %c0_1] : memref<8x128xbf16, #tpu.memory_space<vmem>>, vector<8x128xbf16>
    %c0_2 = arith.constant 0 : index
    %c0_3 = arith.constant 0 : index
    %4 = vector.load %arg20[%c0_2, %c0_3] : memref<128x256xbf16, #tpu.memory_space<vmem>>, vector<128x256xbf16>
    %cst = arith.constant dense<0.000000e+00> : vector<8x256xf32>
    %5 = tpu.matmul %3, %4, %cst {dimension_numbers = #tpu.dot_dimension_numbers<[1], [0], [0], [1], [0, 0, 1, 1], [], []>} : vector<8x128xbf16>, vector<128x256xbf16>, vector<8x256xf32> -> vector<8x256xf32>
    %c0_4 = arith.constant 0 : index
    %c0_5 = arith.constant 0 : index
    %6 = vector.load %arg21[%c0_4, %c0_5] : memref<1x256xf32, #tpu.memory_space<vmem>>, vector<1x256xf32>
    %7 = vector.broadcast %6 : vector<1x256xf32> to vector<8x256xf32>
    %8 = arith.addf %5, %7 : vector<8x256xf32>
    %cst_6 = arith.constant 5.000000e-01 : f32
    %9 = vector.broadcast %cst_6 : f32 to vector<8x256xf32>
    %10 = arith.mulf %9, %8 : vector<8x256xf32>
    %cst_7 = arith.constant 0.707106769 : f32
    %11 = vector.broadcast %cst_7 : f32 to vector<8x256xf32>
    %12 = arith.mulf %8, %11 : vector<8x256xf32>
    %cst_8 = arith.constant 0.000000e+00 : f32
    %13 = vector.broadcast %cst_8 : f32 to vector<8x256xf32>
    %14 = arith.cmpf oge, %12, %13 : vector<8x256xf32>
    %cst_9 = arith.constant 1.000000e+00 : f32
    %cst_10 = arith.constant -1.000000e+00 : f32
    %15 = vector.broadcast %cst_9 : f32 to vector<8x256xf32>
    %16 = vector.broadcast %cst_10 : f32 to vector<8x256xf32>
    %17 = arith.select %14, %15, %16 : vector<8x256xi1>, vector<8x256xf32>
    %18 = math.absf %12 : vector<8x256xf32>
    %cst_11 = arith.constant 0.327591091 : f32
    %19 = vector.broadcast %cst_11 : f32 to vector<8x256xf32>
    %20 = arith.mulf %19, %18 : vector<8x256xf32>
    %cst_12 = arith.constant 1.000000e+00 : f32
    %21 = vector.broadcast %cst_12 : f32 to vector<8x256xf32>
    %22 = arith.addf %21, %20 : vector<8x256xf32>
    %cst_13 = arith.constant 1.000000e+00 : f32
    %23 = vector.broadcast %cst_13 : f32 to vector<8x256xf32>
    %24 = arith.divf %23, %22 : vector<8x256xf32>
    %cst_14 = arith.constant 1.06140542 : f32
    %25 = vector.broadcast %cst_14 : f32 to vector<8x256xf32>
    %26 = arith.mulf %24, %25 : vector<8x256xf32>
    %cst_15 = arith.constant -1.45315206 : f32
    %27 = vector.broadcast %cst_15 : f32 to vector<8x256xf32>
    %28 = arith.addf %27, %26 : vector<8x256xf32>
    %29 = arith.mulf %24, %28 : vector<8x256xf32>
    %cst_16 = arith.constant 1.42141378 : f32
    %30 = vector.broadcast %cst_16 : f32 to vector<8x256xf32>
    %31 = arith.addf %30, %29 : vector<8x256xf32>
    %32 = arith.mulf %24, %31 : vector<8x256xf32>
    %cst_17 = arith.constant -0.284496725 : f32
    %33 = vector.broadcast %cst_17 : f32 to vector<8x256xf32>
    %34 = arith.addf %33, %32 : vector<8x256xf32>
    %35 = arith.mulf %24, %34 : vector<8x256xf32>
    %cst_18 = arith.constant 0.254829586 : f32
    %36 = vector.broadcast %cst_18 : f32 to vector<8x256xf32>
    %37 = arith.addf %36, %35 : vector<8x256xf32>
    %38 = arith.mulf %24, %37 : vector<8x256xf32>
    %cst_19 = arith.constant 0.000000e+00 : f32
    %39 = vector.broadcast %cst_19 : f32 to vector<8x256xf32>
    %40 = arith.subf %39, %18 : vector<8x256xf32>
    %41 = arith.mulf %40, %18 : vector<8x256xf32>
    %42 = math.exp %41 : vector<8x256xf32>
    %43 = arith.mulf %38, %42 : vector<8x256xf32>
    %cst_20 = arith.constant 1.000000e+00 : f32
    %44 = vector.broadcast %cst_20 : f32 to vector<8x256xf32>
    %45 = arith.subf %44, %43 : vector<8x256xf32>
    %46 = arith.mulf %17, %45 : vector<8x256xf32>
    %cst_21 = arith.constant 1.000000e+00 : f32
    %47 = vector.broadcast %cst_21 : f32 to vector<8x256xf32>
    %48 = arith.addf %47, %46 : vector<8x256xf32>
    %49 = arith.mulf %10, %48 : vector<8x256xf32>
    %c0_22 = arith.constant 0 : index
    %c0_23 = arith.constant 0 : index
    %c0_24 = arith.constant 0 : index
    %50 = vector.load %arg24[%c0_22, %c0_23, %c0_24] : memref<1x8x128xf32, #tpu.memory_space<vmem>>, vector<1x8x128xf32>
    %51 = vector.shape_cast %50 : vector<1x8x128xf32> to vector<8x128xf32>
    %52 = arith.truncf %49 : vector<8x256xf32> to vector<8x256xbf16>
    %c0_25 = arith.constant 0 : index
    %c0_26 = arith.constant 0 : index
    %53 = vector.load %arg22[%c0_25, %c0_26] : memref<256x128xbf16, #tpu.memory_space<vmem>>, vector<256x128xbf16>
    %cst_27 = arith.constant dense<0.000000e+00> : vector<8x128xf32>
    %54 = tpu.matmul %52, %53, %cst_27 {dimension_numbers = #tpu.dot_dimension_numbers<[1], [0], [0], [1], [0, 0, 1, 1], [], []>} : vector<8x256xbf16>, vector<256x128xbf16>, vector<8x128xf32> -> vector<8x128xf32>
    %55 = arith.addf %51, %54 : vector<8x128xf32>
    %c0_28 = arith.constant 0 : index
    %c0_29 = arith.constant 0 : index
    %c0_30 = arith.constant 0 : index
    %56 = vector.load %arg24[%c0_28, %c0_29, %c0_30] : memref<1x8x128xf32, #tpu.memory_space<vmem>>, vector<1x8x128xf32>
    %57 = vector.shape_cast %56 : vector<1x8x128xf32> to vector<8x128xf32>
    %58 = vector.shape_cast %55 : vector<8x128xf32> to vector<1x8x128xf32>
    tpu.vector_store %arg24[%c0_28, %c0_29, %c0_30], %58 {strides = array<i32>} : memref<1x8x128xf32, #tpu.memory_space<vmem>>, vector<1x8x128xf32>,
    return
  }
  func.func @transform_0(%arg0: i32, %arg1: i32) -> (i32, i32, i32) {
    %c0_i32 = arith.constant 0 : i32
    %c0_i32_0 = arith.constant 0 : i32
    %c0_i32_1 = arith.constant 0 : i32
    return %arg0, %c0_i32, %c0_i32_0 : i32, i32, i32
  }
  func.func @transform_1(%arg0: i32, %arg1: i32) -> (i32, i32, i32) {
    %c0_i32 = arith.constant 0 : i32
    %c0_i32_0 = arith.constant 0 : i32
    %c0_i32_1 = arith.constant 0 : i32
    return %arg0, %c0_i32, %c0_i32_0 : i32, i32, i32
  }
  func.func @transform_2(%arg0: i32, %arg1: i32) -> (i32, i32) {
    %c0_i32 = arith.constant 0 : i32
    %c0_i32_0 = arith.constant 0 : i32
    %c0_i32_1 = arith.constant 0 : i32
    return %c0_i32, %c0_i32_0 : i32, i32
  }
  func.func @transform_3(%arg0: i32, %arg1: i32) -> (i32, i32) {
    %c0_i32 = arith.constant 0 : i32
    %c0_i32_0 = arith.constant 0 : i32
    %c0_i32_1 = arith.constant 0 : i32
    return %c0_i32, %c0_i32_0 : i32, i32
  }
  func.func @transform_4(%arg0: i32, %arg1: i32) -> (i32, i32) {
    %c0_i32 = arith.constant 0 : i32
    %c0_i32_0 = arith.constant 0 : i32
    %c0_i32_1 = arith.constant 0 : i32
    return %c0_i32, %c0_i32_0 : i32, i32
  }
  func.func @transform_5(%arg0: i32, %arg1: i32) -> (i32, i32) {
    %c0_i32 = arith.constant 0 : i32
    %c0_i32_0 = arith.constant 0 : i32
    %c0_i32_1 = arith.constant 0 : i32
    return %c0_i32, %c0_i32_0 : i32, i32
  }
  func.func @transform_6(%arg0: i32, %arg1: i32) -> (i32, i32) {
    %c0_i32 = arith.constant 0 : i32
    %c0_i32_0 = arith.constant 0 : i32
    %c0_i32_1 = arith.constant 0 : i32
    return %c0_i32, %c0_i32_0 : i32, i32
  }
  func.func @transform_7(%arg0: i32, %arg1: i32) -> (i32, i32) {
    %c0_i32 = arith.constant 0 : i32
    %c0_i32_0 = arith.constant 0 : i32
    %c0_i32_1 = arith.constant 0 : i32
    return %c0_i32, %c0_i32_0 : i32, i32
  }
  func.func @transform_8(%arg0: i32, %arg1: i32) -> (i32, i32) {
    %c0_i32 = arith.constant 0 : i32
    %c0_i32_0 = arith.constant 0 : i32
    %c0_i32_1 = arith.constant 0 : i32
    return %c0_i32, %c0_i32_0 : i32, i32
  }
  func.func @transform_9(%arg0: i32, %arg1: i32) -> (i32, i32) {
    %c0_i32 = arith.constant 0 : i32
    %c0_i32_0 = arith.constant 0 : i32
    %c0_i32_1 = arith.constant 0 : i32
    return %c0_i32, %c0_i32_0 : i32, i32
  }
  func.func @transform_10(%arg0: i32, %arg1: i32) -> (i32, i32) {
    %c0_i32 = arith.constant 0 : i32
    %c0_i32_0 = arith.constant 0 : i32
    %c0_i32_1 = arith.constant 0 : i32
    return %c0_i32, %c0_i32_0 : i32, i32
  }
  func.func @transform_11(%arg0: i32, %arg1: i32) -> (i32, i32) {
    %c0_i32 = arith.constant 0 : i32
    %c0_i32_0 = arith.constant 0 : i32
    %c0_i32_1 = arith.constant 0 : i32
    return %c0_i32, %c0_i32_0 : i32, i32
  }
  func.func @transform_12(%arg0: i32, %arg1: i32) -> (i32, i32) {
    %c0_i32 = arith.constant 0 : i32
    %c0_i32_0 = arith.constant 0 : i32
    %c0_i32_1 = arith.constant 0 : i32
    return %c0_i32, %c0_i32_0 : i32, i32
  }
  func.func @transform_13(%arg0: i32, %arg1: i32) -> (i32, i32) {
    %c0_i32 = arith.constant 0 : i32
    %c0_i32_0 = arith.constant 0 : i32
    %c0_i32_1 = arith.constant 0 : i32
    return %c0_i32, %c0_i32_0 : i32, i32
  }
  func.func @transform_14(%arg0: i32, %arg1: i32) -> (i32, i32) {
    %c0_i32 = arith.constant 0 : i32
    %c0_i32_0 = arith.constant 0 : i32
    %c0_i32_1 = arith.constant 0 : i32
    return %c0_i32, %c0_i32_0 : i32, i32
  }
  func.func @transform_15(%arg0: i32, %arg1: i32) -> (i32, i32) {
    %c0_i32 = arith.constant 0 : i32
    %c0_i32_0 = arith.constant 0 : i32
    %c0_i32_1 = arith.constant 0 : i32
    return %c0_i32, %c0_i32_0 : i32, i32
  }
  func.func @transform_16(%arg0: i32, %arg1: i32) -> (i32, i32) {
    %c0_i32 = arith.constant 0 : i32
    %c0_i32_0 = arith.constant 0 : i32
    %c0_i32_1 = arith.constant 0 : i32
    return %c0_i32, %c0_i32_0 : i32, i32
  }
  func.func @transform_17(%arg0: i32, %arg1: i32) -> (i32, i32) {
    %c0_i32 = arith.constant 0 : i32
    %c0_i32_0 = arith.constant 0 : i32
    %c0_i32_1 = arith.constant 0 : i32
    return %c0_i32, %c0_i32_0 : i32, i32
  }
  func.func @transform_18(%arg0: i32, %arg1: i32) -> (i32, i32) {
    %c0_i32 = arith.constant 0 : i32
    %c0_i32_0 = arith.constant 0 : i32
    return %c0_i32, %arg1 : i32, i32
  }
  func.func @transform_19(%arg0: i32, %arg1: i32) -> (i32, i32) {
    %c0_i32 = arith.constant 0 : i32
    %c0_i32_0 = arith.constant 0 : i32
    return %c0_i32, %arg1 : i32, i32
  }
  func.func @transform_20(%arg0: i32, %arg1: i32) -> (i32, i32) {
    %c0_i32 = arith.constant 0 : i32
    %c0_i32_0 = arith.constant 0 : i32
    return %arg1, %c0_i32 : i32, i32
  }
  func.func @transform_21(%arg0: i32, %arg1: i32) -> (i32, i32) {
    %c0_i32 = arith.constant 0 : i32
    %c0_i32_0 = arith.constant 0 : i32
    %c0_i32_1 = arith.constant 0 : i32
    return %c0_i32, %c0_i32_0 : i32, i32
  }
  func.func @transform_22(%arg0: i32, %arg1: i32) -> (i32, i32, i32) {
    %c0_i32 = arith.constant 0 : i32
    %c0_i32_0 = arith.constant 0 : i32
    %c0_i32_1 = arith.constant 0 : i32
    return %arg0, %c0_i32, %c0_i32_0 : i32, i32, i32
  }
}

</mosaic_0001>

<bundles_post_ra>
// kernel: tpu_custom_call.1
= control target key start
LH: loop header
LB: loop body
LE: loop exit
PB: predicated region body
PF: predicated region fallthrough
CT: control target
= control target key end

     0   :  { %s5681_s0 = inlined_call_operand.hbm [shape: f32[2,8,128], index: 0, kind: input, shape index: {}]   ;;  %s5682_s1 = inlined_call_operand.hbm [shape: f32[2,16,128], index: 1, kind: input, shape index: {}]   ;;  %s5683_s2 = inlined_call_operand.vmem [shape: f32[1,128], index: 2, kind: input, shape index: {}]   ;;  %s5684_s3 = inlined_call_operand.vmem [shape: f32[1,128], index: 3, kind: input, shape index: {}]   ;;  %s5685_s4 = inlined_call_operand.hbm [shape: bf16[128,384], index: 4, kind: input, shape index: {}]   ;;  %s5686_s5 = inlined_call_operand.hbm [shape: bf16[128,128], index: 5, kind: input, shape index: {}]   ;;  %s5687_s6 = inlined_call_operand.vmem [shape: f32[1,128], index: 6, kind: input, shape index: {}]   ;;  %s5688_s7 = inlined_call_operand.vmem [shape: f32[1,128], index: 7, kind: input, shape index: {}]   ;;  %s5689_s8 = inlined_call_operand.vmem [shape: f32[1,128], index: 8, kind: input, shape index: {}]   ;;  %s5690_s9 = inlined_call_operand.vmem [shape: f32[1,128], index: 9, kind: input, shape index: {}]   ;;  %s5691_s10 = inlined_call_operand.vmem [shape: f32[1,128], index: 10, kind: input, shape index: {}]   ;;  %s5692_s11 = inlined_call_operand.hbm [shape: bf16[128,128], index: 11, kind: input, shape index: {}]   ;;  %s5693_s12 = inlined_call_operand.hbm [shape: bf16[128,128], index: 12, kind: input, shape index: {}]   ;;  %s5694_s13 = inlined_call_operand.hbm [shape: bf16[128,128], index: 13, kind: input, shape index: {}]   ;;  %s5695_s14 = inlined_call_operand.hbm [shape: bf16[128,128], index: 14, kind: input, shape index: {}]   ;;  %s5696_s15 = inlined_call_operand.vmem [shape: f32[1,128], index: 15, kind: input, shape index: {}]   ;;  %s5697_s16 = inlined_call_operand.vmem [shape: f32[1,128], index: 16, kind: input, shape index: {}]   ;;  %s5698_s17 = inlined_call_operand.vmem [shape: f32[1,128], index: 17, kind: input, shape index: {}]   ;;  %s5699_s18 = inlined_call_operand.hbm [shape: bf16[128,512], index: 18, kind: input, shape index: {}]   ;;  %s5700_s19 = inlined_call_operand.vmem [shape: f32[1,512], index: 19, kind: input, shape index: {}]   ;;  %s5701_s20 = inlined_call_operand.hbm [shape: bf16[512,128], index: 20, kind: input, shape index: {}]   ;;  %s5702_s21 = inlined_call_operand.vmem [shape: f32[1,128], index: 21, kind: input, shape index: {}]   ;;  %s5703_s22 = inlined_call_operand.hbm [shape: f32[2,8,128], index: 22, kind: output, shape index: {}]  }
   0x1   :  { %5745 = sst [smem:[#allocation40_spill]] %s5681_s0 }
   0x2   :  { %5746 = sst [smem:[#allocation41_spill]] %s5682_s1 }
   0x3   :  { %5747 = sst [smem:[#allocation42_spill]] %s5683_s2 }
   0x4   :  { %5748 = sst [smem:[#allocation43_spill]] %s5684_s3 }
   0x5   :  { %5749 = sst [smem:[#allocation44_spill]] %s5685_s4 }
   0x6   :  { %5750 = sst [smem:[#allocation45_spill]] %s5686_s5 }
   0x7   :  { %5751 = sst [smem:[#allocation46_spill]] %s5687_s6 }
   0x8   :  { %5752 = sst [smem:[#allocation47_spill]] %s5688_s7 }
   0x9   :  { %5753 = sst [smem:[#allocation48_spill]] %s5689_s8 }
   0xa   :  { %5754 = sst [smem:[#allocation49_spill]] %s5690_s9 }
   0xb   :  { %5755 = sst [smem:[#allocation50_spill]] %s5691_s10 }
   0xc   :  { %5756 = sst [smem:[#allocation51_spill]] %s5692_s11 }
   0xd   :  { %5757 = sst [smem:[#allocation52_spill]] %s5693_s12 }
   0xe   :  { %5758 = sst [smem:[#allocation53_spill]] %s5696_s15 }
   0xf   :  { %5759 = sst [smem:[#allocation54_spill]] %s5697_s16 }
  0x10   :  { %5760 = sst [smem:[#allocation55_spill]] %s5698_s17 }
  0x11   :  { %5761 = sst [smem:[#allocation56_spill]] %s5699_s18 }
  0x12   :  { %5762 = sst [smem:[#allocation57_spill]] %s5700_s19 }
  0x13   :  { %5763 = sst [smem:[#allocation58_spill]] %s5701_s20 }
  0x14   :  { %5764 = sst [smem:[#allocation59_spill]] %s5702_s21 }
  0x15   :  { %5765 = sst [smem:[#allocation60_spill]] %s5703_s22 }
  0x16   :  { %27 = vsyncpa [#allocation4], 0 }
  0x17   :  { %29 = vsyncpa [#allocation4 + $0x1], 0 }
  0x18   :  { %30 = vsyncpa [#allocation7], 0 }
  0x19   :  { %32 = vsyncpa [#allocation7 + $0x1], 0 }
  0x1a   :  { %33 = vsyncpa [#allocation10], 0 }
  0x1b   :  { %34 = vsyncpa [#allocation13], 0 }
  0x1c   :  { %35 = vsyncpa [#allocation16], 0 }
  0x1d   :  { %36 = vsyncpa [#allocation5], 0 }
  0x1e   :  { %38 = vsyncpa [#allocation5 + $0x1], 0  ;;  %s4801_s3 = smov 0   ;;  %s4803_s28 = smov 0  }
  0x1f   :  { %s4805_s29 = smov 0   ;;  %s4807_s30 = smov 0  }
  0x20   :  { %s4809_s4 = smov 0   ;;  %s4811_s0 = smov 0  }
  0x21   :  { %s4813_s23 = smov 0   ;;  %s4815_s1 = smov 0  }
  0x22   :  { %s4817_s5 = smov 0   ;;  %s4819_s24 = smov 0  }
  0x23   :  { %s4821_s6 = smov 0  }
  0x24 LB: > { %5766 = sst [smem:[#allocation29_spill]] %s4630_s30  ;;  %s4857_s25 = sadd.s32 4294967295, %s4658_s6   ;;  %s4658_s6 = sphi %s4821_s6, %s44_s6   ;;  %s4654_s24 = sphi %s4819_s24, %s5850_s24   ;;  %s4650_s5 = sphi %s4817_s5, %s5858_s5   ;;  %s4646_s1 = sphi %s4815_s1, %s5848_s1   ;;  %s4642_s23 = sphi %s4813_s23, %s5857_s23   ;;  %s4638_s0 = sphi %s4811_s0, %s5856_s0   ;;  %s4634_s4 = sphi %s4809_s4, %s5855_s4   ;;  %s4630_s30 = sphi %s4807_s30, %s5854_s30   ;;  %s4626_s29 = sphi %s4805_s29, %s5853_s29   ;;  %s4622_s28 = sphi %s4803_s28, %s5852_s28   ;;  %s4618_s3 = sphi %s4801_s3, %s5851_s3  }
  0x25   : > { %5767 = sst [smem:[#allocation30_spill]] %s4642_s23  ;;  %p3378_p0 = scmp.ge.s32.totalorder %s4658_s6, 1 }
  0x26   : > { %5768 = sst [smem:[#allocation31_spill]] %s4646_s1  ;;  %p5709_p1 = scmp.eq.s32.totalorder %s4857_s25, 0 }
  0x27   : > { %5769 = sst [smem:[#allocation32_spill]] %s4654_s24  ;;  %p574_p2 = scmp.lt.s32.totalorder %s4658_s6, 5 }
  0x28   : > { %s4660_s2 = smov [#allocation8]   ;;  %s4661_s1 = smov [#allocation9]  }
  0x29   : > { %p4862_p3 = pnand %p3378_p0, %p574_p2  ;;  %s592_s27 = sshll.u32 %s4660_s2, 4  ;;  %s593_s27 = int_to_ptr.vmem [resolvable:$true] %s592_s27 }
  0x2a   : > { %s605_s17 = sshll.u32 %s4661_s1, 4  ;;  %s5773_s15 = sld [smem:[#allocation44_spill]]  ;;  %s4874_s17 = int_to_ptr.vmem [resolvable:$true] %s605_s17 }
  0x2b   : > { %s5770_s26 = scalar_select %p4862_p3, 1, 0 }
  0x2c   : > { %p3899_p4 = pneg %p4862_p3 }
  0x2d   : > { %5771 = sst [smem:[#allocation33_spill]] %s5770_s26 }
  0x2e   : > { %p4870_p5 = pnand %p3899_p4, %p5709_p1 }
  0x30   : > { %s5772_s22 = scalar_select %p4870_p5, 1, 0 }
  0x31   : > { %s4220_s8 = scalar_lea.hbm %s5773_s15, 3072  ;;  %p4884_p7 = pneg %p4870_p5 }
  0x32   : > { %p4221_p6 = scmp.ne.s32.totalorder %s5773_s15, %s4220_s8  ;;  %p4227_p10 = scmp.lt.u32.totalorder %s4220_s8, %s5773_s15 }
  0x33   : > { %s5774_s2 = scalar_select %p4884_p7, 1, 0 }
  0x34   : > { %p4223_p8 = pnand %p4884_p7, %p4221_p6 }
  0x36   : > { %p4224_p9 = pneg %p4223_p8 }
  0x38   : > { %p4229_p11 = pnand %p4227_p10, %p4224_p9 }
  0x3a   : > { %4232 = shalt.err (!%p4229_p11)
}
  0x3b   : > { %s4233_s16 = scalar_lea.vmem %s593_s27, 3072  ;;  %p4241_p2 = scmp.lt.s32.totalorder %s593_s27, %s593_s27 }
  0x3c   : > { %p4234_p12 = scmp.ne.s32.totalorder %s593_s27, %s4233_s16  ;;  %p4242_p4 = scmp.lt.s32.totalorder %s4233_s16, %s4233_s16 }
  0x3e   : > { %p4236_p13 = pnand %p4234_p12, %p4884_p7  ;;  %p4243_p1 = por %p4242_p4, %p4241_p2 }
  0x40   : > { %p4237_p0 = pneg %p4236_p13 }
  0x42   : > { %p4244_p3 = pnand %p4243_p1, %p4237_p0 }
  0x44   : > { %4247 = shalt.err (!%p4244_p3)
}
  0x45   : > { %s4662_s7 = smov 192   ;;  %s4663_s10 = smov 12  }
  0x46   : > { %3902 = dma.hbm_to_vmem [thread:$0]  (!%p4870_p5), %s5773_s15, 3072, %s593_s27, [#allocation7], %s4662_s7, %s4662_s7, %s4663_s10  }
  0x47   : > { %s5775_s19 = sld [smem:[#allocation45_spill]] }
  0x4d   : > { %s4248_s23 = scalar_lea.hbm %s5775_s19, 1024 }
  0x4e   : > { %p4249_p6 = scmp.ne.s32.totalorder %s5775_s19, %s4248_s23  ;;  %p4255_p8 = scmp.lt.u32.totalorder %s4248_s23, %s5775_s19 }
  0x50   : > { %p4251_p1 = pnand %p4249_p6, %p4884_p7 }
  0x52   : > { %p4252_p3 = pneg %p4251_p1 }
  0x54   : > { %p4257_p9 = pnand %p4255_p8, %p4252_p3 }
  0x56   : > { %4260 = shalt.err (!%p4257_p9)
}
  0x57   : > { %s4261_s27 = scalar_lea.vmem %s4874_s17, 1024  ;;  %p4269_p13 = scmp.lt.s32.totalorder %s4874_s17, %s4874_s17 }
  0x58   : > { %p4262_p10 = scmp.ne.s32.totalorder %s4874_s17, %s4261_s27  ;;  %p4270_p0 = scmp.lt.s32.totalorder %s4261_s27, %s4261_s27 }
  0x5a   : > { %p4264_p11 = pnand %p4262_p10, %p4884_p7  ;;  %p4271_p2 = por %p4270_p0, %p4269_p13 }
  0x5c   : > { %p4265_p12 = pneg %p4264_p11 }
  0x5e   : > { %p4272_p4 = pnand %p4271_p2, %p4265_p12 }
  0x60   : > { %4275 = shalt.err (!%p4272_p4)
}
  0x61   : > { %s5723_s20 = smov 64   ;;  %s5725_s18 = smov 4  }
  0x62   : > { %3905 = dma.hbm_to_vmem [thread:$0]  (!%p4870_p5), %s5775_s19, 1024, %s4874_s17, [#allocation10], %s5723_s20, %s5723_s20, %s5725_s18  }
  0x63   : > { %s4666_s7 = smov [#allocation12]   ;;  %s5776_s12 = sld [smem:[#allocation52_spill]] }
  0x64   : > { %s646_s10 = sshll.u32 %s4666_s7, 4  ;;  %s647_s10 = int_to_ptr.vmem [resolvable:$true] %s646_s10 }
  0x69   : > { %s4276_s21 = scalar_lea.hbm %s5776_s12, 1024 }
  0x6a   : > { %p4277_p6 = scmp.ne.s32.totalorder %s5776_s12, %s4276_s21  ;;  %p4283_p8 = scmp.lt.u32.totalorder %s4276_s21, %s5776_s12 }
  0x6c   : > { %p4279_p1 = pnand %p4277_p6, %p4884_p7 }
  0x6e   : > { %p4280_p3 = pneg %p4279_p1 }
  0x70   : > { %p4285_p9 = pnand %p4283_p8, %p4280_p3 }
  0x72   : > { %4288 = shalt.err (!%p4285_p9)
}
  0x73   : > { %s4289_s17 = scalar_lea.vmem %s647_s10, 1024  ;;  %p4297_p13 = scmp.lt.s32.totalorder %s647_s10, %s647_s10 }
  0x74   : > { %p4290_p10 = scmp.ne.s32.totalorder %s647_s10, %s4289_s17  ;;  %p4298_p0 = scmp.lt.s32.totalorder %s4289_s17, %s4289_s17 }
  0x76   : > { %p4292_p11 = pnand %p4290_p10, %p4884_p7  ;;  %p4299_p2 = por %p4298_p0, %p4297_p13 }
  0x78   : > { %p4293_p12 = pneg %p4292_p11 }
  0x7a   : > { %p4300_p4 = pnand %p4299_p2, %p4293_p12 }
  0x7c   : > { %4303 = shalt.err (!%p4300_p4)
}
  0x7d   : > { %3911 = dma.hbm_to_vmem [thread:$0]  (!%p4870_p5), %s5776_s12, 1024, %s647_s10, [#allocation13], %s5723_s20, %s5723_s20, %s5725_s18  }
  0x7e   : > { %s3377_s26 = sadd.s32 4294967294, %s4658_s6   ;;  %s53_s7 = sadd.s32 1, %s4650_s5 }
  0x7f   : > { %s56_s9 = sadd.s32 1, %s4654_s24  ;;  %p54_p6 = scmp.ge.s32.totalorder %s53_s7, 2 }
  0x80   : > { %s63_s8 = sadd.s32 1, %s4638_s0  ;;  %p5717_p1 = scmp.ne.s32.totalorder %s4638_s0, %s4634_s4 }
  0x81   : > { %p71_p3 = scmp.eq.s32.totalorder %s4658_s6, 0  ;;  %s5860_s7 = smov (%p54_p6, %s53_s7), 0 }
  0x82   : > { %5777 = sst [smem:[#allocation34_spill]] %s5860_s7  ;;  %s5862_s9 = smov (!%p54_p6, %s56_s9), %s4654_s24 }
  0x83   : > { %p4962_p8 = por %p71_p3, %p5717_p1  ;;  %p5716_p9 = scmp.ne.s32.totalorder %s4634_s4, %s4630_s30 }
  0x84   : > { %p58_p10 = scmp.ge.s32.totalorder %s5862_s9, 2  ;;  %s448_s21 = ssub.s32 %s4650_s5, %s5860_s7 }
  0x85   : > { %p5779_p11 = scmp.eq.s32.totalorder %s4857_s25, 0  ;;  %p449_p13 = scmp.eq.s32.totalorder %s448_s21, 0 }
  0x86   : > { %s5864_s9 = smov (%p58_p10, %s5862_s9), 0  ;;  %s451_s16 = sadd.s32 1, %s4626_s29 }
  0x87   : > { %p4975_p12 = por %p5779_p11, %p5716_p9  ;;  %5781 = sst [smem:[#allocation35_spill]] %s5864_s9 }
  0x88   : > { %p458_p0 = scmp.ne.s32.totalorder %s4626_s29, %s4622_s28  ;;  %s60_s27 = ssub.s32 %s4654_s24, %s5864_s9 }
  0x89   : > { %s5780_s1 = scalar_select %p4975_p12, 1, 0 }
  0x8a   : > { %p464_p2 = scmp.ne.s32.totalorder %s4622_s28, %s4618_s3  ;;  %p61_p4 = scmp.eq.s32.totalorder %s60_s27, 0 }
  0x8b   : > { %p4990_p6 = por %p458_p0, %p71_p3  ;;  %p5785_p10 = pmov %p5779_p11 }
  0x8c   : > { %s4995_s15 = scalar_select %p449_p13, %s4626_s29, %s451_s16  }
  0x8d   : > { %s4998_s23 = scalar_select %p61_p4, %s4638_s0, %s63_s8  }
  0x8e   : > { %5783 = sst [smem:[#allocation36_spill]] %s4995_s15  ;;  %p5002_p11 = por %p464_p2, %p5785_p10 }
  0x8f   : > { %5784 = sst [smem:[#allocation37_spill]] %s4998_s23  ;;  %p561_p9 = scmp.eq.s32.totalorder %s4857_s25, 3 }
  0x90   : > { %s5786_s21 = scalar_select %p5002_p11, 1, 0 }
  0x91   : > { %p567_p1 = scmp.eq.s32.totalorder %s3377_s26, 3  ;;  %p5732_p12 = scmp.lt.s32.totalorder %s4658_s6, 4 }
  0x92   : > { %p5787_p5 = scmp.ne.s32.totalorder %s4638_s0, %s4634_s4  ;;  %p5790_p3 = scmp.ne.s32.totalorder %s4634_s4, %s4630_s30 }
  0x93   : > { %s5730_s8 = sand.u32 1, %s4638_s0   ;;  %s3387_s20 = sshll.u32 %s4654_s24, 7 }
  0x94   : > { %p5011_p7 = por %p561_p9, %p5787_p5  ;;  %p5019_p13 = por %p567_p1, %p5790_p3 }
  0x95   : > { %s3386_s18 = sshll.u32 %s5730_s8, 3  ;;  %s5793_s9 = sld [smem:[#allocation40_spill]] }
  0x96   : > { %s5788_s3 = scalar_select %p5011_p7, 1, 0 }
  0x97   : > { %s5791_s16 = scalar_select %p5019_p13, 1, 0 }
  0x98   : > { %5789 = sst [smem:[#allocation38_spill]] %s5788_s3  ;;  %p5036_p5 = pnand %p5732_p12, %p4962_p8 }
  0x99   : > { %5792 = sst [smem:[#allocation39_spill]] %s5791_s16  ;;  %s702_s7 = scalar_lea.vmem [#allocation3], %s3386_s18 }
  0x9a   : > { %s709_s23 = sshll.u32 %s702_s7, 4  ;;  %s5795_s8 = sand.u32 1, %s4658_s6   ;;  %s5040_s23 = int_to_ptr.vmem [resolvable:$true] %s709_s23 }
  0x9b   : > { %s5030_s26 = scalar_lea.hbm %s5793_s9, %s3387_s20  ;;  %s5044_s12 = scalar_lea.sflag [#allocation4], %s5795_s8 }
  0x9c   : > { %s4304_s19 = scalar_lea.hbm %s5030_s26, 128  ;;  %p4306_p9 = pneg %p5036_p5 }
  0x9d   : > { %p4305_p1 = scmp.ne.s32.totalorder %s5030_s26, %s4304_s19  ;;  %s4309_s15 = scalar_lea.hbm %s5793_s9, 256 }
  0x9e   : > { %p4310_p2 = scmp.lt.u32.totalorder %s5030_s26, %s5793_s9  ;;  %p4311_p4 = scmp.lt.u32.totalorder %s4309_s15, %s4304_s19 }
  0x9f   : > { %p4307_p0 = pnand %p4306_p9, %p4305_p1  ;;  %p4313_p3 = scmp.lt.u32.totalorder %s4304_s19, %s5030_s26 }
  0xa0   : > { %p4312_p10 = por %p4311_p4, %p4310_p2 }
  0xa1   : > { %p4308_p8 = pneg %p4307_p0 }
  0xa2   : > { %p4314_p12 = por %p4313_p3, %p4312_p10 }
  0xa4   : > { %p4315_p13 = pnand %p4314_p12, %p4308_p8 }
  0xa6   : > { %4318 = shalt.err (!%p4315_p13)
}
  0xa7   : > { %s4319_s7 = scalar_lea.vmem %s5040_s23, 128  ;;  %s4667_s8 = smov [#allocation3]  }
  0xa8   : > { %p4320_p1 = scmp.ne.s32.totalorder %s5040_s23, %s4319_s7  ;;  %s4324_s20 = sshll.u32 %s4667_s8, 4  ;;  %s4325_s20 = int_to_ptr.vmem [resolvable:$false] %s4324_s20 }
  0xa9   : > { %s4326_s16 = scalar_lea.vmem %s4325_s20, 256  ;;  %p4327_p11 = scmp.lt.s32.totalorder %s5040_s23, %s4325_s20 }
  0xaa   : > { %p4322_p0 = pnand %p4320_p1, %p4306_p9  ;;  %p4328_p2 = scmp.lt.s32.totalorder %s4326_s16, %s4319_s7 }
  0xac   : > { %p4323_p7 = pneg %p4322_p0  ;;  %p4329_p4 = por %p4328_p2, %p4327_p11 }
  0xae   : > { %p4330_p10 = pnand %p4329_p4, %p4323_p7 }
  0xb0   : > { %4333 = shalt.err (!%p4330_p10)
}
  0xb1   : > { %3921 = dma.hbm_to_vmem [thread:$0]  (!%p5036_p5), %s5030_s26, 128, %s5040_s23, %s5044_s12  }
  0xb2   : > { %s5796_s15 = sand.u32 1, %s4638_s0   ;;  %p5797_p12 = scmp.lt.s32.totalorder %s4658_s6, 4 }
  0xb3   : > { %s3388_s19 = sshll.u32 %s5796_s15, 4  ;;  %s3538_s18 = sshll.u32 %s4654_s24, 8 }
  0xb4   : > { %p5078_p13 = pnand %p5797_p12, %p4990_p6  ;;  %s720_s7 = scalar_lea.vmem [#allocation6], %s3388_s19 }
  0xb5   : > { %s727_s8 = sshll.u32 %s720_s7, 4  ;;  %s5799_s9 = sld [smem:[#allocation41_spill]]  ;;  %s5083_s8 = int_to_ptr.vmem [resolvable:$true] %s727_s8 }
  0xb6   : > { %s5798_s10 = scalar_select %p5078_p13, 1, 0 }
  0xb7   : > { %s5800_s3 = sand.u32 1, %s4658_s6  }
  0xb8   : > { %s5092_s17 = scalar_lea.sflag [#allocation7], %s5800_s3 }
  0xbb   : > { %s5088_s30 = scalar_lea.hbm %s5799_s9, %s3538_s18  ;;  %s4339_s19 = scalar_lea.hbm %s5799_s9, 512 }
  0xbc   : > { %s4334_s23 = scalar_lea.hbm %s5088_s30, 256  ;;  %p4340_p8 = scmp.lt.u32.totalorder %s5088_s30, %s5799_s9 }
  0xbd   : > { %p4335_p7 = scmp.ne.s32.totalorder %s5088_s30, %s4334_s23  ;;  %p4341_p3 = scmp.lt.u32.totalorder %s4339_s19, %s4334_s23 }
  0xbe   : > { %p4343_p0 = scmp.lt.u32.totalorder %s4334_s23, %s5088_s30 }
  0xbf   : > { %p4337_p6 = pnand %p4335_p7, %p4306_p9  ;;  %p4342_p1 = por %p4341_p3, %p4340_p8 }
  0xc1   : > { %p4338_p11 = pneg %p4337_p6  ;;  %p4344_p2 = por %p4343_p0, %p4342_p1 }
  0xc3   : > { %p4345_p4 = pnand %p4344_p2, %p4338_p11 }
  0xc5   : > { %4348 = shalt.err (!%p4345_p4)
}
  0xc6   : > { %s4349_s3 = scalar_lea.vmem %s5083_s8, 256  ;;  %s4668_s20 = smov [#allocation6]  }
  0xc7   : > { %p4350_p10 = scmp.ne.s32.totalorder %s5083_s8, %s4349_s3  ;;  %s4354_s16 = sshll.u32 %s4668_s20, 4  ;;  %s4355_s16 = int_to_ptr.vmem [resolvable:$false] %s4354_s16 }
  0xc8   : > { %s4356_s26 = scalar_lea.vmem %s4355_s16, 512  ;;  %p4357_p6 = scmp.lt.s32.totalorder %s5083_s8, %s4355_s16 }
  0xc9   : > { %p4352_p12 = pnand %p4350_p10, %p4306_p9  ;;  %p4358_p8 = scmp.lt.s32.totalorder %s4356_s26, %s4349_s3 }
  0xcb   : > { %p4353_p7 = pneg %p4352_p12  ;;  %p4359_p3 = por %p4358_p8, %p4357_p6 }
  0xcd   : > { %p4360_p1 = pnand %p4359_p3, %p4353_p7 }
  0xcf   : > { %4363 = shalt.err (!%p4360_p1)
}
  0xd0   : > { %s5741_s23 = smov 128   ;;  %s5742_s15 = smov 8  }
  0xd1   : > { %3924 = dma.hbm_to_vmem [thread:$0]  (!%p5036_p5), %s5088_s30, 256, %s5083_s8, %s5092_s17, %s5741_s23, %s5741_s23, %s5742_s15  }
  0xd2   : > { %s4671_s19 = smov [#allocation11]   ;;  %s4672_s18 = smov [#allocation14]  }
  0xd3   : > { %s633_s7 = sshll.u32 %s4671_s19, 4  ;;  %s659_s20 = sshll.u32 %s4672_s18, 4  ;;  %s634_s7 = int_to_ptr.vmem [resolvable:$true] %s633_s7  ;;  %s5121_s20 = int_to_ptr.vmem [resolvable:$true] %s659_s20 }
  0xd4   : > { %s5801_s11 = sld [smem:[#allocation51_spill]]  ;;  %p5802_p11 = scmp.ne.s32.totalorder %s5774_s2, 0 }
  0xda   : > { %s4364_s26 = scalar_lea.hbm %s5801_s11, 1024 }
  0xdb   : > { %p4365_p9 = scmp.ne.s32.totalorder %s5801_s11, %s4364_s26  ;;  %p4371_p5 = scmp.lt.u32.totalorder %s4364_s26, %s5801_s11 }
  0xdd   : > { %p4367_p0 = pnand %p4365_p9, %p5802_p11 }
  0xdf   : > { %p4368_p2 = pneg %p4367_p0 }
  0xe1   : > { %p4373_p4 = pnand %p4371_p5, %p4368_p2 }
  0xe3   : > { %4376 = shalt.err (!%p4373_p4)
}
  0xe4   : > { %s4377_s8 = scalar_lea.vmem %s634_s7, 1024  ;;  %p4385_p6 = scmp.lt.s32.totalorder %s634_s7, %s634_s7 }
  0xe5   : > { %p4378_p10 = scmp.ne.s32.totalorder %s634_s7, %s4377_s8  ;;  %p4386_p8 = scmp.lt.s32.totalorder %s4377_s8, %s4377_s8 }
  0xe7   : > { %p4380_p12 = pnand %p4378_p10, %p5802_p11  ;;  %p4387_p3 = por %p4386_p8, %p4385_p6 }
  0xe9   : > { %p4381_p7 = pneg %p4380_p12 }
  0xeb   : > { %p4388_p1 = pnand %p4387_p3, %p4381_p7 }
  0xed   : > { %4391 = shalt.err (!%p4388_p1)
}
  0xee   : > { %p5803_p9 = scmp.ne.s32.totalorder %s5772_s22, 0  ;;  %s5804_s24 = smov 4  }
  0xef   : > { %s5805_s9 = smov 64   ;;  %s4392_s26 = scalar_lea.hbm %s5694_s13, 1024 }
  0xf0   : > { %3908 = dma.hbm_to_vmem [thread:$0]  (!%p5803_p9), %s5801_s11, 1024, %s634_s7, [#allocation10], %s5805_s9, %s5805_s9, %s5804_s24  }
  0xf1   : > { %p4393_p0 = scmp.ne.s32.totalorder %s5694_s13, %s4392_s26  ;;  %p4399_p4 = scmp.lt.u32.totalorder %s4392_s26, %s5694_s13 }
  0xf3   : > { %p4395_p2 = pnand %p4393_p0, %p5802_p11 }
  0xf5   : > { %p4396_p5 = pneg %p4395_p2 }
  0xf7   : > { %p4401_p10 = pnand %p4399_p4, %p4396_p5 }
  0xf9   : > { %4404 = shalt.err (!%p4401_p10)
}
  0xfa   : > { %s4405_s7 = scalar_lea.vmem %s5121_s20, 1024  ;;  %p4413_p8 = scmp.lt.s32.totalorder %s5121_s20, %s5121_s20 }
  0xfb   : > { %p4406_p12 = scmp.ne.s32.totalorder %s5121_s20, %s4405_s7  ;;  %p4414_p3 = scmp.lt.s32.totalorder %s4405_s7, %s4405_s7 }
  0xfd   : > { %p4408_p7 = pnand %p4406_p12, %p5802_p11  ;;  %p4415_p1 = por %p4414_p3, %p4413_p8 }
  0xff   : > { %p4409_p6 = pneg %p4408_p7 }
 0x101   : > { %p4416_p0 = pnand %p4415_p1, %p4409_p6 }
 0x103   : > { %4419 = shalt.err (!%p4416_p0)
}
 0x104   : > { %3914 = dma.hbm_to_vmem [thread:$0]  (!%p5803_p9), %s5694_s13, 1024, %s5121_s20, [#allocation13], %s5805_s9, %s5805_s9, %s5804_s24  }
 0x105   : > { %s739_s18 = sand.u32 1, %s4626_s29   ;;  %s4673_s3 = smov [#allocation15]  }
 0x106   : > { %s672_s16 = sshll.u32 %s4673_s3, 4  ;;  %s5171_s26 = sshll.u32 %s739_s18, 7  ;;  %s673_s16 = int_to_ptr.vmem [resolvable:$true] %s672_s16 }
 0x107   : > { %s4420_s8 = scalar_lea.hbm %s5695_s14, 1024 }
 0x108   : > { %p4421_p2 = scmp.ne.s32.totalorder %s5695_s14, %s4420_s8  ;;  %p4427_p10 = scmp.lt.u32.totalorder %s4420_s8, %s5695_s14 }
 0x10a   : > { %p4423_p5 = pnand %p4421_p2, %p5802_p11 }
 0x10c   : > { %p4424_p4 = pneg %p4423_p5 }
 0x10e   : > { %p4429_p12 = pnand %p4427_p10, %p4424_p4 }
 0x110   : > { %4432 = shalt.err (!%p4429_p12)
}
 0x111   : > { %s4433_s20 = scalar_lea.vmem %s673_s16, 1024  ;;  %p4441_p3 = scmp.lt.s32.totalorder %s673_s16, %s673_s16 }
 0x112   : > { %p4434_p7 = scmp.ne.s32.totalorder %s673_s16, %s4433_s20  ;;  %p4442_p1 = scmp.lt.s32.totalorder %s4433_s20, %s4433_s20 }
 0x114   : > { %p4436_p6 = pnand %p4434_p7, %p5802_p11  ;;  %p4443_p0 = por %p4442_p1, %p4441_p3 }
 0x116   : > { %p4437_p8 = pneg %p4436_p6 }
 0x118   : > { %p4444_p13 = pnand %p4443_p0, %p4437_p8 }
 0x11a   : > { %4447 = shalt.err (!%p4444_p13)
}
 0x11b   : > { %3917 = dma.hbm_to_vmem [thread:$0]  (!%p5803_p9), %s5695_s14, 1024, %s673_s16, [#allocation16], %s5805_s9, %s5805_s9, %s5804_s24  }
 0x11c   : > { %s3539_s2 = sshll.u32 %s4650_s5, 7  ;;  %s741_s3 = scalar_lea.vmem [#allocation17], %s5171_s26 }
 0x11d   : > { %s748_s27 = sshll.u32 %s741_s3, 4  ;;  %s5806_s7 = sld [smem:[#allocation56_spill]]  ;;  %s5201_s27 = int_to_ptr.vmem [resolvable:$true] %s748_s27 }
 0x11e   : > { %p5807_p11 = scmp.ne.s32.totalorder %s5798_s10, 0 }
 0x120   : > { %p4450_p2 = pneg %p5807_p11 }
 0x123   : > { %s5199_s23 = scalar_lea.hbm %s5806_s7, %s3539_s2  ;;  %s4453_s20 = scalar_lea.hbm %s5806_s7, 4096 }
 0x124   : > { %s4448_s22 = scalar_lea.hbm %s5199_s23, 2048  ;;  %p4454_p4 = scmp.lt.u32.totalorder %s5199_s23, %s5806_s7 }
 0x125   : > { %p4449_p13 = scmp.ne.s32.totalorder %s5199_s23, %s4448_s22  ;;  %p4455_p10 = scmp.lt.u32.totalorder %s4453_s20, %s4448_s22 }
 0x126   : > { %p4457_p7 = scmp.lt.u32.totalorder %s4448_s22, %s5199_s23 }
 0x127   : > { %p4451_p9 = pnand %p4450_p2, %p4449_p13  ;;  %p4456_p12 = por %p4455_p10, %p4454_p4 }
 0x129   : > { %p4452_p5 = pneg %p4451_p9  ;;  %p4458_p6 = por %p4457_p7, %p4456_p12 }
 0x12b   : > { %p4459_p8 = pnand %p4458_p6, %p4452_p5 }
 0x12d   : > { %4462 = shalt.err (!%p4459_p8)
}
 0x12e   : > { %s4463_s2 = scalar_lea.vmem %s5201_s27, 2048  ;;  %s4674_s3 = smov [#allocation17]  }
 0x12f   : > { %p4464_p3 = scmp.ne.s32.totalorder %s5201_s27, %s4463_s2  ;;  %s4468_s30 = sshll.u32 %s4674_s3, 4  ;;  %s4469_s30 = int_to_ptr.vmem [resolvable:$false] %s4468_s30 }
 0x130   : > { %s4470_s8 = scalar_lea.vmem %s4469_s30, 4096  ;;  %p4471_p13 = scmp.lt.s32.totalorder %s5201_s27, %s4469_s30 }
 0x131   : > { %p4466_p1 = pnand %p4464_p3, %p4450_p2  ;;  %p4472_p9 = scmp.lt.s32.totalorder %s4470_s8, %s4463_s2 }
 0x133   : > { %p4467_p0 = pneg %p4466_p1  ;;  %p4473_p4 = por %p4472_p9, %p4471_p13 }
 0x135   : > { %p4474_p10 = pnand %p4473_p4, %p4467_p0 }
 0x137   : > { %4477 = shalt.err (!%p4474_p10)
}
 0x138   : > { %s4675_s22 = smov 256   ;;  %s5808_s16 = smov 8  }
 0x139   : > { %s5809_s19 = smov 128   ;;  %s3540_s20 = sshll.u32 %s4650_s5, 11 }
 0x13a   : > { %3927 = dma.hbm_to_vmem [thread:$0]  (!%p5807_p11), %s5199_s23, 2048, %s5201_s27, %s5044_s12, %s4675_s22, %s5809_s19, %s5808_s16  }
 0x13b   : > { %s770_s15 = scalar_lea.vmem [#allocation18], %s5171_s26  ;;  %s5810_s30 = sld [smem:[#allocation58_spill]] }
 0x13c   : > { %s777_s18 = sshll.u32 %s770_s15, 4  ;;  %s5238_s18 = int_to_ptr.vmem [resolvable:$true] %s777_s18 }
 0x141   : > { %s5811_s8 = smov %s5810_s30  ;;  %s5236_s7 = scalar_lea.hbm %s5810_s30, %s3540_s20 }
 0x142   : > { %s4478_s11 = scalar_lea.hbm %s5236_s7, 2048  ;;  %s4483_s27 = scalar_lea.hbm %s5811_s8, 4096 }
 0x143   : > { %p4479_p5 = scmp.ne.s32.totalorder %s5236_s7, %s4478_s11  ;;  %p4484_p6 = scmp.lt.u32.totalorder %s5236_s7, %s5811_s8 }
 0x144   : > { %p4485_p8 = scmp.lt.u32.totalorder %s4483_s27, %s4478_s11  ;;  %p4487_p1 = scmp.lt.u32.totalorder %s4478_s11, %s5236_s7 }
 0x145   : > { %p4481_p12 = pnand %p4479_p5, %p4450_p2 }
 0x146   : > { %p4486_p3 = por %p4485_p8, %p4484_p6 }
 0x147   : > { %p4482_p7 = pneg %p4481_p12 }
 0x148   : > { %p4488_p0 = por %p4487_p1, %p4486_p3 }
 0x14a   : > { %p4489_p13 = pnand %p4488_p0, %p4482_p7 }
 0x14c   : > { %4492 = shalt.err (!%p4489_p13)
}
 0x14d   : > { %s4493_s16 = scalar_lea.vmem %s5238_s18, 2048  ;;  %s4676_s19 = smov [#allocation18]  }
 0x14e   : > { %p4494_p9 = scmp.ne.s32.totalorder %s5238_s18, %s4493_s16  ;;  %s4498_s20 = sshll.u32 %s4676_s19, 4  ;;  %s4499_s20 = int_to_ptr.vmem [resolvable:$false] %s4498_s20 }
 0x14f   : > { %s4500_s15 = scalar_lea.vmem %s4499_s20, 4096  ;;  %p4501_p5 = scmp.lt.s32.totalorder %s5238_s18, %s4499_s20 }
 0x150   : > { %p4496_p4 = pnand %p4494_p9, %p4450_p2  ;;  %p4502_p12 = scmp.lt.s32.totalorder %s4500_s15, %s4493_s16 }
 0x152   : > { %p4497_p10 = pneg %p4496_p4  ;;  %p4503_p6 = por %p4502_p12, %p4501_p5 }
 0x154   : > { %p4504_p8 = pnand %p4503_p6, %p4497_p10 }
 0x156   : > { %4507 = shalt.err (!%p4504_p8)
}
 0x157   : > { %3930 = dma.hbm_to_vmem [thread:$0]  (!%p5807_p11), %s5236_s7, 2048, %s5238_s18, %s5092_s17, %s5805_s9, %s5805_s9, %s5804_s24  }
 0x158   : > { %s5812_s11 = sld [smem:[#allocation33_spill]] }
 0x15e   : > { %p5813_p2 = scmp.ne.s32.totalorder %s5812_s11, 0 }
 0x15f   : > { %s791_s3 = sand.u32 (!%p5813_p2), 1, %s4857_s25   ;;  %s5271_s2 = sand.u32 (!%p5813_p2), 1, %s4634_s4  }
 0x160   : > { %789 = sbr.rel (%p5813_p2) target bundleno = 5171 (0x1433), region = 108  ;;  %s3398_s30 = sshll.u32 (!%p5813_p2), %s5271_s2, 3 }
 0x161   : > { %s792_s10 = scalar_lea.sflag (!%p5813_p2), [#allocation4], %s791_s3  ;;  %s5276_s12 = scalar_lea.vmem (!%p5813_p2), [#allocation3], %s3398_s30 }
 0x162   : > { %p5814_p7 = scmp.ne.s32.totalorder (!%p5813_p2), %s5780_s1, 0 }
 0x167   : > { %4581 = dma.done.wait (%p5814_p7), %s792_s10, 128  }
 0x168   : > { %4583 = vsyncadd (%p5814_p7), %s792_s10, 4294967168  ;;  %s3399_s17 = sshll.u32 %s5271_s2, 4  ;;  %s801_s24 = scalar_lea.sflag [#allocation7], %s791_s3 }
 0x169   : > { %s5283_s9 = scalar_lea.vmem [#allocation6], %s3399_s17 }
 0x16a   : > { %4585 = dma.done.wait (%p5814_p7), %s801_s24, 256  }
 0x16b   : > { %4587 = vsyncadd (%p5814_p7), %s801_s24, 4294967040  ;;  %p5815_p11 = scmp.eq.s32.totalorder %s4857_s25, 0 }
 0x16d   : > { %4589 = dma.done.wait (%p5815_p11), [#allocation7], 3072   ;;  %p5816_p3 = pmov %p5815_p11 }
 0x16f   : > { %4591 = vsyncadd (%p5816_p3), [#allocation7], 4294964224  ;;  %p5817_p1 = pmov %p5816_p3 }
 0x171   : > { %4593 = dma.done.wait (%p5817_p1), [#allocation10], 2048   ;;  %p5818_p0 = pmov %p5817_p1 }
 0x173   : > { %4595 = vsyncadd (%p5818_p0), [#allocation10], 4294965248  ;;  %p5819_p13 = pmov %p5818_p0 }
 0x174   : > { %p5820_p9 = pmov %p5818_p0 }
 0x175   : > { %4597 = dma.done.wait (%p5819_p13), [#allocation13], 2048  }
 0x176   : > { %4599 = vsyncadd (%p5820_p9), [#allocation13], 4294965248  ;;  %p5821_p4 = pmov %p5818_p0 }
 0x177   : > { %p5822_p10 = pmov %p5818_p0 }
 0x178   : > { %4601 = dma.done.wait (%p5821_p4), [#allocation16], 1024  }
 0x179   : > { %4603 = vsyncadd (%p5822_p10), [#allocation16], 4294966272  ;;  %s835_s1 = sand.u32 1, %s4622_s28   ;;  %p5823_p5 = scmp.ne.s32.totalorder %s5786_s21, 0 }
 0x17a   : > { %s3406_s7 = sshll.u32 %s835_s1, 7 }
 0x17b   : > { %s5306_s18 = scalar_lea.vmem [#allocation17], %s3406_s7 }
 0x17c   : > { %4605 = dma.done.wait (%p5823_p5), %s792_s10, 2048  }
 0x17d   : > { %4607 = vsyncadd (%p5823_p5), %s792_s10, 4294965248  ;;  %s5312_s26 = scalar_lea.vmem [#allocation18], %s3406_s7 }
 0x17e   : > { %4609 = dma.done.wait (%p5823_p5), %s801_s24, 2048  }
 0x17f   : > { %4611 = vsyncadd (%p5823_p5), %s801_s24, 4294965248  ;;  %s5824_s25 = sld [smem:[#allocation30_spill]]  ;;  %s5825_s16 = sld [smem:[#allocation57_spill]] }
 0x180   : > { %s5327_s20 = scalar_lea.vmem [#allocation19], %s3398_s30 }
 0x185   : > { %s3409_s27 = sshll.u32 %s5824_s25, 1  ;;  %p3410_p6 = scmp.ne.s32.totalorder %s5824_s25, 0 }
 0x186   : > { %p928_p12 = scmp.lt.s32.totalorder %s3409_s27, 3  ;;  %v5331_v0 = vld [vmem:[%s5276_s12] sm:$0xff] (!%p3410_p6)  ;;  %v4060_v2 = vld [vmem:[#allocation8] ss:$12 sps:$4 sm:$0xff] (!%p3410_p6)   ;;  %v4677_v3 = vmov (!%p3410_p6), 0.0   ;;  %v4678_v25 = vmov (!%p3410_p6), 0  }
 0x187   : > { %937 = sbr.rel (%p3410_p6) target bundleno = 4642 (0x1222), region = 152  ;;  %943 = vadd.xlane.f32.xlu0 (!%p3410_p6), %v5331_v0  ;;  %v4058_v1 = vld [vmem:[#allocation8 + $0x4] ss:$12 sps:$4 sm:$0xff] (!%p3410_p6)   ;;  %3649 = vmatprep.subr.bf16.mxu1 (!%p3410_p6), %v4677_v3  ;;  %v4061_v4 = vld [vmem:[#allocation8 + $0x8] ss:$12 sps:$4 sm:$0xff] (!%p3410_p6)   ;;  %vm4679_vm0 = vmmov (!%p3410_p6), 0  }
 0x188   : > { %s5866_s27 = smov (!%p928_p12, %s3409_s27), 3  ;;  %v4062_v5 = vld [vmem:[#allocation8 + $0x1c] ss:$12 sps:$4 sm:$0xff] (!%p3410_p6)   ;;  %v4064_v6 = vld [vmem:[#allocation8 + $0x18] ss:$12 sps:$4 sm:$0xff] (!%p3410_p6)   ;;  %1130 = vmatprep.subr.bf16.mxu0 (!%p3410_p6), %v4058_v1  ;;  %3650 = vmatpush3.bf16.msra.mxu1 (!%p3410_p6), %v4061_v4  ;;  %s5826_s11 = sld [smem:[#allocation42_spill]] (!%p3410_p6) }
 0x189   : > { %s930_s19 = scalar_lea.vmem %s5825_s16, %s5866_s27  ;;  %v4065_v7 = vld [vmem:[#allocation8 + $0x20] ss:$12 sps:$4 sm:$0xff] (!%p3410_p6)   ;;  %1131 = vmatpush1.bf16.msra.mxu0 (!%p3410_p6), %v4060_v2  ;;  %3651 = vmatprep.subr.bf16.mxu1 (!%p3410_p6), %v4677_v3  ;;  %v4068_v13 = vld [vmem:[#allocation8 + $0x30] ss:$12 sps:$4 sm:$0xff] (!%p3410_p6)   ;;  %v4069_v14 = vld [vmem:[#allocation8 + $0x38] ss:$12 sps:$4 sm:$0xff] (!%p3410_p6)  }
 0x18a   : > { %v4066_v8 = vld [vmem:[#allocation8 + $0x34] ss:$12 sps:$4 sm:$0xff] (!%p3410_p6)   ;;  %1132 = vmatprep.subr.bf16.mxu0 (!%p3410_p6), %v4062_v5  ;;  %v4070_v15 = vld [vmem:[#allocation8 + $0x4c] ss:$12 sps:$4 sm:$0xff] (!%p3410_p6)   ;;  %v4073_v17 = vld [vmem:[#allocation8 + $0x50] ss:$12 sps:$4 sm:$0xff] (!%p3410_p6)   ;;  %1162 = vmatprep.mubr.bf16.mxu0 (!%p3410_p6), %v4678_v25 }
 0x18b   : > { %v4072_v16 = vld [vmem:[#allocation8 + $0x48] ss:$12 sps:$4 sm:$0xff] (!%p3410_p6)   ;;  %v4074_v18 = vld [vmem:[#allocation8 + $0x64] ss:$12 sps:$4 sm:$0xff] (!%p3410_p6)   ;;  %v4076_v19 = vld [vmem:[#allocation8 + $0x60] ss:$12 sps:$4 sm:$0xff] (!%p3410_p6)   ;;  %3665 = vmatprep.mubr.msk.bf16.mxu1 (!%p3410_p6), %vm4679_vm0, %v4677_v3 }
 0x18c   : > { %3652 = vmatpush3.bf16.msra.mxu1 (!%p3410_p6), %v4065_v7  ;;  %v4077_v20 = vld [vmem:[#allocation8 + $0x68] ss:$12 sps:$4 sm:$0xff] (!%p3410_p6)   ;;  %v4080_v22 = vld [vmem:[#allocation8 + $0x78] ss:$12 sps:$4 sm:$0xff] (!%p3410_p6)   ;;  %v4081_v23 = vld [vmem:[#allocation8 + $0x80] ss:$12 sps:$4 sm:$0xff] (!%p3410_p6)  }
 0x18d   : > { %1133 = vmatpush1.bf16.msra.mxu0 (!%p3410_p6), %v4064_v6  ;;  %3653 = vmatprep.subr.bf16.mxu1 (!%p3410_p6), %v4677_v3  ;;  %v4078_v21 = vld [vmem:[#allocation8 + $0x7c] ss:$12 sps:$4 sm:$0xff] (!%p3410_p6)   ;;  %v4082_v24 = vld [vmem:[#allocation8 + $0x94] ss:$12 sps:$4 sm:$0xff] (!%p3410_p6)   ;;  %v4085_v27 = vld [vmem:[#allocation8 + $0x98] ss:$12 sps:$4 sm:$0xff] (!%p3410_p6)  }
 0x18e   : > { %1134 = vmatprep.subr.bf16.mxu0 %v4066_v8  ;;  %v4084_v26 = vld [vmem:[#allocation8 + $0x90] ss:$12 sps:$4 sm:$0xff]   ;;  %v4086_v28 = vld [vmem:[#allocation8 + $0xac] ss:$12 sps:$4 sm:$0xff]   ;;  %v4088_v29 = vld [vmem:[#allocation8 + $0xa8] ss:$12 sps:$4 sm:$0xff]  }
 0x18f   : > { %v4089_v30 = vld [vmem:[#allocation8 + $0xb0] ss:$12 sps:$4 sm:$0xff]   ;;  %v3411_v35 = vld [vmem:[%s5826_s11] ss:$0 sm:$0xff]  ;;  %s5827_s10 = sld [smem:[#allocation43_spill]]  ;;  %vm1214_vm1 = vcmask 261120  }
 0x190   : > { %3654 = vmatpush3.bf16.msra.mxu1 %v4069_v14  ;;  %s4680_s12 = smov 96   ;;  %s4681_s17 = smov 32   ;;  %vm1278_vm2 = vcmask 1043456   ;;  %vm1262_vm3 = vcmask 64512   ;;  %vm1671_vm4 = vcmask 523264   ;;  %vm1673_vm5 = vcmask 785408  }
 0x191   : > { %1135 = vmatpush1.bf16.msra.mxu0 %v4068_v13  ;;  %3655 = vmatprep.subr.bf16.mxu1 %v4677_v3  ;;  %s4682_s24 = smov 64   ;;  %s5828_s7 = sld [smem:[#allocation46_spill]]  ;;  %vm2222_vm6 = vcmask 130048  }
 0x192   : > { %1136 = vmatprep.subr.bf16.mxu0 %v4070_v15  ;;  %s5829_s22 = sld [smem:[#allocation49_spill]]  ;;  %s5830_s15 = sld [smem:[#allocation50_spill]] }
 0x193   : > { %s5831_s30 = sld [smem:[#allocation47_spill]]  ;;  %s5832_s1 = sld [smem:[#allocation48_spill]] }
 0x194   : > { %3656 = vmatpush3.bf16.msra.mxu1 %v4073_v17  ;;  %s5834_s23 = sld [smem:[#allocation59_spill]]  ;;  %s5835_s21 = sld [smem:[#allocation54_spill]] }
 0x195   : > { %1137 = vmatpush1.bf16.msra.mxu0 %v4072_v16  ;;  %3657 = vmatprep.subr.bf16.mxu1 %v4677_v3  ;;  %v3412_v37 = vld [vmem:[%s5827_s10] ss:$0 sm:$0xff]  ;;  %s5836_s3 = sld [smem:[#allocation55_spill]] }
 0x196   : > { %1138 = vmatprep.subr.bf16.mxu0 %v4074_v18 }
 0x198   : > { %3658 = vmatpush3.bf16.msra.mxu1 %v4077_v20 }
 0x199   : > { %1139 = vmatpush1.bf16.msra.mxu0 %v4076_v19  ;;  %3659 = vmatprep.subr.bf16.mxu1 %v4677_v3 }
 0x19a   : > { %1140 = vmatprep.subr.bf16.mxu0 %v4078_v21 }
 0x19c   : > { %3660 = vmatpush3.bf16.msra.mxu1 %v4081_v23 }
 0x19d   : > { %1141 = vmatpush1.bf16.msra.mxu0 %v4080_v22  ;;  %3661 = vmatprep.subr.bf16.mxu1 %v4677_v3 }
 0x19e   : > { %1142 = vmatprep.subr.bf16.mxu0 %v4082_v24 }
 0x1a0   : > { %3662 = vmatpush3.bf16.msra.mxu1 %v4085_v27 }
 0x1a1   : > { %1143 = vmatpush1.bf16.msra.mxu0 %v4084_v26  ;;  %3663 = vmatprep.subr.bf16.mxu1 %v4677_v3 }
 0x1a2   : > { %1144 = vmatprep.subr.bf16.mxu0 %v4086_v28 }
 0x1a4   : > { %3664 = vmatpush3.bf16.msra.mxu1 %v4089_v30 }
 0x1a5   : > { %1145 = vmatpush1.bf16.msra.mxu0 %v4088_v29  ;;  %3669 = vmatprep.subr.bf16.mxu1 %v4677_v3 }
 0x1a6   : > { %3693 = vmatprep.subr.bf16.mxu0 %v4677_v3 }
 0x214   : > { %v944_v9 = vpop.xlane.xlu0 %943 }
 0x215   : > { %v946_v10 = vmul.f32 0.0078125, %v944_v9 }
 0x217   : > { %v947_v11 = vsub.f32 %v5331_v0, %v946_v10 }
 0x219   : > { %v948_v12 = vmul.f32 %v947_v11, %v947_v11 }
 0x21b   : > { %949 = vadd.xlane.f32.xlu0 %v948_v12 }
 0x2a8   : > { %v950_v31 = vpop.xlane.xlu0 %949 }
 0x2a9   : > { %v951_v32 = vmul.f32 0.0078125, %v950_v31 }
 0x2ab   : > { %v952_v33 = vadd.f32 1e-05, %v951_v32 }
 0x2ad   : > { %4130 = vrsqrt.f32 %v952_v33 }
 0x2b7   : > { %v4131_v34 = vpop.eup %4130 }
 0x2b8   : > { %v954_v36 = vmul.f32 %v4131_v34, %v947_v11 }
 0x2ba   : > { %v961_v38 = vmul.f32 %v3411_v35, %v954_v36 }
 0x2bc   : > { %v968_v39 = vadd.f32 %v3412_v37, %v961_v38 }
 0x2be   : > { %v969_v40 = vpack.c.bf16 %v968_v39, %v968_v39 }
 0x2c0   : > { %1163 = vmatmul.mubr.bf16.vlgmr.msra.gmra.mrb[0].mxu0 %v969_v40  ;;  %3666 = vmatmul.mubr.bf16.vlgmr.msra.gmra.mrb[0].mxu1 %v969_v40 }
 0x2c1   : > { %3671 = vmatprep.mubr.msk.bf16.mxu1 %vm4679_vm0, %v4677_v3  ;;  %3695 = vmatprep.mubr.msk.bf16.mxu0 %vm4679_vm0, %v4677_v3 }
 0x393   : > { %v1164_v41 = vpop.f32.mrb[0].mxu0  ;;  %v1205_v42 = vpop.f32.mrb[0].mxu1 }
 0x394   : > { %v1166_v43 = vpop.f32.mrb[1].mxu0  ;;  %v3667_v44 = vpop.f32.mrb[1].mxu1  ;;  %v5360_v51 = vpack.c.bf16 %v1205_v42, %v1205_v42  ;;  %v1211_v52 = vpack.c.bf16 %v1164_v41, %v1164_v41 }
 0x395   : > { %v1212_v45 = vpack.c.bf16 %v1166_v43, %v1166_v43  ;;  %v1168_v46 = vpop.f32.mrb[2].mxu0  ;;  %v1208_v47 = vpop.f32.mrb[2].mxu1 }
 0x396   : > { %v1169_v48 = vpop.f32.mrb[3].mxu0  ;;  %v3668_v49 = vpop.f32.mrb[3].mxu1  ;;  %v1280_v53 = vsel %vm1278_vm2, %v5360_v51, 0 }
 0x397   : > { %1326 = vrot.lane.b32.xlu0 %v1212_v45, %s4680_s12  ;;  %v1219_v50 = vsel %vm1214_vm1, %v1212_v45, 0 }
 0x398   : > { %3670 = vmatpush3.bf16.xpose.msra.mxu1 %v1219_v50 }
 0x399   : > { %3675 = vmatprep.subr.bf16.mxu1 %v4677_v3 }
 0x39b   : > { %1549 = vrot.lane.b32.xlu0 %v1212_v45, %s4681_s17 }
 0x39f   : > { %3672 = vmatmul.mubr.msk.bf16.vlgmr.msra.gmra.mrb[4].mxu1 %vm1214_vm1, %v1211_v52 }
 0x3a0   : > { %3676 = vmatpush3.bf16.msra.mxu1 %v1280_v53  ;;  %3677 = vmatprep.mubr.msk.bf16.mxu1 %vm4679_vm0, %v4677_v3 }
 0x3a1   : > { %3681 = vmatprep.subr.bf16.mxu1 %v4677_v3 }
 0x409   : > { %v1327_v5 = vpop.permute.xlu0 %1326 }
 0x40a   : > { %v1332_v12 = vsel %vm1214_vm1, %v1327_v5, 0 }
 0x40d   : > { %v1550_v10 = vpop.permute.xlu0 %1549 }
 0x40e   : > { %v1555_v14 = vsel %vm1214_vm1, %v1550_v10, 0  ;;  %v4091_v10 = vld [vmem:[#allocation9 + $0x8] sm:$0xff]  }
 0x472   : > { %v1255_v54 = vpop.f32.mrb[4].mxu1 }
 0x473   : > { %v1261_v55 = vmul.f32 0.17677669, %v1255_v54  ;;  %v3673_v56 = vpop.f32.mrb[5].mxu1 }
 0x474   : > { %v1258_v57 = vpop.f32.mrb[6].mxu1 }
 0x475   : > { %v3674_v58 = vpop.f32.mrb[7].mxu1  ;;  %v1263_v59 = vsel %vm1262_vm3, %v1261_v55, -inf }
 0x476   : > { %1264 = vmax.xlane.f32.xlu1 %v1263_v59 }
 0x503   : > { %v1265_v60 = vpop.xlane.xlu1 %1264 }
 0x504   : > { %v1266_v61 = vsub.f32 %v1261_v55, %v1265_v60 }
 0x506   : > { %v1267_v62 = vmul.f32 1.442695, %v1266_v61 }
 0x508   : > { %4132 = vpow2.f32 %v1267_v62 }
 0x512   : > { %v4133_v63 = vpop.eup %4132 }
 0x513   : > { %v1269_v1 = vsel %vm1262_vm3, %v4133_v63, 0.0 }
 0x514   : > { %1270 = vadd.xlane.f32.xlu1 %v1269_v1 }
 0x525   : > { %1323 = vrot.lane.b32.xlu1 %v1211_v52, %s4680_s12 }
 0x529   : > { %1438 = vrot.lane.b32.xlu1 %v1212_v45, %s4682_s24 }
 0x52d   : > { %1436 = vrot.lane.b32.xlu1 %v1211_v52, %s4682_s24 }
 0x531   : > { %1547 = vrot.lane.b32.xlu1 %v1211_v52, %s4681_s17 }
 0x5a1   : > { %v1271_v2 = vpop.xlane.xlu1 %1270 }
 0x5a2   : > { %4134 = vrcp.f32 %v1271_v2 }
 0x5a5   : > { %v1324_v4 = vpop.permute.xlu1 %1323 }
 0x5a9   : > { %v1439_v6 = vpop.permute.xlu1 %1438 }
 0x5aa   : > { %v1444_v7 = vsel %vm1214_vm1, %v1439_v6, 0 }
 0x5ab   : > { %3694 = vmatpush3.bf16.xpose.msra.mxu0 %v1444_v7 }
 0x5ac   : > { %v4135_v8 = vpop.eup %4134  ;;  %3705 = vmatprep.subr.bf16.mxu0 %v4677_v3 }
 0x5ad   : > { %v1273_v9 = vmul.f32 %v4135_v8, %v4133_v63  ;;  %v1437_v13 = vpop.permute.xlu1 %1436 }
 0x5af   : > { %v1274_v11 = vpack.c.bf16 %v1273_v9, %v1273_v9  ;;  %v4090_v9 = vld [vmem:[#allocation9] sm:$0xff]  }
 0x5b1   : > { %3678 = vmatmul.mubr.msk.bf16.vlgmr.msra.gmra.mrb[8].mxu1 %vm1262_vm3, %v1274_v11  ;;  %v1548_v15 = vpop.permute.xlu1 %1547  ;;  %v4092_v11 = vld [vmem:[#allocation9 + $0x10] sm:$0xff]  }
 0x5b2   : > { %3682 = vmatpush3.bf16.xpose.msra.mxu1 %v1332_v12  ;;  %3696 = vmatmul.mubr.msk.bf16.vlgmr.msra.gmra.mrb[4].mxu0 %vm1214_vm1, %v1437_v13  ;;  %v4093_v12 = vld [vmem:[#allocation9 + $0x18] sm:$0xff]   ;;  %v4094_v13 = vld [vmem:[#allocation9 + $0x20] sm:$0xff]  }
 0x5b3   : > { %3706 = vmatpush3.bf16.xpose.msra.mxu0 %v1555_v14  ;;  %3683 = vmatprep.mubr.msk.bf16.mxu1 %vm4679_vm0, %v4677_v3  ;;  %v4095_v14 = vld [vmem:[#allocation9 + $0x28] sm:$0xff]  }
 0x5b4   : > { %3707 = vmatprep.mubr.msk.bf16.mxu0 %vm4679_vm0, %v4677_v3  ;;  %3687 = vmatprep.subr.bf16.mxu1 %v4677_v3 }
 0x5b5   : > { %3717 = vmatprep.subr.bf16.mxu0 %v4677_v3 }
 0x5b9   : > { %3684 = vmatmul.mubr.msk.bf16.vlgmr.msra.gmra.mrb[12].mxu1 %vm1214_vm1, %v1324_v4 }
 0x5ba   : > { %3708 = vmatmul.mubr.msk.bf16.vlgmr.msra.gmra.mrb[8].mxu0 %vm1214_vm1, %v1548_v15  ;;  %3689 = vmatprep.mubr.msk.bf16.mxu1 %vm4679_vm0, %v4677_v3  ;;  %v4096_v15 = vld [vmem:[#allocation9 + $0x30] sm:$0xff]  }
 0x5bb   : > { %3733 = vmatprep.mubr.msk.bf16.mxu0 %vm4679_vm0, %v4677_v3  ;;  %3718 = vmatpush3.bf16.msra.mxu0 %v4090_v9 }
 0x5bc   : > { %3719 = vmatprep.subr.bf16.mxu0 %v4677_v3 }
 0x5bf   : > { %3720 = vmatpush3.bf16.msra.mxu0 %v4091_v10 }
 0x5c0   : > { %3721 = vmatprep.subr.bf16.mxu0 %v4677_v3 }
 0x5c3   : > { %3722 = vmatpush3.bf16.msra.mxu0 %v4092_v11 }
 0x5c4   : > { %3723 = vmatprep.subr.bf16.mxu0 %v4677_v3 }
 0x5c7   : > { %3724 = vmatpush3.bf16.msra.mxu0 %v4093_v12 }
 0x5c8   : > { %3725 = vmatprep.subr.bf16.mxu0 %v4677_v3 }
 0x5cb   : > { %3726 = vmatpush3.bf16.msra.mxu0 %v4094_v13  ;;  %v3456_v13 = vld [vmem:[%s5829_s22] ss:$0 sm:$0xff] }
 0x5cc   : > { %3727 = vmatprep.subr.bf16.mxu0 %v4677_v3 }
 0x5cf   : > { %3728 = vmatpush3.bf16.msra.mxu0 %v4095_v14 }
 0x5d0   : > { %3729 = vmatprep.subr.bf16.mxu0 %v4677_v3 }
 0x5d3   : > { %3730 = vmatpush3.bf16.msra.mxu0 %v4096_v15  ;;  %v4109_v15 = vld [vmem:[#allocation11 + $0x18] sm:$0xff]  }
 0x5d4   : > { %3731 = vmatprep.subr.bf16.mxu0 %v4677_v3 }
 0x684   : > { %v5393_v16 = vpop.f32.mrb[8].mxu1 }
 0x685   : > { %v3679_v17 = vpop.f32.mrb[9].mxu1  ;;  %v1480_v18 = vpop.f32.mrb[4].mxu0 }
 0x686   : > { %v1486_v19 = vmul.f32 0.17677669, %v1480_v18  ;;  %v1319_v20 = vpop.f32.mrb[10].mxu1  ;;  %v3697_v21 = vpop.f32.mrb[5].mxu0 }
 0x687   : > { %v3680_v22 = vpop.f32.mrb[11].mxu1  ;;  %v1483_v23 = vpop.f32.mrb[6].mxu0  ;;  %v4097_v21 = vld [vmem:[#allocation9 + $0x38] sm:$0xff]  }
 0x688   : > { %v3698_v24 = vpop.f32.mrb[7].mxu0  ;;  %v1487_v25 = vsel %vm1262_vm3, %v1486_v19, -inf  ;;  %3732 = vmatpush3.bf16.msra.mxu0 %v4097_v21 }
 0x689   : > { %1488 = vmax.xlane.f32.xlu1 %v1487_v25  ;;  %3757 = vmatprep.subr.bf16.mxu0 %v4677_v3 }
 0x68c   : > { %v1368_v26 = vpop.f32.mrb[12].mxu1 }
 0x68d   : > { %v1374_v27 = vmul.f32 0.17677669, %v1368_v26  ;;  %v3685_v28 = vpop.f32.mrb[13].mxu1  ;;  %v1591_v29 = vpop.f32.mrb[8].mxu0 }
 0x68e   : > { %v1371_v30 = vpop.f32.mrb[14].mxu1  ;;  %v3709_v31 = vpop.f32.mrb[9].mxu0  ;;  %v1597_v32 = vmul.f32 0.17677669, %v1591_v29 }
 0x68f   : > { %v3686_v33 = vpop.f32.mrb[15].mxu1  ;;  %v1594_v34 = vpop.f32.mrb[10].mxu0  ;;  %v1375_v35 = vsel %vm1262_vm3, %v1374_v27, -inf  ;;  %v939_v30 = vld [vmem:[%s5283_s9] sm:$0xff]  ;;  %v940_v31 = vld [vmem:[%s5283_s9 + $0x8] sm:$0xff] }
 0x690   : > { %1376 = vmax.xlane.f32.xlu0 %v1375_v35  ;;  %v3710_v36 = vpop.f32.mrb[11].mxu0  ;;  %v1598_v37 = vsel %vm1262_vm3, %v1597_v32, -inf }
 0x694   : > { %1599 = vmax.xlane.f32.xlu0 %v1598_v37 }
 0x716   : > { %v1489_v38 = vpop.xlane.xlu1 %1488 }
 0x717   : > { %v1490_v39 = vsub.f32 %v1486_v19, %v1489_v38 }
 0x719   : > { %v1491_v40 = vmul.f32 1.442695, %v1490_v39 }
 0x71b   : > { %4136 = vpow2.f32 %v1491_v40 }
 0x71d   : > { %v1377_v41 = vpop.xlane.xlu0 %1376 }
 0x71e   : > { %v1378_v42 = vsub.f32 %v1374_v27, %v1377_v41 }
 0x720   : > { %v1379_v43 = vmul.f32 1.442695, %v1378_v42 }
 0x721   : > { %v1600_v44 = vpop.xlane.xlu0 %1599 }
 0x722   : > { %4138 = vpow2.f32 %v1379_v43  ;;  %v1601_v45 = vsub.f32 %v1597_v32, %v1600_v44  ;;  %v3453_v43 = vld [vmem:[%s5828_s7] ss:$0 sm:$0xff]  ;;  %s5833_s7 = sld [smem:[#allocation53_spill]] }
 0x724   : > { %v1602_v46 = vmul.f32 1.442695, %v1601_v45 }
 0x725   : > { %v4137_v47 = vpop.eup %4136 }
 0x726   : > { %4140 = vpow2.f32 %v1602_v46  ;;  %v1493_v48 = vsel %vm1262_vm3, %v4137_v47, 0.0 }
 0x727   : > { %1494 = vadd.xlane.f32.xlu0 %v1493_v48 }
 0x72c   : > { %v4139_v49 = vpop.eup %4138 }
 0x72d   : > { %v1381_v50 = vsel %vm1262_vm3, %v4139_v49, 0.0 }
 0x72e   : > { %1382 = vadd.xlane.f32.xlu0 %v1381_v50 }
 0x730   : > { %v4141_v52 = vpop.eup %4140 }
 0x731   : > { %v1604_v53 = vsel %vm1262_vm3, %v4141_v52, 0.0 }
 0x732   : > { %1605 = vadd.xlane.f32.xlu1 %v1604_v53 }
 0x743   : > { %1499 = vrot.lane.b32.xlu1 %v5360_v51, %s4682_s24 }
 0x744   : > { %1388 = vrot.lane.b32.xlu0 %v5360_v51, %s4680_s12 }
 0x747   : > { %1610 = vrot.lane.b32.xlu1 %v5360_v51, %s4681_s17 }
 0x7b4   : > { %v1495_v54 = vpop.xlane.xlu0 %1494 }
 0x7bb   : > { %v1383_v55 = vpop.xlane.xlu0 %1382 }
 0x7bc   : > { %4142 = vrcp.f32 %v1383_v55  ;;  %v4099_v55 = vld [vmem:[#allocation12 + $0x8] sm:$0xff]  }
 0x7bd   : > { %4144 = vrcp.f32 %v1495_v54  ;;  %v4098_v54 = vld [vmem:[#allocation12] sm:$0xff]  }
 0x7bf   : > { %v1389_v56 = vpop.permute.xlu0 %1388  ;;  %v1606_v58 = vpop.xlane.xlu1 %1605 }
 0x7c0   : > { %v1394_v57 = vsel %vm1278_vm2, %v1389_v56, 0  ;;  %4146 = vrcp.f32 %v1606_v58  ;;  %v4101_v56 = vld [vmem:[#allocation12 + $0x18] sm:$0xff]   ;;  %v4103_v58 = vld [vmem:[#allocation12 + $0x28] sm:$0xff]  }
 0x7c1   : > { %3688 = vmatpush3.bf16.msra.mxu1 %v1394_v57  ;;  %v4102_v57 = vld [vmem:[#allocation12 + $0x20] sm:$0xff]  }
 0x7c2   : > { %3699 = vmatprep.subr.bf16.mxu1 %v4677_v3 }
 0x7c3   : > { %v1500_v61 = vpop.permute.xlu1 %1499 }
 0x7c4   : > { %v1505_v1 = vsel %vm1278_vm2, %v1500_v61, 0  ;;  %v4106_v61 = vld [vmem:[#allocation11] sm:$0xff]  }
 0x7c6   : > { %v4143_v59 = vpop.eup %4142 }
 0x7c7   : > { %v1385_v60 = vmul.f32 %v4143_v59, %v4139_v49  ;;  %v4145_v63 = vpop.eup %4144  ;;  %v1611_v2 = vpop.permute.xlu1 %1610  ;;  %v4104_v59 = vld [vmem:[#allocation12 + $0x30] sm:$0xff]  }
 0x7c8   : > { %v1497_v51 = vmul.f32 %v4145_v63, %v4137_v47  ;;  %v1616_v6 = vsel %vm1278_vm2, %v1611_v2, 0  ;;  %v4108_v63 = vld [vmem:[#allocation11 + $0x10] sm:$0xff]  }
 0x7c9   : > { %v1386_v62 = vpack.c.bf16 %v1385_v60, %v1385_v60  ;;  %v4105_v60 = vld [vmem:[#allocation12 + $0x38] sm:$0xff]  }
 0x7ca   : > { %v1498_v4 = vpack.c.bf16 %v1497_v51, %v1497_v51  ;;  %v4147_v5 = vpop.eup %4146 }
 0x7cb   : > { %3690 = vmatmul.mubr.msk.bf16.vlgmr.msra.gmra.mrb[16].mxu1 %vm1262_vm3, %v1386_v62  ;;  %v1608_v7 = vmul.f32 %v4147_v5, %v4141_v52  ;;  %v4107_v62 = vld [vmem:[#allocation11 + $0x8] sm:$0xff]  }
 0x7cc   : > { %3700 = vmatpush3.bf16.msra.mxu1 %v1505_v1  ;;  %3701 = vmatprep.mubr.msk.bf16.mxu1 %vm4679_vm0, %v4677_v3 }
 0x7cd   : > { %3711 = vmatprep.subr.bf16.mxu1 %v4677_v3  ;;  %v1609_v8 = vpack.c.bf16 %v1608_v7, %v1608_v7 }
 0x7d3   : > { %3702 = vmatmul.mubr.msk.bf16.vlgmr.msra.gmra.mrb[20].mxu1 %vm1262_vm3, %v1498_v4 }
 0x7d4   : > { %3712 = vmatpush3.bf16.msra.mxu1 %v1616_v6  ;;  %3713 = vmatprep.mubr.msk.bf16.mxu1 %vm4679_vm0, %v4677_v3 }
 0x7d5   : > { %3737 = vmatprep.subr.bf16.mxu1 %v4677_v3 }
 0x7db   : > { %3714 = vmatmul.mubr.msk.bf16.vlgmr.msra.gmra.mrb[24].mxu1 %vm1262_vm3, %v1609_v8 }
 0x7dc   : > { %3753 = vmatprep.mubr.msk.bf16.mxu1 %vm4679_vm0, %v4677_v3  ;;  %3738 = vmatpush3.bf16.msra.mxu1 %v4106_v61 }
 0x7dd   : > { %3739 = vmatprep.subr.bf16.mxu1 %v4677_v3 }
 0x7e0   : > { %3740 = vmatpush3.bf16.msra.mxu1 %v4107_v62 }
 0x7e1   : > { %3741 = vmatprep.subr.bf16.mxu1 %v4677_v3 }
 0x7e4   : > { %3742 = vmatpush3.bf16.msra.mxu1 %v4108_v63 }
 0x7e5   : > { %3743 = vmatprep.subr.bf16.mxu1 %v4677_v3 }
 0x7e8   : > { %3744 = vmatpush3.bf16.msra.mxu1 %v4109_v15 }
 0x7e9   : > { %3745 = vmatprep.subr.bf16.mxu1 %v4677_v3 }
 0x89e   : > { %v1430_v17 = vpop.f32.mrb[16].mxu1 }
 0x89f   : > { %1659 = vrot.lane.b32.xlu1 %v1430_v17, %s4681_s17  ;;  %v3691_v18 = vpop.f32.mrb[17].mxu1 }
 0x8a0   : > { %v1433_v19 = vpop.f32.mrb[18].mxu1 }
 0x8a1   : > { %v3692_v20 = vpop.f32.mrb[19].mxu1  ;;  %v3457_v19 = vld [vmem:[%s5830_s15] ss:$0 sm:$0xff] }
 0x8a2   : > { %v4110_v20 = vld [vmem:[#allocation11 + $0x20] sm:$0xff]  }
 0x8a3   : > { %3746 = vmatpush3.bf16.msra.mxu1 %v4110_v20 }
 0x8a4   : > { %3747 = vmatprep.subr.bf16.mxu1 %v4677_v3 }
 0x8a6   : > { %v1541_v22 = vpop.f32.mrb[20].mxu1 }
 0x8a7   : > { %1663 = vrot.lane.b32.xlu0 %v1541_v22, %s4682_s24  ;;  %v3703_v23 = vpop.f32.mrb[21].mxu1 }
 0x8a8   : > { %v1544_v24 = vpop.f32.mrb[22].mxu1 }
 0x8a9   : > { %v3704_v25 = vpop.f32.mrb[23].mxu1  ;;  %v4111_v24 = vld [vmem:[#allocation11 + $0x28] sm:$0xff]  }
 0x8aa   : > { %3748 = vmatpush3.bf16.msra.mxu1 %v4111_v24 }
 0x8ab   : > { %3749 = vmatprep.subr.bf16.mxu1 %v4677_v3 }
 0x8ae   : > { %v1652_v26 = vpop.f32.mrb[24].mxu1 }
 0x8af   : > { %1667 = vrot.lane.b32.xlu1 %v1652_v26, %s4680_s12  ;;  %v3715_v27 = vpop.f32.mrb[25].mxu1  ;;  %v4112_v26 = vld [vmem:[#allocation11 + $0x30] sm:$0xff]  }
 0x8b0   : > { %v1655_v28 = vpop.f32.mrb[26].mxu1  ;;  %3750 = vmatpush3.bf16.msra.mxu1 %v4112_v26  ;;  %v4113_v27 = vld [vmem:[#allocation11 + $0x38] sm:$0xff]  }
 0x8b1   : > { %v3716_v29 = vpop.f32.mrb[27].mxu1  ;;  %3751 = vmatprep.subr.bf16.mxu1 %v4677_v3 }
 0x8b4   : > { %3752 = vmatpush3.bf16.msra.mxu1 %v4113_v27 }
 0x8b5   : > { %3777 = vmatprep.subr.bf16.mxu1 %v4677_v3 }
 0x8c6   : > { %1819 = vadd.xlane.f32.xlu0 %v939_v30 }
 0x8d3   : > { %1821 = vadd.xlane.f32.xlu1 %v940_v31 }
 0x911   : > { %v1660_v32 = vpop.permute.xlu1 %1659 }
 0x912   : > { %v1670_v34 = vsel %vm1214_vm1, %v5393_v16, %v1660_v32  ;;  %v3454_v32 = vld [vmem:[%s5831_s30] ss:$0 sm:$0xff] }
 0x919   : > { %v1664_v33 = vpop.permute.xlu0 %1663 }
 0x91a   : > { %v1672_v35 = vsel %vm1671_vm4, %v1670_v34, %v1664_v33  ;;  %v3455_v34 = vld [vmem:[%s5832_s1] ss:$0 sm:$0xff] }
 0x921   : > { %v1668_v36 = vpop.permute.xlu1 %1667 }
 0x922   : > { %v1674_v37 = vsel %vm1673_vm5, %v1672_v35, %v1668_v36 }
 0x923   : > { %v1675_v38 = vpack.c.bf16 %v1674_v37, %v1674_v37  ;;  %v4114_v37 = vld [vmem:[#allocation14] sm:$0xff]  }
 0x925   : > { %3734 = vmatmul.mubr.bf16.vlgmr.msra.gmra.mrb[12].mxu0 %v1675_v38 }
 0x926   : > { %3773 = vmatprep.mubr.msk.bf16.mxu0 %vm4679_vm0, %v4677_v3  ;;  %3758 = vmatpush3.bf16.msra.mxu0 %v4098_v54 }
 0x927   : > { %3759 = vmatprep.subr.bf16.mxu0 %v4677_v3 }
 0x92a   : > { %3760 = vmatpush3.bf16.msra.mxu0 %v4099_v55 }
 0x92b   : > { %3761 = vmatprep.subr.bf16.mxu0 %v4677_v3 }
 0x953   : > { %v1820_v39 = vpop.xlane.xlu0 %1819 }
 0x954   : > { %v1823_v40 = vmul.f32 0.0078125, %v1820_v39  ;;  %v4115_v39 = vld [vmem:[#allocation14 + $0x8] sm:$0xff]  }
 0x956   : > { %v1825_v45 = vsub.f32 %v939_v30, %v1823_v40  ;;  %v4116_v40 = vld [vmem:[#allocation14 + $0x10] sm:$0xff]  }
 0x958   : > { %v1827_v52 = vmul.f32 %v1825_v45, %v1825_v45 }
 0x960   : > { %v1822_v41 = vpop.xlane.xlu1 %1821 }
 0x961   : > { %v1824_v46 = vmul.f32 0.0078125, %v1822_v41  ;;  %v4117_v41 = vld [vmem:[#allocation14 + $0x18] sm:$0xff]  }
 0x963   : > { %v1826_v50 = vsub.f32 %v940_v31, %v1824_v46 }
 0x965   : > { %v1828_v53 = vmul.f32 %v1826_v50, %v1826_v50 }
 0x9f8   : > { %v1774_v42 = vpop.f32.mrb[12].mxu0 }
 0x9f9   : > { %v1780_v16 = vadd.f32 %v1774_v42, %v5331_v0  ;;  %v3735_v44 = vpop.f32.mrb[13].mxu0  ;;  %v4100_v0 = vld [vmem:[#allocation12 + $0x10] sm:$0xff]   ;;  %v4118_v42 = vld [vmem:[#allocation14 + $0x20] sm:$0xff]  }
 0x9fa   : > { %v1777_v47 = vpop.f32.mrb[14].mxu0  ;;  %3762 = vmatpush3.bf16.msra.mxu0 %v4100_v0  ;;  %v4121_v44 = vld [vmem:[#allocation14 + $0x38] sm:$0xff]  }
 0x9fb   : > { %v5445_v48 = vadd.f32 %v3453_v43, %v1780_v16  ;;  %v3736_v49 = vpop.f32.mrb[15].mxu0  ;;  %3763 = vmatprep.subr.bf16.mxu0 %v4677_v3  ;;  %v4119_v43 = vld [vmem:[#allocation14 + $0x28] sm:$0xff]   ;;  %v4120_v16 = vld [vmem:[#allocation14 + $0x30] sm:$0xff]  }
 0x9fd   : > { %1791 = vadd.xlane.f32.xlu0 %v5445_v48 }
 0x9fe   : > { %3764 = vmatpush3.bf16.msra.mxu0 %v4101_v56 }
 0x9ff   : > { %3765 = vmatprep.subr.bf16.mxu0 %v4677_v3 }
 0xa01   : > { %1829 = vadd.xlane.f32.xlu0 %v1827_v52 }
 0xa02   : > { %3766 = vmatpush3.bf16.msra.mxu0 %v4102_v57 }
 0xa03   : > { %3767 = vmatprep.subr.bf16.mxu0 %v4677_v3 }
 0xa05   : > { %1831 = vadd.xlane.f32.xlu0 %v1828_v53 }
 0xa06   : > { %3768 = vmatpush3.bf16.msra.mxu0 %v4103_v58 }
 0xa07   : > { %3769 = vmatprep.subr.bf16.mxu0 %v4677_v3 }
 0xa0a   : > { %3770 = vmatpush3.bf16.msra.mxu0 %v4104_v59 }
 0xa0b   : > { %3771 = vmatprep.subr.bf16.mxu0 %v4677_v3 }
 0xa0e   : > { %3772 = vmatpush3.bf16.msra.mxu0 %v4105_v60 }
 0xa0f   : > { %3797 = vmatprep.subr.bf16.mxu0 %v4677_v3 }
 0xa8a   : > { %v1792_v1 = vpop.xlane.xlu0 %1791 }
 0xa8b   : > { %v1793_v51 = vmul.f32 0.0078125, %v1792_v1 }
 0xa8d   : > { %v1794_v2 = vsub.f32 %v5445_v48, %v1793_v51 }
 0xa8e   : > { %v1830_v4 = vpop.xlane.xlu0 %1829 }
 0xa8f   : > { %v1833_v5 = vmul.f32 0.0078125, %v1830_v4  ;;  %v1795_v6 = vmul.f32 %v1794_v2, %v1794_v2 }
 0xa91   : > { %v1835_v7 = vadd.f32 1e-05, %v1833_v5  ;;  %1796 = vadd.xlane.f32.xlu1 %v1795_v6 }
 0xa92   : > { %v1832_v8 = vpop.xlane.xlu0 %1831 }
 0xa93   : > { %4148 = vrsqrt.f32 %v1835_v7  ;;  %v1834_v9 = vmul.f32 0.0078125, %v1832_v8 }
 0xa95   : > { %v1836_v10 = vadd.f32 1e-05, %v1834_v9 }
 0xa97   : > { %4150 = vrsqrt.f32 %v1836_v10 }
 0xa9d   : > { %v4149_v11 = vpop.eup %4148 }
 0xa9e   : > { %v1839_v12 = vmul.f32 %v4149_v11, %v1825_v45 }
 0xaa0   : > { %v1847_v18 = vmul.f32 %v3456_v13, %v1839_v12 }
 0xaa1   : > { %v4151_v14 = vpop.eup %4150 }
 0xaa2   : > { %v1840_v17 = vmul.f32 %v4151_v14, %v1826_v50  ;;  %v1855_v22 = vadd.f32 %v3457_v19, %v1847_v18 }
 0xaa4   : > { %v1848_v21 = vmul.f32 %v3456_v13, %v1840_v17 }
 0xaa6   : > { %v1856_v23 = vadd.f32 %v3457_v19, %v1848_v21 }
 0xaa8   : > { %v1857_v25 = vpack.c.bf16 %v1856_v23, %v1855_v22 }
 0xaaa   : > { %3774 = vmatmul.mubr.bf16.vlgmr.msra.gmra.mrb[16].mxu0 %v1857_v25 }
 0xaab   : > { %3799 = vmatprep.mubr.msk.bf16.mxu0 %vm4679_vm0, %v4677_v3 }
 0xb1e   : > { %v1797_v28 = vpop.xlane.xlu1 %1796 }
 0xb1f   : > { %v1798_v29 = vmul.f32 0.0078125, %v1797_v28 }
 0xb21   : > { %v1799_v30 = vadd.f32 1e-05, %v1798_v29 }
 0xb23   : > { %4152 = vrsqrt.f32 %v1799_v30 }
 0xb2d   : > { %v4153_v31 = vpop.eup %4152 }
 0xb2e   : > { %v1801_v33 = vmul.f32 %v4153_v31, %v1794_v2 }
 0xb30   : > { %v1808_v35 = vmul.f32 %v3454_v32, %v1801_v33 }
 0xb32   : > { %v1815_v36 = vadd.f32 %v3455_v34, %v1808_v35 }
 0xb34   : > { %v1816_v38 = vpack.c.bf16 %v1815_v36, %v1815_v36 }
 0xb36   : > { %3754 = vmatmul.mubr.bf16.vlgmr.msra.gmra.mrb[28].mxu1 %v1816_v38 }
 0xb37   : > { %3778 = vmatpush3.bf16.msra.mxu1 %v4114_v37  ;;  %3793 = vmatprep.mubr.msk.bf16.mxu1 %vm4679_vm0, %v4677_v3 }
 0xb38   : > { %3779 = vmatprep.subr.bf16.mxu1 %v4677_v3 }
 0xb3b   : > { %3780 = vmatpush3.bf16.msra.mxu1 %v4115_v39 }
 0xb3c   : > { %3781 = vmatprep.subr.bf16.mxu1 %v4677_v3 }
 0xb3f   : > { %3782 = vmatpush3.bf16.msra.mxu1 %v4116_v40 }
 0xb40   : > { %3783 = vmatprep.subr.bf16.mxu1 %v4677_v3 }
 0xb43   : > { %3784 = vmatpush3.bf16.msra.mxu1 %v4117_v41 }
 0xb44   : > { %3785 = vmatprep.subr.bf16.mxu1 %v4677_v3 }
 0xb47   : > { %3786 = vmatpush3.bf16.msra.mxu1 %v4118_v42 }
 0xb48   : > { %3787 = vmatprep.subr.bf16.mxu1 %v4677_v3 }
 0xb4b   : > { %3788 = vmatpush3.bf16.msra.mxu1 %v4119_v43 }
 0xb4c   : > { %3789 = vmatprep.subr.bf16.mxu1 %v4677_v3 }
 0xb4f   : > { %3790 = vmatpush3.bf16.msra.mxu1 %v4120_v16 }
 0xb50   : > { %3791 = vmatprep.subr.bf16.mxu1 %v4677_v3 }
 0xb53   : > { %3792 = vmatpush3.bf16.msra.mxu1 %v4121_v44 }
 0xb54   : > { %3803 = vmatprep.subr.bf16.mxu1 %v4677_v3 }
 0xb56   : > { %3794 = vmatmul.mubr.bf16.vlgmr.msra.gmra.mrb[32].mxu1 %v1857_v25 }
 0xb57   : > { %3805 = vmatprep.mubr.msk.bf16.mxu1 %vm4679_vm0, %v4677_v3 }
 0xb7d   : > { %v2060_v45 = vpop.f32.mrb[16].mxu0 }
 0xb7e   : > { %v3775_v46 = vpop.f32.mrb[17].mxu0 }
 0xb7f   : > { %v2063_v47 = vpop.f32.mrb[18].mxu0 }
 0xb80   : > { %v2173_v49 = vpack.c.bf16 %v2063_v47, %v2060_v45  ;;  %v3776_v50 = vpop.f32.mrb[19].mxu0 }
 0xb82   : > { %2282 = vrot.lane.b32.xlu0 %v2173_v49, %s4680_s12  ;;  %v2179_v52 = vsel %vm1214_vm1, %v2173_v49, 0 }
 0xb83   : > { %3798 = vmatpush3.bf16.xpose.msra.mxu0 %v2179_v52 }
 0xb84   : > { %3809 = vmatprep.subr.bf16.mxu0 %v4677_v3 }
 0xb86   : > { %2501 = vrot.lane.b32.xlu0 %v2173_v49, %s4681_s17 }
 0xbf4   : > { %v2283_v53 = vpop.permute.xlu0 %2282 }
 0xbf5   : > { %v2288_v57 = vsel %vm1214_vm1, %v2283_v53, 0 }
 0xbf8   : > { %v2502_v4 = vpop.permute.xlu0 %2501 }
 0xbf9   : > { %v2507_v6 = vsel %vm1214_vm1, %v2502_v4, 0 }
 0xc09   : > { %v1956_v54 = vpop.f32.mrb[28].mxu1 }
 0xc0a   : > { %v2172_v55 = vpack.c.bf16 %v1956_v54, %v1956_v54  ;;  %v3755_v0 = vpop.f32.mrb[29].mxu1 }
 0xc0b   : > { %v1959_v56 = vpop.f32.mrb[30].mxu1 }
 0xc0c   : > { %2279 = vrot.lane.b32.xlu1 %v2172_v55, %s4680_s12  ;;  %v3756_v58 = vpop.f32.mrb[31].mxu1  ;;  %3800 = vmatmul.mubr.msk.bf16.vlgmr.msra.gmra.mrb[20].mxu0 %vm1214_vm1, %v2172_v55 }
 0xc0d   : > { %3810 = vmatpush3.bf16.xpose.msra.mxu0 %v2288_v57  ;;  %3811 = vmatprep.mubr.msk.bf16.mxu0 %vm4679_vm0, %v4677_v3 }
 0xc0e   : > { %3821 = vmatprep.subr.bf16.mxu0 %v4677_v3 }
 0xc10   : > { %2392 = vrot.lane.b32.xlu1 %v2173_v49, %s4682_s24 }
 0xc14   : > { %2390 = vrot.lane.b32.xlu1 %v2172_v55, %s4682_s24 }
 0xc18   : > { %2499 = vrot.lane.b32.xlu1 %v2172_v55, %s4681_s17 }
 0xc29   : > { %v2165_v59 = vpop.f32.mrb[32].mxu1 }
 0xc2a   : > { %v3795_v60 = vpop.f32.mrb[33].mxu1 }
 0xc2b   : > { %v2168_v61 = vpop.f32.mrb[34].mxu1 }
 0xc2c   : > { %v5504_v62 = vpack.c.bf16 %v2168_v61, %v2165_v59  ;;  %v3796_v63 = vpop.f32.mrb[35].mxu1 }
 0xc2e   : > { %3804 = vmatpush3.bf16.msra.mxu1 %v5504_v62 }
 0xc2f   : > { %3815 = vmatprep.subr.bf16.mxu1 %v4677_v3 }
 0xc7e   : > { %v2280_v1 = vpop.permute.xlu1 %2279 }
 0xc7f   : > { %3812 = vmatmul.mubr.msk.bf16.vlgmr.msra.gmra.mrb[24].mxu0 %vm1214_vm1, %v2280_v1 }
 0xc80   : > { %3823 = vmatprep.mubr.msk.bf16.mxu0 %vm4679_vm0, %v4677_v3 }
 0xc82   : > { %v2393_v51 = vpop.permute.xlu1 %2392 }
 0xc83   : > { %v2398_v2 = vsel %vm1214_vm1, %v2393_v51, 0 }
 0xc84   : > { %3822 = vmatpush3.bf16.xpose.msra.mxu0 %v2398_v2 }
 0xc85   : > { %3833 = vmatprep.subr.bf16.mxu0 %v4677_v3 }
 0xc86   : > { %v2391_v5 = vpop.permute.xlu1 %2390 }
 0xc8a   : > { %v2500_v7 = vpop.permute.xlu1 %2499 }
 0xc8b   : > { %3824 = vmatmul.mubr.msk.bf16.vlgmr.msra.gmra.mrb[28].mxu0 %vm1214_vm1, %v2391_v5 }
 0xc8c   : > { %3834 = vmatpush3.bf16.xpose.msra.mxu0 %v2507_v6  ;;  %3835 = vmatprep.mubr.msk.bf16.mxu0 %vm4679_vm0, %v4677_v3 }
 0xc8d   : > { %3845 = vmatprep.subr.bf16.mxu0 %v4677_v3 }
 0xc93   : > { %3836 = vmatmul.mubr.msk.bf16.vlgmr.msra.gmra.mrb[32].mxu0 %vm1214_vm1, %v2500_v7 }
 0xc94   : > { %3861 = vmatprep.mubr.msk.bf16.mxu0 %vm4679_vm0, %v4677_v3 }
 0xcdf   : > { %v2215_v8 = vpop.f32.mrb[20].mxu0 }
 0xce0   : > { %v2221_v9 = vmul.f32 0.17677669, %v2215_v8  ;;  %v3801_v10 = vpop.f32.mrb[21].mxu0 }
 0xce1   : > { %v2218_v11 = vpop.f32.mrb[22].mxu0 }
 0xce2   : > { %v3802_v12 = vpop.f32.mrb[23].mxu0  ;;  %v2223_v13 = vsel %vm2222_vm6, %v2221_v9, -inf }
 0xce3   : > { %2224 = vmax.xlane.f32.xlu0 %v2223_v13  ;;  %v4122_v13 = vld [vmem:[#allocation15] sm:$0xff]  }
 0xce4   : > { %3846 = vmatpush3.bf16.msra.mxu0 %v4122_v13 }
 0xce5   : > { %3847 = vmatprep.subr.bf16.mxu0 %v4677_v3 }
 0xd52   : > { %v2324_v14 = vpop.f32.mrb[24].mxu0 }
 0xd53   : > { %v2330_v15 = vmul.f32 0.17677669, %v2324_v14  ;;  %v3813_v17 = vpop.f32.mrb[25].mxu0  ;;  %v4123_v14 = vld [vmem:[#allocation15 + $0x8] sm:$0xff]  }
 0xd54   : > { %v2327_v18 = vpop.f32.mrb[26].mxu0  ;;  %3848 = vmatpush3.bf16.msra.mxu0 %v4123_v14 }
 0xd55   : > { %v3814_v19 = vpop.f32.mrb[27].mxu0  ;;  %v2331_v20 = vsel %vm2222_vm6, %v2330_v15, -inf  ;;  %3849 = vmatprep.subr.bf16.mxu0 %v4677_v3 }
 0xd56   : > { %2332 = vmax.xlane.f32.xlu1 %v2331_v20  ;;  %v4124_v19 = vld [vmem:[#allocation15 + $0x10] sm:$0xff]  }
 0xd58   : > { %3850 = vmatpush3.bf16.msra.mxu0 %v4124_v19 }
 0xd59   : > { %3851 = vmatprep.subr.bf16.mxu0 %v4677_v3 }
 0xd5e   : > { %v2434_v21 = vpop.f32.mrb[28].mxu0 }
 0xd5f   : > { %v2440_v22 = vmul.f32 0.17677669, %v2434_v21  ;;  %v3825_v23 = vpop.f32.mrb[29].mxu0  ;;  %v4125_v21 = vld [vmem:[#allocation15 + $0x18] sm:$0xff]  }
 0xd60   : > { %v2437_v24 = vpop.f32.mrb[30].mxu0  ;;  %3852 = vmatpush3.bf16.msra.mxu0 %v4125_v21 }
 0xd61   : > { %v3826_v25 = vpop.f32.mrb[31].mxu0  ;;  %v2441_v26 = vsel %vm2222_vm6, %v2440_v22, -inf  ;;  %3853 = vmatprep.subr.bf16.mxu0 %v4677_v3 }
 0xd62   : > { %2442 = vmax.xlane.f32.xlu0 %v2441_v26  ;;  %v4126_v25 = vld [vmem:[#allocation15 + $0x20] sm:$0xff]  }
 0xd64   : > { %3854 = vmatpush3.bf16.msra.mxu0 %v4126_v25 }
 0xd65   : > { %3855 = vmatprep.subr.bf16.mxu0 %v4677_v3 }
 0xd66   : > { %v2543_v27 = vpop.f32.mrb[32].mxu0 }
 0xd67   : > { %v2549_v28 = vmul.f32 0.17677669, %v2543_v27  ;;  %v3837_v29 = vpop.f32.mrb[33].mxu0  ;;  %v4127_v27 = vld [vmem:[#allocation15 + $0x28] sm:$0xff]  }
 0xd68   : > { %v2546_v30 = vpop.f32.mrb[34].mxu0  ;;  %3856 = vmatpush3.bf16.msra.mxu0 %v4127_v27  ;;  %v4129_v29 = vld [vmem:[#allocation15 + $0x38] sm:$0xff]  }
 0xd69   : > { %v3838_v31 = vpop.f32.mrb[35].mxu0  ;;  %v2550_v32 = vsel %vm2222_vm6, %v2549_v28, -inf  ;;  %3857 = vmatprep.subr.bf16.mxu0 %v4677_v3 }
 0xd6a   : > { %2551 = vmax.xlane.f32.xlu0 %v2550_v32 }
 0xd70   : > { %v2225_v33 = vpop.xlane.xlu0 %2224 }
 0xd71   : > { %v2226_v34 = vsub.f32 %v2221_v9, %v2225_v33 }
 0xd73   : > { %v2227_v35 = vmul.f32 1.442695, %v2226_v34 }
 0xd75   : > { %4154 = vpow2.f32 %v2227_v35 }
 0xd7f   : > { %v4155_v36 = vpop.eup %4154 }
 0xd80   : > { %v2229_v37 = vsel %vm2222_vm6, %v4155_v36, 0.0 }
 0xd81   : > { %2230 = vadd.xlane.f32.xlu0 %v2229_v37 }
 0xde3   : > { %v2333_v38 = vpop.xlane.xlu1 %2332 }
 0xde4   : > { %v2334_v39 = vsub.f32 %v2330_v15, %v2333_v38 }
 0xde6   : > { %v2335_v40 = vmul.f32 1.442695, %v2334_v39 }
 0xde8   : > { %4156 = vpow2.f32 %v2335_v40 }
 0xdef   : > { %v2443_v41 = vpop.xlane.xlu0 %2442 }
 0xdf0   : > { %v2444_v42 = vsub.f32 %v2440_v22, %v2443_v41  ;;  %v3498_v41 = vld [vmem:[%s5833_s7] ss:$0 sm:$0xff] }
 0xdf2   : > { %v4157_v43 = vpop.eup %4156  ;;  %v2445_v16 = vmul.f32 1.442695, %v2444_v42 }
 0xdf3   : > { %v2337_v44 = vsel %vm2222_vm6, %v4157_v43, 0.0 }
 0xdf4   : > { %4158 = vpow2.f32 %v2445_v16  ;;  %2338 = vadd.xlane.f32.xlu1 %v2337_v44  ;;  %v3501_v16 = vld [vmem:[%s5834_s23] ss:$0 sm:$0xff] }
 0xdf7   : > { %v2552_v47 = vpop.xlane.xlu0 %2551 }
 0xdf8   : > { %v2553_v50 = vsub.f32 %v2549_v28, %v2552_v47  ;;  %v4128_v28 = vld [vmem:[#allocation15 + $0x30] sm:$0xff]  }
 0xdf9   : > { %3858 = vmatpush3.bf16.msra.mxu0 %v4128_v28 }
 0xdfa   : > { %v2554_v52 = vmul.f32 1.442695, %v2553_v50  ;;  %3859 = vmatprep.subr.bf16.mxu0 %v4677_v3 }
 0xdfd   : > { %3860 = vmatpush3.bf16.msra.mxu0 %v4129_v29 }
 0xdfe   : > { %v4159_v45 = vpop.eup %4158 }
 0xdff   : > { %v2447_v46 = vsel %vm2222_vm6, %v4159_v45, 0.0 }
 0xe00   : > { %2448 = vadd.xlane.f32.xlu0 %v2447_v46 }
 0xe05   : > { %2453 = vrot.lane.b32.xlu1 %v5504_v62, %s4682_s24 }
 0xe0e   : > { %v2231_v49 = vpop.xlane.xlu0 %2230 }
 0xe0f   : > { %4160 = vrcp.f32 %v2231_v49 }
 0xe10   : > { %4162 = vpow2.f32 %v2554_v52 }
 0xe16   : > { %2344 = vrot.lane.b32.xlu0 %v5504_v62, %s4680_s12 }
 0xe19   : > { %v4161_v53 = vpop.eup %4160 }
 0xe1a   : > { %v2233_v54 = vmul.f32 %v4161_v53, %v4155_v36  ;;  %v4163_v0 = vpop.eup %4162 }
 0xe1b   : > { %v2556_v56 = vsel %vm2222_vm6, %v4163_v0, 0.0 }
 0xe1c   : > { %v2234_v55 = vpack.c.bf16 %v2233_v54, %v2233_v54 }
 0xe1e   : > { %3806 = vmatmul.mubr.msk.bf16.vlgmr.msra.gmra.mrb[36].mxu1 %vm2222_vm6, %v2234_v55 }
 0xe1f   : > { %3817 = vmatprep.mubr.msk.bf16.mxu1 %vm4679_vm0, %v4677_v3 }
 0xe29   : > { %2557 = vadd.xlane.f32.xlu1 %v2556_v56  ;;  %v3499_v56 = vld [vmem:[%s5835_s21] ss:$0 sm:$0xff] }
 0xe3a   : > { %2562 = vrot.lane.b32.xlu1 %v5504_v62, %s4681_s17 }
 0xe81   : > { %v2339_v57 = vpop.xlane.xlu1 %2338 }
 0xe82   : > { %4164 = vrcp.f32 %v2339_v57 }
 0xe85   : > { %v2454_v1 = vpop.permute.xlu1 %2453 }
 0xe8c   : > { %v4165_v58 = vpop.eup %4164 }
 0xe8d   : > { %v2449_v59 = vpop.xlane.xlu0 %2448  ;;  %v2341_v60 = vmul.f32 %v4165_v58, %v4157_v43  ;;  %v3500_v58 = vld [vmem:[%s5836_s3] ss:$0 sm:$0xff] }
 0xe8e   : > { %4166 = vrcp.f32 %v2449_v59 }
 0xe8f   : > { %v2342_v63 = vpack.c.bf16 %v2341_v60, %v2341_v60 }
 0xe91   : > { %v2345_v61 = vpop.permute.xlu0 %2344 }
 0xe92   : > { %3816 = vmatpush3.bf16.msra.mxu1 %v2345_v61 }
 0xe93   : > { %3827 = vmatprep.subr.bf16.mxu1 %v4677_v3 }
 0xe95   : > { %3818 = vmatmul.mubr.msk.bf16.vlgmr.msra.gmra.mrb[40].mxu1 %vm2222_vm6, %v2342_v63 }
 0xe96   : > { %3828 = vmatpush3.bf16.msra.mxu1 %v2454_v1  ;;  %3829 = vmatprep.mubr.msk.bf16.mxu1 %vm4679_vm0, %v4677_v3 }
 0xe97   : > { %3839 = vmatprep.subr.bf16.mxu1 %v4677_v3 }
 0xe98   : > { %v4167_v62 = vpop.eup %4166 }
 0xe99   : > { %v2451_v51 = vmul.f32 %v4167_v62, %v4159_v45 }
 0xe9b   : > { %v2452_v2 = vpack.c.bf16 %v2451_v51, %v2451_v51 }
 0xe9d   : > { %3830 = vmatmul.mubr.msk.bf16.vlgmr.msra.gmra.mrb[44].mxu1 %vm2222_vm6, %v2452_v2 }
 0xe9e   : > { %3841 = vmatprep.mubr.msk.bf16.mxu1 %vm4679_vm0, %v4677_v3 }
 0xeb6   : > { %v2558_v4 = vpop.xlane.xlu1 %2557 }
 0xeb7   : > { %4168 = vrcp.f32 %v2558_v4 }
 0xeba   : > { %v2563_v5 = vpop.permute.xlu1 %2562 }
 0xebb   : > { %3840 = vmatpush3.bf16.msra.mxu1 %v2563_v5 }
 0xec1   : > { %v4169_v6 = vpop.eup %4168 }
 0xec2   : > { %v2560_v7 = vmul.f32 %v4169_v6, %v4163_v0 }
 0xec4   : > { %v2561_v8 = vpack.c.bf16 %v2560_v7, %v2560_v7 }
 0xec6   : > { %3842 = vmatmul.mubr.msk.bf16.vlgmr.msra.gmra.mrb[48].mxu1 %vm2222_vm6, %v2561_v8 }
 0xef1   : > { %v2272_v9 = vpop.f32.mrb[36].mxu1 }
 0xef2   : > { %v3807_v10 = vpop.f32.mrb[37].mxu1 }
 0xef3   : > { %v2275_v11 = vpop.f32.mrb[38].mxu1 }
 0xef4   : > { %v3808_v12 = vpop.f32.mrb[39].mxu1 }
 0xf68   : > { %v2384_v15 = vpop.f32.mrb[40].mxu1 }
 0xf69   : > { %2609 = vrot.lane.b32.xlu1 %v2384_v15, %s4681_s17  ;;  %v3819_v17 = vpop.f32.mrb[41].mxu1 }
 0xf6a   : > { %v2387_v18 = vpop.f32.mrb[42].mxu1 }
 0xf6b   : > { %v3820_v20 = vpop.f32.mrb[43].mxu1 }
 0xf70   : > { %v2493_v22 = vpop.f32.mrb[44].mxu1 }
 0xf71   : > { %2613 = vrot.lane.b32.xlu0 %v2493_v22, %s4682_s24  ;;  %v3831_v23 = vpop.f32.mrb[45].mxu1 }
 0xf72   : > { %v2496_v24 = vpop.f32.mrb[46].mxu1 }
 0xf73   : > { %v3832_v26 = vpop.f32.mrb[47].mxu1 }
 0xf99   : > { %v2602_v30 = vpop.f32.mrb[48].mxu1 }
 0xf9a   : > { %2617 = vrot.lane.b32.xlu1 %v2602_v30, %s4680_s12  ;;  %v3843_v31 = vpop.f32.mrb[49].mxu1 }
 0xf9b   : > { %v2605_v32 = vpop.f32.mrb[50].mxu1 }
 0xf9c   : > { %v3844_v33 = vpop.f32.mrb[51].mxu1 }
 0xfdb   : > { %v2610_v34 = vpop.permute.xlu1 %2609 }
 0xfdc   : > { %v2620_v36 = vsel %vm1214_vm1, %v2272_v9, %v2610_v34 }
 0xfe3   : > { %v2614_v35 = vpop.permute.xlu0 %2613 }
 0xfe4   : > { %v2621_v37 = vsel %vm1671_vm4, %v2620_v36, %v2614_v35 }
0x100c   : > { %v2618_v38 = vpop.permute.xlu1 %2617 }
0x100d   : > { %v2622_v39 = vsel %vm1673_vm5, %v2621_v37, %v2618_v38 }
0x100e   : > { %v2623_v40 = vpack.c.bf16 %v2622_v39, %v2622_v39 }
0x1010   : > { %3862 = vmatmul.mubr.bf16.vlgmr.msra.gmra.mrb[36].mxu0 %v2623_v40 }
0x10e3   : > { %v2722_v3 = vpop.f32.mrb[36].mxu0 }
0x10e4   : > { %v2728_v42 = vadd.f32 %v2722_v3, %v5445_v48  ;;  %v3863_v43 = vpop.f32.mrb[37].mxu0 }
0x10e5   : > { %v2725_v44 = vpop.f32.mrb[38].mxu0 }
0x10e6   : > { %v2736_v45 = vadd.f32 %v3498_v41, %v2728_v42  ;;  %v3864_v46 = vpop.f32.mrb[39].mxu0 }
0x10e8   : > { %v2773_v47 = vadd.f32 %v3501_v16, %v2736_v45  ;;  %2739 = vadd.xlane.f32.xlu0 %v2736_v45 }
0x10ea   : > { %2774 = vst [vmem:[%s5327_s20] sm:$0xff] %v2773_v47 }
0x1175   : > { %v2740_v49 = vpop.xlane.xlu0 %2739 }
0x1176   : > { %v2741_v50 = vmul.f32 0.0078125, %v2740_v49 }
0x1178   : > { %v2742_v52 = vsub.f32 %v2736_v45, %v2741_v50 }
0x117a   : > { %v2743_v53 = vmul.f32 %v2742_v52, %v2742_v52 }
0x117c   : > { %2744 = vadd.xlane.f32.xlu1 %v2743_v53 }
0x1209   : > { %v2745_v54 = vpop.xlane.xlu1 %2744 }
0x120a   : > { %v2746_v55 = vmul.f32 0.0078125, %v2745_v54 }
0x120c   : > { %v2747_v0 = vadd.f32 1e-05, %v2746_v55 }
0x120e   : > { %4170 = vrsqrt.f32 %v2747_v0 }
0x1218   : > { %v4171_v48 = vpop.eup %4170 }
0x1219   : > { %v2749_v57 = vmul.f32 %v4171_v48, %v2742_v52 }
0x121b   : > { %v2756_v59 = vmul.f32 %v3499_v56, %v2749_v57 }
0x121d   : > { %v2763_v60 = vadd.f32 %v3500_v58, %v2756_v59 }
0x121f   : > { %v2764_v61 = vpack.c.bf16 %v2763_v60, %v2763_v60 }
0x1221   : > { %2765 = vst [vmem:[#allocation2] sm:$0xf] %v2764_v61 }
0x1222 PF: > { %v4172_v63 = vld [vmem:[%s5306_s18 + $0x4] ss:$8 sps:$4 sm:$0xff]   ;;  %v4174_v1 = vld [vmem:[%s5306_s18] ss:$8 sps:$4 sm:$0xff]   ;;  %v4683_v62 = vmov 0   ;;  %v4200_v22 = vld [vmem:[%s5312_s26 + $0x50] sm:$0xff]   ;;  %v2794_v34 = vlaneseq }
0x1223   : > { %2916 = vmatprep.mubr.bf16.mxu0 %v4683_v62  ;;  %2884 = vmatprep.subr.bf16.mxu0 %v4172_v63  ;;  %v4175_v51 = vld [vmem:[%s5306_s18 + $0x14] ss:$8 sps:$4 sm:$0xff]   ;;  %v4177_v2 = vld [vmem:[%s5306_s18 + $0x10] ss:$8 sps:$4 sm:$0xff]   ;;  %v4178_v4 = vld [vmem:[%s5306_s18 + $0x24] ss:$8 sps:$4 sm:$0xff]  }
0x1224   : > { %2885 = vmatpush1.bf16.msra.mxu0 %v4174_v1  ;;  %v4180_v5 = vld [vmem:[%s5306_s18 + $0x20] ss:$8 sps:$4 sm:$0xff]   ;;  %v4181_v6 = vld [vmem:[%s5306_s18 + $0x34] ss:$8 sps:$4 sm:$0xff]   ;;  %v4183_v7 = vld [vmem:[%s5306_s18 + $0x30] ss:$8 sps:$4 sm:$0xff]  }
0x1225   : > { %2886 = vmatprep.subr.bf16.mxu0 %v4175_v51  ;;  %v4184_v8 = vld [vmem:[%s5306_s18 + $0x44] ss:$8 sps:$4 sm:$0xff]   ;;  %v4186_v9 = vld [vmem:[%s5306_s18 + $0x40] ss:$8 sps:$4 sm:$0xff]   ;;  %v4187_v10 = vld [vmem:[%s5306_s18 + $0x54] ss:$8 sps:$4 sm:$0xff]  }
0x1226   : > { %v4189_v11 = vld [vmem:[%s5306_s18 + $0x50] ss:$8 sps:$4 sm:$0xff]   ;;  %v4190_v12 = vld [vmem:[%s5306_s18 + $0x64] ss:$8 sps:$4 sm:$0xff]   ;;  %v4192_v13 = vld [vmem:[%s5306_s18 + $0x60] ss:$8 sps:$4 sm:$0xff]  }
0x1227   : > { %v4193_v14 = vld [vmem:[%s5306_s18 + $0x74] ss:$8 sps:$4 sm:$0xff]   ;;  %v4195_v15 = vld [vmem:[%s5306_s18 + $0x70] ss:$8 sps:$4 sm:$0xff]   ;;  %v4196_v18 = vld [vmem:[%s5312_s26 + $0x40] sm:$0xff]   ;;  %v2795_v35 = vshrl.u32 %v2794_v34, 7 }
0x1228   : > { %2887 = vmatpush1.bf16.msra.mxu0 %v4177_v2  ;;  %v2775_v17 = vld [vmem:[#allocation2] sm:$0xf]  ;;  %v4197_v19 = vld [vmem:[%s5312_s26] sm:$0xff]   ;;  %3627 = vmatprep.subr.bf16.mxu1 %v4196_v18  ;;  %v4201_v23 = vld [vmem:[%s5312_s26 + $0x10] sm:$0xff]   ;;  %s5839_s27 = sld [smem:[#allocation38_spill]]  ;;  %s3166_s9 = sshll.u32 %s5327_s20, 4  ;;  %s5619_s9 = int_to_ptr.vmem [resolvable:$true] %s3166_s9 }
0x1229   : > { %2888 = vmatprep.subr.bf16.mxu0 %v4178_v4  ;;  %v4198_v20 = vld [vmem:[%s5312_s26 + $0x48] sm:$0xff]   ;;  %3628 = vmatpush3.bf16.msra.mxu1 %v4197_v19  ;;  %v4202_v24 = vld [vmem:[%s5312_s26 + $0x58] sm:$0xff]   ;;  %v4204_v26 = vld [vmem:[%s5312_s26 + $0x60] sm:$0xff]   ;;  %v2796_v36 = vsub.s32 0, %v2795_v35  ;;  %v2800_v38 = vsub.s32 1, %v2795_v35  ;;  %s5840_s24 = sld [smem:[#allocation60_spill]] }
0x122a   : > { %v4199_v21 = vld [vmem:[%s5312_s26 + $0x8] sm:$0xff]   ;;  %3629 = vmatprep.subr.bf16.mxu1 %v4198_v20  ;;  %v4203_v25 = vld [vmem:[%s5312_s26 + $0x18] sm:$0xff]   ;;  %v4205_v27 = vld [vmem:[%s5312_s26 + $0x20] sm:$0xff]   ;;  %s3153_s25 = scalar_lea.sflag [#allocation5], %s5271_s2  ;;  %s4508_s23 = scalar_lea.vmem %s5619_s9, 128 }
0x122b   : > { %v4206_v28 = vld [vmem:[%s5312_s26 + $0x68] sm:$0xff]   ;;  %v4208_v30 = vld [vmem:[%s5312_s26 + $0x70] sm:$0xff]   ;;  %v4210_v32 = vld [vmem:[%s5312_s26 + $0x78] sm:$0xff]   ;;  %p4509_p8 = scmp.ne.s32.totalorder %s5619_s9, %s4508_s23  ;;  %s4685_s22 = smov [#allocation19]  }
0x122c   : > { %2889 = vmatpush1.bf16.msra.mxu0 %v4180_v5  ;;  %v4207_v29 = vld [vmem:[%s5312_s26 + $0x28] sm:$0xff]   ;;  %v4209_v31 = vld [vmem:[%s5312_s26 + $0x30] sm:$0xff]   ;;  %v4211_v33 = vld [vmem:[%s5312_s26 + $0x38] sm:$0xff]   ;;  %s5838_s26 = sld [smem:[#allocation31_spill]]  ;;  %s4512_s16 = sshll.u32 %s4685_s22, 4  ;;  %s4513_s16 = int_to_ptr.vmem [resolvable:$false] %s4512_s16 }
0x122d   : > { %2890 = vmatprep.subr.bf16.mxu0 %v4181_v6  ;;  %3630 = vmatpush3.bf16.msra.mxu1 %v4199_v21  ;;  %v2792_v37 = vld [vmem:[%s930_s19] sm:$0x3]  ;;  %s4514_s21 = scalar_lea.vmem %s4513_s16, 256  ;;  %p4515_p3 = scmp.lt.s32.totalorder %s5619_s9, %s4513_s16 }
0x122e   : > { %3631 = vmatprep.subr.bf16.mxu1 %v4200_v22  ;;  %v2797_v39 = vrot.slane %v2792_v37, %v2796_v36  ;;  %v2801_v40 = vrot.slane %v2792_v37, %v2800_v38  ;;  %v4684_v22 = vmov -1.0   ;;  %v2979_v37 = vld [vmem:[%s5327_s20] sm:$0xff]  ;;  %p5842_p2 = scmp.ne.s32.totalorder %s5839_s27, 0  ;;  %p4516_p1 = scmp.lt.s32.totalorder %s4514_s21, %s4508_s23 }
0x122f   : > { %s5841_s7 = smov %s5840_s24 }
0x1230   : > { %2891 = vmatpush1.bf16.msra.mxu0 %v4183_v7  ;;  %p4510_p7 = pnand %p4509_p8, %p5842_p2  ;;  %p4517_p0 = por %p4516_p1, %p4515_p3 }
0x1231   : > { %2892 = vmatprep.subr.bf16.mxu0 %v4184_v8  ;;  %3632 = vmatpush3.bf16.msra.mxu1 %v4201_v23 }
0x1232   : > { %3633 = vmatprep.subr.bf16.mxu1 %v4202_v24  ;;  %s3535_s19 = sshll.u32 %s5838_s26, 7  ;;  %p4511_p11 = pneg %p4510_p7 }
0x1233   : > { %s5617_s12 = scalar_lea.hbm %s5840_s24, %s3535_s19 }
0x1234   : > { %2893 = vmatpush1.bf16.msra.mxu0 %v4186_v9  ;;  %p4518_p13 = pnand %p4517_p0, %p4511_p11 }
0x1235   : > { %2894 = vmatprep.subr.bf16.mxu0 %v4187_v10  ;;  %3634 = vmatpush3.bf16.msra.mxu1 %v4203_v25 }
0x1236   : > { %3635 = vmatprep.subr.bf16.mxu1 %v4204_v26 }
0x1238   : > { %2895 = vmatpush1.bf16.msra.mxu0 %v4189_v11 }
0x1239   : > { %2896 = vmatprep.subr.bf16.mxu0 %v4190_v12  ;;  %3636 = vmatpush3.bf16.msra.mxu1 %v4205_v27 }
0x123a   : > { %3637 = vmatprep.subr.bf16.mxu1 %v4206_v28 }
0x123c   : > { %2897 = vmatpush1.bf16.msra.mxu0 %v4192_v13 }
0x123d   : > { %2898 = vmatprep.subr.bf16.mxu0 %v4193_v14  ;;  %3638 = vmatpush3.bf16.msra.mxu1 %v4207_v29 }
0x123e   : > { %3639 = vmatprep.subr.bf16.mxu1 %v4208_v30 }
0x1240   : > { %2899 = vmatpush1.bf16.msra.mxu0 %v4195_v15 }
0x1241   : > { %3640 = vmatpush3.bf16.msra.mxu1 %v4209_v31 }
0x1242   : > { %3641 = vmatprep.subr.bf16.mxu1 %v4210_v32 }
0x1243   : > { %2917 = vmatmul.mubr.bf16.vlgmr.msra.gmra.mrb[0].mxu0 %v2775_v17 }
0x1245   : > { %3642 = vmatpush3.bf16.msra.mxu1 %v4211_v33 }
0x1316   : > { %v2918_v3 = vpop.f32.mrb[0].mxu0 }
0x1317   : > { %v2919_v41 = vadd.f32 %v2918_v3, %v2797_v39  ;;  %v2920_v42 = vpop.f32.mrb[1].mxu0 }
0x1318   : > { %v2921_v43 = vadd.f32 %v2920_v42, %v2801_v40  ;;  %v2922_v16 = vpop.f32.mrb[2].mxu0 }
0x1319   : > { %v2927_v44 = vmul.f32 0.70710677, %v2919_v41  ;;  %v2923_v45 = vpop.f32.mrb[3].mxu0  ;;  %v2925_v28 = vmul.f32 0.5, %v2919_v41 }
0x131a   : > { %v2928_v46 = vmul.f32 0.70710677, %v2921_v43  ;;  %v2926_v30 = vmul.f32 0.5, %v2921_v43 }
0x131b   : > { %v2933_v47 = vand.u32 2147483647, %v2927_v44  ;;  %vm2929_vm7 = vcmp.ge.f32.partialorder %v2927_v44, 0.0 }
0x131c   : > { %v2934_v49 = vand.u32 2147483647, %v2928_v46  ;;  %vm2930_vm8 = vcmp.ge.f32.partialorder %v2928_v46, 0.0  ;;  %v2931_v23 = vsel %vm2929_vm7, 1.0, %v4684_v22 }
0x131d   : > { %v2935_v50 = vmul.f32 0.3275911, %v2933_v47  ;;  %v2961_v55 = vsub.f32 0.0, %v2933_v47  ;;  %v2932_v25 = vsel %vm2930_vm8, 1.0, %v4684_v22 }
0x131e   : > { %v2936_v52 = vmul.f32 0.3275911, %v2934_v49  ;;  %v2962_v0 = vsub.f32 0.0, %v2934_v49 }
0x131f   : > { %v2937_v53 = vadd.f32 1.0, %v2935_v50  ;;  %v2963_v56 = vmul.f32 %v2961_v55, %v2933_v47 }
0x1320   : > { %v2938_v54 = vadd.f32 1.0, %v2936_v52  ;;  %v2964_v58 = vmul.f32 %v2962_v0, %v2934_v49 }
0x1321   : > { %4212 = vrcp.f32 %v2937_v53  ;;  %v2965_v63 = vmul.f32 1.442695, %v2963_v56 }
0x1322   : > { %4214 = vrcp.f32 %v2938_v54  ;;  %v2967_v62 = vmul.f32 1.442695, %v2964_v58 }
0x1323   : > { %4216 = vpow2.f32 %v2965_v63 }
0x1324   : > { %4218 = vpow2.f32 %v2967_v62 }
0x132b   : > { %v4213_v48 = vpop.eup %4212 }
0x132c   : > { %v4215_v57 = vpop.eup %4214  ;;  %v2943_v59 = vmul.f32 1.0614054, %v4213_v48 }
0x132d   : > { %v2944_v60 = vmul.f32 1.0614054, %v4215_v57  ;;  %v4217_v15 = vpop.eup %4216 }
0x132e   : > { %v2945_v61 = vadd.f32 -1.4531521, %v2943_v59  ;;  %v4219_v18 = vpop.eup %4218 }
0x132f   : > { %v2946_v1 = vadd.f32 -1.4531521, %v2944_v60 }
0x1330   : > { %v2947_v51 = vmul.f32 %v4213_v48, %v2945_v61 }
0x1331   : > { %v2948_v2 = vmul.f32 %v4215_v57, %v2946_v1 }
0x1332   : > { %v2949_v4 = vadd.f32 1.4214138, %v2947_v51 }
0x1333   : > { %v2950_v5 = vadd.f32 1.4214138, %v2948_v2 }
0x1334   : > { %v2951_v6 = vmul.f32 %v4213_v48, %v2949_v4 }
0x1335   : > { %v2952_v7 = vmul.f32 %v4215_v57, %v2950_v5 }
0x1336   : > { %v2953_v8 = vadd.f32 -0.28449672, %v2951_v6 }
0x1337   : > { %v2954_v9 = vadd.f32 -0.28449672, %v2952_v7 }
0x1338   : > { %v2955_v10 = vmul.f32 %v4213_v48, %v2953_v8 }
0x1339   : > { %v2956_v11 = vmul.f32 %v4215_v57, %v2954_v9 }
0x133a   : > { %v2957_v12 = vadd.f32 0.2548296, %v2955_v10 }
0x133b   : > { %v2958_v13 = vadd.f32 0.2548296, %v2956_v11 }
0x133c   : > { %v2959_v14 = vmul.f32 %v4213_v48, %v2957_v12 }
0x133d   : > { %v2960_v17 = vmul.f32 %v4215_v57, %v2958_v13 }
0x133e   : > { %v2969_v19 = vmul.f32 %v4217_v15, %v2959_v14 }
0x133f   : > { %v2970_v20 = vmul.f32 %v4219_v18, %v2960_v17 }
0x1340   : > { %v2971_v21 = vsub.f32 1.0, %v2969_v19 }
0x1341   : > { %v2972_v24 = vsub.f32 1.0, %v2970_v20 }
0x1342   : > { %v2973_v26 = vmul.f32 %v2971_v21, %v2931_v23 }
0x1343   : > { %v2974_v27 = vmul.f32 %v2972_v24, %v2932_v25 }
0x1344   : > { %v2975_v29 = vadd.f32 1.0, %v2973_v26 }
0x1345   : > { %v2976_v31 = vadd.f32 1.0, %v2974_v27 }
0x1346   : > { %v2977_v32 = vmul.f32 %v2975_v29, %v2925_v28 }
0x1347   : > { %v2978_v33 = vmul.f32 %v2976_v31, %v2926_v30 }
0x1348   : > { %v2980_v35 = vpack.c.bf16 %v2977_v32, %v2977_v32 }
0x1349   : > { %v2981_v34 = vpack.c.bf16 %v2978_v33, %v2978_v33 }
0x134b   : > { %3142 = vmatprep.mubr.bf16.mxu1 %v2981_v34 }
0x134c   : > { %3143 = vmatmul.mubr.bf16.vlgmr.msra.gmra.mrb[0].mxu1 %v2980_v35 }
0x141f   : > { %v3643_v36 = vpop.f32.mrb[0].mxu1 }
0x1420   : > { %v3644_v38 = vpop.f32.mrb[1].mxu1 }
0x1421   : > { %v3645_v39 = vadd.f32 %v3644_v38, %v3643_v36  ;;  %v3646_v40 = vpop.f32.mrb[2].mxu1 }
0x1422   : > { %v3647_v3 = vpop.f32.mrb[3].mxu1 }
0x1423   : > { %v3150_v41 = vadd.f32 %v3645_v39, %v2979_v37 }
0x1425   : > { %3151 = vst [vmem:[%s5327_s20] sm:$0xff] %v3150_v41 }
0x1426   : > { %4521 = shalt.err (!%p4518_p13)
}
0x1427   : > { %s4522_s2 = scalar_lea.hbm %s5617_s12, 128  ;;  %s4526_s11 = scalar_lea.hbm %s5841_s7, 256 }
0x1428   : > { %p4523_p9 = scmp.ne.s32.totalorder %s5617_s12, %s4522_s2  ;;  %p4527_p5 = scmp.lt.u32.totalorder %s5617_s12, %s5841_s7 }
0x1429   : > { %p4528_p12 = scmp.lt.u32.totalorder %s4526_s11, %s4522_s2  ;;  %p4530_p8 = scmp.lt.u32.totalorder %s4522_s2, %s5617_s12 }
0x142a   : > { %p4524_p4 = pnand %p4523_p9, %p5842_p2 }
0x142b   : > { %p4529_p6 = por %p4528_p12, %p4527_p5 }
0x142c   : > { %p4525_p10 = pneg %p4524_p4 }
0x142d   : > { %p4531_p7 = por %p4530_p8, %p4529_p6 }
0x142f   : > { %p4532_p11 = pnand %p4531_p7, %p4525_p10 }
0x1431   : > { %4535 = shalt.err (!%p4532_p11)
}
0x1432   : > { %3897 = dma.vmem_to_hbm [thread:$0]  (%p5842_p2), %s5619_s9, 128, %s5617_s12, %s3153_s25  }
0x1433 PF: > { %s5843_s30 = sld [smem:[#allocation29_spill]]  ;;  %s5844_s10 = sld [smem:[#allocation39_spill]] }
0x1434   : > { %p3948_p3 = scmp.ge.s32.totalorder %s4658_s6, 2 }
0x1439   : > { %s3178_s26 = sand.u32 1, %s5843_s30   ;;  %p5845_p1 = scmp.ne.s32.totalorder %s5844_s10, 0 }
0x143a   : > { %s3179_s19 = scalar_lea.sflag [#allocation5], %s3178_s26 }
0x143b   : > { %p3932_p0 = pnand %p3948_p3, %p5845_p1 }
0x143d   : > { %4613 = dma.done.wait (!%p3932_p0), %s3179_s19, 128  }
0x143e   : > { %4615 = vsyncadd (!%p3932_p0), %s3179_s19, 4294967168  ;;  %s44_s6 = sadd.s32 1, %s4658_s6   ;;  %s5846_s27 = sld [smem:[#allocation36_spill]] }
0x143f   : > { %p41_p13 = scmp.ge.s32.totalorder %s44_s6, 6   ;;  %s5847_s9 = sld [smem:[#allocation37_spill]] }
0x1440   : > { %s5848_s1 = sld [smem:[#allocation32_spill]]  ;;  %s5849_s17 = sld [smem:[#allocation34_spill]] }
0x1441   : > { %s5850_s24 = sld [smem:[#allocation35_spill]]  ;;  %s5851_s3 = smov %s4622_s28 }
0x1442   : > { %s5852_s28 = smov %s4626_s29  ;;  %s5854_s30 = smov %s4634_s4 }
0x1443   : > { %s5855_s4 = smov %s4638_s0  ;;  %s5857_s23 = smov %s4650_s5 }
0x1444   : > { %s5853_s29 = smov %s5846_s27  ;;  %43 = sbr.rel (!%p41_p13) target bundleno = 36 (0x24), region = 219 }
0x1445   : > { %s5856_s0 = smov %s5847_s9 }
0x1446   : > { %s5858_s5 = smov %s5849_s17 }
0x144b   :  { %3184 = vsyncpa [#allocation4], 1 }
0x144c   :  { %3186 = vsyncpa [#allocation4 + $0x1], 1 }
0x144d   :  { %3187 = vsyncpa [#allocation7], 1 }
0x144e   :  { %3189 = vsyncpa [#allocation7 + $0x1], 1 }
0x144f   :  { %3190 = vsyncpa [#allocation10], 1 }
0x1450   :  { %3191 = vsyncpa [#allocation13], 1 }
0x1451   :  { %3192 = vsyncpa [#allocation16], 1 }
0x1452   :  { %3193 = vsyncpa [#allocation5], 1 }
0x1453   :  { %3195 = vsyncpa [#allocation5 + $0x1], 1 }

</bundles_post_ra>
